<compile_context>
chip_gen: v7x
topology: tpu7x:2x2x1
jax: 0.10.0
libtpu: 0.0.40
codegen_flags: <defaults>
</compile_context>

<pallas_src>
import jax
import jax.numpy as jnp
from jax import lax
from jax.experimental import pallas as pl
from jax.experimental.pallas import tpu as pltpu


# ------------------------------ small helpers --------------------------------

def _round_up(x, m):
    return (x + m - 1) // m * m


def _choose_tm(M, bytes_per_row):
    """Row-tile size: big tiles amortize per-step overhead (~0.35us/step), but
    keep >=2 grid steps for v7x's two TensorCores and keep the double-buffered
    working set well under the 64 MiB v7x VMEM budget."""
    tm = 512 if M >= 1024 else _round_up(max(1, (M + 1) // 2), 16)
    while tm > 16 and 2 * tm * bytes_per_row > (12 << 20):
        tm = _round_up(tm // 2, 16)
    # TODO(synk): for very large K (=9*Cin at real C3 widths) add a K grid axis
    # with a VMEM accumulator instead of shrinking tm.
    return min(tm, _round_up(M, 16))


def _w1x1(w_oihw):
    """(Cout, Cin, 1, 1) torch conv weight -> (Cin, Cout) matmul weight."""
    return jnp.transpose(w_oihw[:, :, 0, 0], (1, 0))


# --------------------------- fused matmul kernel ------------------------------

def _mm_kernel(n_in, apply_silu, has_residual, out_widths):
    """y = [silu](sum_i x_i @ w_i) [+ residual], written to one or more outputs
    (lane slices of the accumulator).  All math in f32; store downcasts."""
    def kernel(*refs):
        x_refs = refs[:n_in]
        w_refs = refs[n_in:2 * n_in]
        idx = 2 * n_in
        r_ref = refs[idx] if has_residual else None
        o_refs = refs[idx + (1 if has_residual else 0):]

        acc = jnp.dot(x_refs[0][...], w_refs[0][...],
                      preferred_element_type=jnp.float32)
        for i in range(1, n_in):
            acc = acc + jnp.dot(x_refs[i][...], w_refs[i][...],
                                preferred_element_type=jnp.float32)
        if apply_silu:
            acc = acc * jax.nn.sigmoid(acc)          # SiLU (f32, EUP)
        if has_residual:
            acc = acc + r_ref[...].astype(jnp.float32)
        off = 0
        for o_ref, w_ in zip(o_refs, out_widths):
            o_ref[...] = acc[:, off:off + w_].astype(o_ref.dtype)
            off += w_
    return kernel


def fused_matmul(xs, ws, *, residual=None, apply_silu=True,
                 out_dtype=jnp.bfloat16, out_splits=None):
    """Row-tiled Pallas matmul: act(sum_i xs[i] @ ws[i]) [+ residual].

    xs[i]: (M, K_i), ws[i]: (K_i, Cout).  Inputs/weights are cast to bf16 before
    the call (halves HBM/VMEM traffic, native MXU rate); accumulation, SiLU and
    the residual add stay in f32.  `out_splits` splits Cout into several outputs
    straight from the kernel (used for the fused cv1+cv2).
    """
    M = xs[0].shape[0]
    Cout = ws[0].shape[1]
    out_widths = tuple(out_splits) if out_splits is not None else (Cout,)
    assert sum(out_widths) == Cout

    xs = [x.astype(jnp.bfloat16) for x in xs]
    ws = [w.astype(jnp.bfloat16) for w in ws]
    if residual is not None:
        residual = residual.astype(jnp.bfloat16)

    out_bytes = jnp.dtype(out_dtype).itemsize
    bytes_per_row = (sum(x.shape[1] * 2 for x in xs)
                     + Cout * (4 + out_bytes)
                     + (Cout * 2 if residual is not None else 0))
    tm = _choose_tm(M, bytes_per_row)
    M_pad = _round_up(M, tm)
    if M_pad != M:                                   # masked tail via zero padding
        xs = [jnp.pad(x, ((0, M_pad - M), (0, 0))) for x in xs]
        if residual is not None:
            residual = jnp.pad(residual, ((0, M_pad - M), (0, 0)))
    grid = (M_pad // tm,)

    in_specs = [pl.BlockSpec((tm, x.shape[1]), lambda i: (i, 0)) for x in xs]
    in_specs += [pl.BlockSpec(w.shape, lambda i: (0, 0)) for w in ws]
    args = list(xs) + list(ws)
    if residual is not None:
        in_specs.append(pl.BlockSpec((tm, Cout), lambda i: (i, 0)))
        args.append(residual)

    out_shape = tuple(jax.ShapeDtypeStruct((M_pad, w_), out_dtype)
                      for w_ in out_widths)
    out_specs = [pl.BlockSpec((tm, w_), lambda i: (i, 0)) for w_ in out_widths]

    outs = pl.pallas_call(
        _mm_kernel(len(xs), apply_silu, residual is not None, out_widths),
        out_shape=out_shape,
        grid_spec=pltpu.PrefetchScalarGridSpec(
            num_scalar_prefetch=0,
            grid=grid,
            in_specs=in_specs,
            out_specs=out_specs),
        compiler_params=pltpu.CompilerParams(dimension_semantics=("parallel",)),
    )(*args)
    outs = tuple(o[:M] for o in outs) if M_pad != M else tuple(outs)
    return outs if out_splits is not None else outs[0]


# --------------------------- 3x3 conv kernel ----------------------------------

def _conv3x3_kernel(H, W, C3, Cout, apply_silu, has_residual):
    """3x3, stride 1, pad 1 conv for one batch element.  Input block is the
    W-pre-shifted, channel-concatenated image (1, H+2, W, 3*Cin); the three kh
    taps are accumulated as (H*W, 3*Cin) x (3*Cin, Cout) MXU matmuls."""
    def kernel(*refs):
        if has_residual:
            x_ref, w_ref, r_ref, o_ref = refs
        else:
            x_ref, w_ref, o_ref = refs
        acc = jnp.zeros((H * W, Cout), jnp.float32)
        for dh in range(3):                          # static unroll of kh taps
            # Slice a leading dim (layout-free) and collapse it into the
            # 16-aligned sublane dim (W % 16 == 0 guaranteed by the gate).
            slab = x_ref[0, dh:dh + H, :, :].reshape(H * W, C3)
            acc = acc + jnp.dot(slab, w_ref[dh],
                                preferred_element_type=jnp.float32)
        if apply_silu:
            acc = acc * jax.nn.sigmoid(acc)
        if has_residual:
            acc = acc + r_ref[...].astype(jnp.float32)
        o_ref[...] = acc.astype(o_ref.dtype)
    return kernel


def _use_direct_3x3(H, W, Cin, Cout):
    """Use the direct kernel when the (H,W)->(H*W) collapse is layout-clean and
    the per-batch working set fits comfortably in VMEM."""
    if W % 16 != 0:
        return False
    hw, c3 = H * W, 3 * Cin
    need = (2 * (H + 2) * W * c3 * 2                 # double-buffered bf16 feats block
            + 2 * 3 * c3 * Cout * 2                  # weights
            + 2 * hw * Cout * 2                      # residual block
            + 2 * hw * Cout * 4                      # double-buffered output block
            + hw * c3 * 2                            # one tap slab
            + hw * Cout * 4)                         # f32 accumulator
    return need <= (16 << 20)


def _im2col_3x3(x_nhwc):
    """Fallback only: 3x3/s1/p1 patches, feature order (kh, kw, cin)."""
    N, H, W, C = x_nhwc.shape
    xp = jnp.pad(x_nhwc, ((0, 0), (1, 1), (1, 1), (0, 0)))
    patches = [xp[:, dh:dh + H, dw:dw + W, :] for dh in range(3) for dw in range(3)]
    return jnp.concatenate(patches, axis=-1)


def conv3x3_block(x2d, w_oihw, N, H, W, *, gn=True, residual2d=None):
    """ConvBlock with a 3x3 conv: conv -> GroupNorm-or-Identity -> SiLU [+res]."""
    Cin = x2d.shape[1]
    Cout = w_oihw.shape[0]
    HW = H * W
    use_gn = gn and (Cout // 8) >= 16
    w_hwio = jnp.transpose(w_oihw, (2, 3, 1, 0))     # (3, 3, Cin, Cout)

    if _use_direct_3x3(H, W, Cin, Cout):
        # Pre-materialize only the three W-shifts (3x input bytes); the kh taps
        # are sliced inside the kernel, so the 9x im2col never touches HBM.
        xp = jnp.pad(x2d.reshape(N, H, W, Cin).astype(jnp.bfloat16),
                     ((0, 0), (1, 1), (1, 1), (0, 0)))
        feats = jnp.concatenate([xp[:, :, dw:dw + W, :] for dw in range(3)],
                                axis=-1)             # (N, H+2, W, 3*Cin)
        w3 = w_hwio.reshape(3, 3 * Cin, Cout).astype(jnp.bfloat16)
        fuse_act = not use_gn
        res = residual2d if (fuse_act and residual2d is not None) else None

        in_specs = [pl.BlockSpec((1, H + 2, W, 3 * Cin), lambda n: (n, 0, 0, 0)),
                    pl.BlockSpec((3, 3 * Cin, Cout), lambda n: (0, 0, 0))]
        args = [feats, w3]
        if res is not None:
            in_specs.append(pl.BlockSpec((HW, Cout), lambda n: (n, 0)))
            args.append(res.astype(jnp.bfloat16))
        out_dtype = jnp.bfloat16 if fuse_act else jnp.float32

        y2d = pl.pallas_call(
            _conv3x3_kernel(H, W, 3 * Cin, Cout, fuse_act, res is not None),
            out_shape=jax.ShapeDtypeStruct((N * HW, Cout), out_dtype),
            grid_spec=pltpu.PrefetchScalarGridSpec(
                num_scalar_prefetch=0,
                grid=(N,),
                in_specs=in_specs,
                out_specs=pl.BlockSpec((HW, Cout), lambda n: (n, 0))),
            compiler_params=pltpu.CompilerParams(
                dimension_semantics=("parallel",)),
        )(*args)
        if not use_gn:
            return y2d                               # SiLU + residual already fused
        y2d = _gn_silu(y2d, N, HW, Cout // 8)
    else:
        # Fallback: bf16 im2col + row-tiled fused matmul.
        x4 = x2d.reshape(N, H, W, Cin).astype(jnp.bfloat16)
        feats = _im2col_3x3(x4).reshape(N * HW, 9 * Cin)
        w2d = w_hwio.reshape(9 * Cin, Cout)
        if not use_gn:
            return fused_matmul([feats], [w2d], residual=residual2d, apply_silu=True)
        pre = fused_matmul([feats], [w2d], apply_silu=False, out_dtype=jnp.float32)
        y2d = _gn_silu(pre, N, HW, Cout // 8)

    if residual2d is not None:                       # GroupNorm path: add after act
        y2d = (y2d.astype(jnp.float32)
               + residual2d.astype(jnp.float32)).astype(jnp.bfloat16)
    return y2d


# ------------------------------ GroupNorm tail --------------------------------

def _gn_silu(y2d, N, HW, n_groups, out_dtype=jnp.bfloat16):
    # TODO(synk): GroupNorm reduction kept in plain JAX; it only triggers when
    # out_channels >= 128, which the small synthetic shapes never exercise.
    C = y2d.shape[1]
    y = y2d.astype(jnp.float32).reshape(N, HW, n_groups, C // n_groups)
    mean = y.mean(axis=(1, 3), keepdims=True)
    var = y.var(axis=(1, 3), keepdims=True)
    y = ((y - mean) / jnp.sqrt(var + 1e-5)).reshape(N * HW, C)
    y = y * jax.nn.sigmoid(y)
    return y.astype(out_dtype)


# --------------------------------- C3 forward ---------------------------------

def c3_forward(x_nchw, params, shortcut=True, gn=True):
    """C3.forward: cv3(cat(m(cv1(x)), cv2(x), dim=channels))."""
    N, Cin, H, W = x_nchw.shape
    HW = H * W
    ch = params["cv1"].shape[0]
    c2 = params["cv3"].shape[0]
    use_gn_ch = gn and (ch // 8) >= 16
    use_gn_c2 = gn and (c2 // 8) >= 16

    # NCHW -> NHWC once; activations stay as flat bf16 (N*H*W, C) rows after this.
    x2d = jnp.transpose(x_nchw, (0, 2, 3, 1)).reshape(N * HW, Cin).astype(jnp.bfloat16)

    # cv1 & cv2 share the input x: one matmul, two outputs (x read once).
    w12 = jnp.concatenate([_w1x1(params["cv1"]), _w1x1(params["cv2"])], axis=1)
    if use_gn_ch:
        a_pre, b_pre = fused_matmul([x2d], [w12], apply_silu=False,
                                    out_dtype=jnp.float32, out_splits=(ch, ch))
        a2d = _gn_silu(a_pre, N, HW, ch // 8)
        b2d = _gn_silu(b_pre, N, HW, ch // 8)
    else:
        a2d, b2d = fused_matmul([x2d], [w12], apply_silu=True, out_splits=(ch, ch))

    # Bottleneck chain: a = a + silu(conv3x3(silu(conv1x1(a))))   (shortcut=True)
    for bw in params["m"]:
        if use_gn_ch:
            h_pre = fused_matmul([a2d], [_w1x1(bw["cv1"])], apply_silu=False,
                                 out_dtype=jnp.float32)
            h2d = _gn_silu(h_pre, N, HW, ch // 8)
        else:
            h2d = fused_matmul([a2d], [_w1x1(bw["cv1"])], apply_silu=True)

        res = a2d if shortcut else None
        if bw["cv2"].shape[-1] == 3:                 # spatial Bottleneck
            a2d = conv3x3_block(h2d, bw["cv2"], N, H, W, gn=gn, residual2d=res)
        else:                                        # 1x1 Bottleneck (spatial=False)
            if use_gn_ch:
                pre = fused_matmul([h2d], [_w1x1(bw["cv2"])], apply_silu=False,
                                   out_dtype=jnp.float32)
                y = _gn_silu(pre, N, HW, ch // 8)
                a2d = ((y.astype(jnp.float32) + res.astype(jnp.float32))
                       .astype(jnp.bfloat16) if res is not None else y)
            else:
                a2d = fused_matmul([h2d], [_w1x1(bw["cv2"])],
                                   residual=res, apply_silu=True)

    # cv3 over the (virtual) channel concat of (a, b): split K, never materialize cat.
    w3 = _w1x1(params["cv3"])
    w3a, w3b = w3[:ch], w3[ch:]
    if use_gn_c2:
        pre = fused_matmul([a2d, b2d], [w3a, w3b], apply_silu=False,
                           out_dtype=jnp.float32)
        y2d = _gn_silu(pre, N, HW, c2 // 8, out_dtype=jnp.float32)
    else:
        y2d = fused_matmul([a2d, b2d], [w3a, w3b], apply_silu=True,
                           out_dtype=jnp.float32)

    return jnp.transpose(y2d.reshape(N, H, W, c2), (0, 3, 1, 2))   # back to NCHW


# ------------------------- deterministic parameters ---------------------------

def init_c3_params(key, c1, c2, n=1, e=0.5, spatial=True):
    ch = int(c2 * e)
    keys = jax.random.split(key, 3 + 2 * n)

    def w(k, cout, cin, ks):
        scale = 1.0 / jnp.sqrt(jnp.float32(cin * ks * ks))
        return scale * jax.random.normal(k, (cout, cin, ks, ks), jnp.float32)

    params = {
        "cv1": w(keys[0], ch, c1, 1),
        "cv2": w(keys[1], ch, c1, 1),
        "cv3": w(keys[2], c2, 2 * ch, 1),
        "m": [],
    }
    ksm = 3 if spatial else 1
    for i in range(n):
        params["m"].append({
            "cv1": w(keys[3 + 2 * i], ch, ch, 1),
            "cv2": w(keys[4 + 2 * i], ch, ch, ksm),
        })
    return params


# ------------------------------ pure-JAX reference ----------------------------
# Emulates the kernels' numeric policy (bf16 storage of weights / inter-block
# activations, f32 accumulation and SiLU) so the comparison stays tight.

def _q(t):
    return t.astype(jnp.bfloat16).astype(jnp.float32)


def _conv_block_ref(x, w, gn=True):
    ks = w.shape[-1]
    pad = (ks - 1) // 2
    y = lax.conv_general_dilated(_q(x), _q(w), (1, 1), [(pad, pad), (pad, pad)],
                                 dimension_numbers=("NCHW", "OIHW", "NCHW"))
    Cout = w.shape[0]
    ng = Cout // 8
    if gn and ng >= 16:
        N, C, H, W = y.shape
        yg = y.reshape(N, ng, C // ng, H, W)
        mean = yg.mean(axis=(2, 3, 4), keepdims=True)
        var = yg.var(axis=(2, 3, 4), keepdims=True)
        y = ((yg - mean) / jnp.sqrt(var + 1e-5)).reshape(N, C, H, W)
    return y * jax.nn.sigmoid(y)


def _c3_ref(x, p, shortcut=True, gn=True):
    a = _q(_conv_block_ref(x, p["cv1"], gn))
    b = _q(_conv_block_ref(x, p["cv2"], gn))
    for bw in p["m"]:
        h = _q(_conv_block_ref(a, bw["cv1"], gn))
        out = _conv_block_ref(h, bw["cv2"], gn)
        a = _q(out + a) if shortcut else _q(out)
    return _conv_block_ref(jnp.concatenate([a, b], axis=1), p["cv3"], gn)


# ----------------------------------- main --------------------------------------

if __name__ == "__main__":
    key = jax.random.PRNGKey(0)
    kx, kp = jax.random.split(key)

    # x: NCHW, matching nn.Conv2d input convention.
    x = jax.random.normal(kx, (2, 4, 16, 16), jnp.float32)
    params = init_c3_params(kp, c1=4, c2=4, n=1, e=0.5)

    y = jax.jit(c3_forward)(x, params)
    jax.block_until_ready(y)

    y_ref = _c3_ref(x, params)
    assert y.shape == (2, 4, 16, 16), y.shape
    max_err = jnp.max(jnp.abs(y - y_ref))
    assert jnp.allclose(y, y_ref, atol=2e-2, rtol=2e-2), f"mismatch vs reference (max abs err {max_err})"

    print("KERNEL_OK")
</pallas_src>

<mosaic_0001>
module attributes {stable_mosaic.version = 11 : i64} {
  func.func @kernel(%arg0: i32, %arg1: memref<256x2xbf16, #tpu.memory_space<vmem>>, %arg2: memref<2x2xbf16, #tpu.memory_space<vmem>>, %arg3: memref<256x2xbf16, #tpu.memory_space<vmem>>) attributes {dimension_semantics = [#tpu.dimension_semantics<parallel>], iteration_bounds = array<i64: 2>, scalar_prefetch = 0 : i64, scratch_operands = 0 : i64, tpu.core_type = #tpu.core_type<tc>, window_params = [{transform_indices = @transform_0, window_bounds = array<i64: 256, 2>}, {pipeline_mode = #tpu.pipeline_mode<synchronous>, transform_indices = @transform_1, window_bounds = array<i64: 2, 2>}, {transform_indices = @transform_2, window_bounds = array<i64: 256, 2>}]} {
    %c0 = arith.constant 0 : index
    %c0_0 = arith.constant 0 : index
    %0 = vector.load %arg1[%c0, %c0_0] : memref<256x2xbf16, #tpu.memory_space<vmem>>, vector<256x2xbf16>
    %c0_1 = arith.constant 0 : index
    %c0_2 = arith.constant 0 : index
    %1 = vector.load %arg2[%c0_1, %c0_2] : memref<2x2xbf16, #tpu.memory_space<vmem>>, vector<2x2xbf16>
    %cst = arith.constant dense<0.000000e+00> : vector<256x2xf32>
    %2 = tpu.matmul %0, %1, %cst {dimension_numbers = #tpu.dot_dimension_numbers<[1], [0], [0], [1], [0, 0, 1, 1], [], []>} : vector<256x2xbf16>, vector<2x2xbf16>, vector<256x2xf32> -> vector<256x2xf32>
    %3 = arith.negf %2 : vector<256x2xf32>
    %4 = math.exp %3 : vector<256x2xf32>
    %cst_3 = arith.constant 1.000000e+00 : f32
    %5 = vector.broadcast %cst_3 : f32 to vector<256x2xf32>
    %6 = arith.addf %5, %4 : vector<256x2xf32>
    %7 = arith.divf %5, %6 : vector<256x2xf32>
    %8 = arith.mulf %2, %7 : vector<256x2xf32>
    %9 = arith.truncf %8 : vector<256x2xf32> to vector<256x2xbf16>
    %c0_4 = arith.constant 0 : index
    %c0_5 = arith.constant 0 : index
    %10 = vector.load %arg3[%c0_4, %c0_5] : memref<256x2xbf16, #tpu.memory_space<vmem>>, vector<256x2xbf16>
    tpu.vector_store %arg3[%c0_4, %c0_5], %9 {strides = array<i32>} : memref<256x2xbf16, #tpu.memory_space<vmem>>, vector<256x2xbf16>,
    return
  }
  func.func @transform_0(%arg0: i32) -> (i32, i32) {
    %c0_i32 = arith.constant 0 : i32
    %c0_i32_0 = arith.constant 0 : i32
    return %arg0, %c0_i32 : i32, i32
  }
  func.func @transform_1(%arg0: i32) -> (i32, i32) {
    %c0_i32 = arith.constant 0 : i32
    %c0_i32_0 = arith.constant 0 : i32
    %c0_i32_1 = arith.constant 0 : i32
    return %c0_i32, %c0_i32_0 : i32, i32
  }
  func.func @transform_2(%arg0: i32) -> (i32, i32) {
    %c0_i32 = arith.constant 0 : i32
    %c0_i32_0 = arith.constant 0 : i32
    return %arg0, %c0_i32 : i32, i32
  }
}

module attributes {stable_mosaic.version = 11 : i64} {
  func.func @kernel(%arg0: i32, %arg1: memref<256x4xbf16, #tpu.memory_space<vmem>>, %arg2: memref<4x4xbf16, #tpu.memory_space<vmem>>, %arg3: memref<256x2xbf16, #tpu.memory_space<vmem>>, %arg4: memref<256x2xbf16, #tpu.memory_space<vmem>>) attributes {dimension_semantics = [#tpu.dimension_semantics<parallel>], iteration_bounds = array<i64: 2>, scalar_prefetch = 0 : i64, scratch_operands = 0 : i64, tpu.core_type = #tpu.core_type<tc>, window_params = [{transform_indices = @transform_0, window_bounds = array<i64: 256, 4>}, {pipeline_mode = #tpu.pipeline_mode<synchronous>, transform_indices = @transform_1, window_bounds = array<i64: 4, 4>}, {transform_indices = @transform_2, window_bounds = array<i64: 256, 2>}, {transform_indices = @transform_3, window_bounds = array<i64: 256, 2>}]} {
    %c0 = arith.constant 0 : index
    %c0_0 = arith.constant 0 : index
    %0 = vector.load %arg1[%c0, %c0_0] : memref<256x4xbf16, #tpu.memory_space<vmem>>, vector<256x4xbf16>
    %c0_1 = arith.constant 0 : index
    %c0_2 = arith.constant 0 : index
    %1 = vector.load %arg2[%c0_1, %c0_2] : memref<4x4xbf16, #tpu.memory_space<vmem>>, vector<4x4xbf16>
    %cst = arith.constant dense<0.000000e+00> : vector<256x4xf32>
    %2 = tpu.matmul %0, %1, %cst {dimension_numbers = #tpu.dot_dimension_numbers<[1], [0], [0], [1], [0, 0, 1, 1], [], []>} : vector<256x4xbf16>, vector<4x4xbf16>, vector<256x4xf32> -> vector<256x4xf32>
    %3 = arith.negf %2 : vector<256x4xf32>
    %4 = math.exp %3 : vector<256x4xf32>
    %cst_3 = arith.constant 1.000000e+00 : f32
    %5 = vector.broadcast %cst_3 : f32 to vector<256x4xf32>
    %6 = arith.addf %5, %4 : vector<256x4xf32>
    %7 = arith.divf %5, %6 : vector<256x4xf32>
    %8 = arith.mulf %2, %7 : vector<256x4xf32>
    %9 = vector.extract_strided_slice %8 {offsets = [0, 0], sizes = [256, 2], strides = [1, 1]} : vector<256x4xf32> to vector<256x2xf32>
    %10 = arith.truncf %9 : vector<256x2xf32> to vector<256x2xbf16>
    %c0_4 = arith.constant 0 : index
    %c0_5 = arith.constant 0 : index
    %11 = vector.load %arg3[%c0_4, %c0_5] : memref<256x2xbf16, #tpu.memory_space<vmem>>, vector<256x2xbf16>
    tpu.vector_store %arg3[%c0_4, %c0_5], %10 {strides = array<i32>} : memref<256x2xbf16, #tpu.memory_space<vmem>>, vector<256x2xbf16>,
    %12 = vector.extract_strided_slice %8 {offsets = [0, 2], sizes = [256, 2], strides = [1, 1]} : vector<256x4xf32> to vector<256x2xf32>
    %13 = arith.truncf %12 : vector<256x2xf32> to vector<256x2xbf16>
    %c0_6 = arith.constant 0 : index
    %c0_7 = arith.constant 0 : index
    %14 = vector.load %arg4[%c0_6, %c0_7] : memref<256x2xbf16, #tpu.memory_space<vmem>>, vector<256x2xbf16>
    tpu.vector_store %arg4[%c0_6, %c0_7], %13 {strides = array<i32>} : memref<256x2xbf16, #tpu.memory_space<vmem>>, vector<256x2xbf16>,
    return
  }
  func.func @transform_0(%arg0: i32) -> (i32, i32) {
    %c0_i32 = arith.constant 0 : i32
    %c0_i32_0 = arith.constant 0 : i32
    return %arg0, %c0_i32 : i32, i32
  }
  func.func @transform_1(%arg0: i32) -> (i32, i32) {
    %c0_i32 = arith.constant 0 : i32
    %c0_i32_0 = arith.constant 0 : i32
    %c0_i32_1 = arith.constant 0 : i32
    return %c0_i32, %c0_i32_0 : i32, i32
  }
  func.func @transform_2(%arg0: i32) -> (i32, i32) {
    %c0_i32 = arith.constant 0 : i32
    %c0_i32_0 = arith.constant 0 : i32
    return %arg0, %c0_i32 : i32, i32
  }
  func.func @transform_3(%arg0: i32) -> (i32, i32) {
    %c0_i32 = arith.constant 0 : i32
    %c0_i32_0 = arith.constant 0 : i32
    return %arg0, %c0_i32 : i32, i32
  }
}

module attributes {stable_mosaic.version = 11 : i64} {
  func.func @kernel(%arg0: i32, %arg1: memref<1x18x16x6xbf16, #tpu.memory_space<vmem>>, %arg2: memref<3x6x2xbf16, #tpu.memory_space<vmem>>, %arg3: memref<256x2xbf16, #tpu.memory_space<vmem>>, %arg4: memref<256x2xbf16, #tpu.memory_space<vmem>>) attributes {dimension_semantics = [#tpu.dimension_semantics<parallel>], iteration_bounds = array<i64: 2>, scalar_prefetch = 0 : i64, scratch_operands = 0 : i64, tpu.core_type = #tpu.core_type<tc>, window_params = [{transform_indices = @transform_0, window_bounds = array<i64: 1, 18, 16, 6>}, {pipeline_mode = #tpu.pipeline_mode<synchronous>, transform_indices = @transform_1, window_bounds = array<i64: 3, 6, 2>}, {transform_indices = @transform_2, window_bounds = array<i64: 256, 2>}, {transform_indices = @transform_3, window_bounds = array<i64: 256, 2>}]} {
    %cst = arith.constant 0.000000e+00 : f32
    %0 = vector.broadcast %cst : f32 to vector<256x2xf32>
    %c0 = arith.constant 0 : index
    %c0_0 = arith.constant 0 : index
    %c0_1 = arith.constant 0 : index
    %c0_2 = arith.constant 0 : index
    %1 = vector.load %arg1[%c0, %c0_0, %c0_1, %c0_2] : memref<1x18x16x6xbf16, #tpu.memory_space<vmem>>, vector<1x16x16x6xbf16>
    %2 = vector.shape_cast %1 : vector<1x16x16x6xbf16> to vector<16x16x6xbf16>
    %3 = vector.shape_cast %2 : vector<16x16x6xbf16> to vector<256x6xbf16>
    %c0_3 = arith.constant 0 : index
    %c0_4 = arith.constant 0 : index
    %c0_5 = arith.constant 0 : index
    %4 = vector.load %arg2[%c0_3, %c0_4, %c0_5] : memref<3x6x2xbf16, #tpu.memory_space<vmem>>, vector<1x6x2xbf16>
    %5 = vector.shape_cast %4 : vector<1x6x2xbf16> to vector<6x2xbf16>
    %cst_6 = arith.constant dense<0.000000e+00> : vector<256x2xf32>
    %6 = tpu.matmul %3, %5, %cst_6 {dimension_numbers = #tpu.dot_dimension_numbers<[1], [0], [0], [1], [0, 0, 1, 1], [], []>} : vector<256x6xbf16>, vector<6x2xbf16>, vector<256x2xf32> -> vector<256x2xf32>
    %7 = arith.addf %0, %6 : vector<256x2xf32>
    %c0_7 = arith.constant 0 : index
    %c1 = arith.constant 1 : index
    %c0_8 = arith.constant 0 : index
    %c0_9 = arith.constant 0 : index
    %8 = vector.load %arg1[%c0_7, %c1, %c0_8, %c0_9] : memref<1x18x16x6xbf16, #tpu.memory_space<vmem>>, vector<1x16x16x6xbf16>
    %9 = vector.shape_cast %8 : vector<1x16x16x6xbf16> to vector<16x16x6xbf16>
    %10 = vector.shape_cast %9 : vector<16x16x6xbf16> to vector<256x6xbf16>
    %c1_10 = arith.constant 1 : index
    %c0_11 = arith.constant 0 : index
    %c0_12 = arith.constant 0 : index
    %11 = vector.load %arg2[%c1_10, %c0_11, %c0_12] : memref<3x6x2xbf16, #tpu.memory_space<vmem>>, vector<1x6x2xbf16>
    %12 = vector.shape_cast %11 : vector<1x6x2xbf16> to vector<6x2xbf16>
    %cst_13 = arith.constant dense<0.000000e+00> : vector<256x2xf32>
    %13 = tpu.matmul %10, %12, %cst_13 {dimension_numbers = #tpu.dot_dimension_numbers<[1], [0], [0], [1], [0, 0, 1, 1], [], []>} : vector<256x6xbf16>, vector<6x2xbf16>, vector<256x2xf32> -> vector<256x2xf32>
    %14 = arith.addf %7, %13 : vector<256x2xf32>
    %c0_14 = arith.constant 0 : index
    %c2 = arith.constant 2 : index
    %c0_15 = arith.constant 0 : index
    %c0_16 = arith.constant 0 : index
    %15 = vector.load %arg1[%c0_14, %c2, %c0_15, %c0_16] : memref<1x18x16x6xbf16, #tpu.memory_space<vmem>>, vector<1x16x16x6xbf16>
    %16 = vector.shape_cast %15 : vector<1x16x16x6xbf16> to vector<16x16x6xbf16>
    %17 = vector.shape_cast %16 : vector<16x16x6xbf16> to vector<256x6xbf16>
    %c2_17 = arith.constant 2 : index
    %c0_18 = arith.constant 0 : index
    %c0_19 = arith.constant 0 : index
    %18 = vector.load %arg2[%c2_17, %c0_18, %c0_19] : memref<3x6x2xbf16, #tpu.memory_space<vmem>>, vector<1x6x2xbf16>
    %19 = vector.shape_cast %18 : vector<1x6x2xbf16> to vector<6x2xbf16>
    %cst_20 = arith.constant dense<0.000000e+00> : vector<256x2xf32>
    %20 = tpu.matmul %17, %19, %cst_20 {dimension_numbers = #tpu.dot_dimension_numbers<[1], [0], [0], [1], [0, 0, 1, 1], [], []>} : vector<256x6xbf16>, vector<6x2xbf16>, vector<256x2xf32> -> vector<256x2xf32>
    %21 = arith.addf %14, %20 : vector<256x2xf32>
    %22 = arith.negf %21 : vector<256x2xf32>
    %23 = math.exp %22 : vector<256x2xf32>
    %cst_21 = arith.constant 1.000000e+00 : f32
    %24 = vector.broadcast %cst_21 : f32 to vector<256x2xf32>
    %25 = arith.addf %24, %23 : vector<256x2xf32>
    %26 = arith.divf %24, %25 : vector<256x2xf32>
    %27 = arith.mulf %21, %26 : vector<256x2xf32>
    %c0_22 = arith.constant 0 : index
    %c0_23 = arith.constant 0 : index
    %28 = vector.load %arg3[%c0_22, %c0_23] : memref<256x2xbf16, #tpu.memory_space<vmem>>, vector<256x2xbf16>
    %29 = arith.extf %28 : vector<256x2xbf16> to vector<256x2xf32>
    %30 = arith.addf %27, %29 : vector<256x2xf32>
    %31 = arith.truncf %30 : vector<256x2xf32> to vector<256x2xbf16>
    %c0_24 = arith.constant 0 : index
    %c0_25 = arith.constant 0 : index
    %32 = vector.load %arg4[%c0_24, %c0_25] : memref<256x2xbf16, #tpu.memory_space<vmem>>, vector<256x2xbf16>
    tpu.vector_store %arg4[%c0_24, %c0_25], %31 {strides = array<i32>} : memref<256x2xbf16, #tpu.memory_space<vmem>>, vector<256x2xbf16>,
    return
  }
  func.func @transform_0(%arg0: i32) -> (i32, i32, i32, i32) {
    %c0_i32 = arith.constant 0 : i32
    %c0_i32_0 = arith.constant 0 : i32
    %c0_i32_1 = arith.constant 0 : i32
    %c0_i32_2 = arith.constant 0 : i32
    return %arg0, %c0_i32, %c0_i32_0, %c0_i32_1 : i32, i32, i32, i32
  }
  func.func @transform_1(%arg0: i32) -> (i32, i32, i32) {
    %c0_i32 = arith.constant 0 : i32
    %c0_i32_0 = arith.constant 0 : i32
    %c0_i32_1 = arith.constant 0 : i32
    %c0_i32_2 = arith.constant 0 : i32
    return %c0_i32, %c0_i32_0, %c0_i32_1 : i32, i32, i32
  }
  func.func @transform_2(%arg0: i32) -> (i32, i32) {
    %c0_i32 = arith.constant 0 : i32
    %c0_i32_0 = arith.constant 0 : i32
    return %arg0, %c0_i32 : i32, i32
  }
  func.func @transform_3(%arg0: i32) -> (i32, i32) {
    %c0_i32 = arith.constant 0 : i32
    %c0_i32_0 = arith.constant 0 : i32
    return %arg0, %c0_i32 : i32, i32
  }
}

module attributes {stable_mosaic.version = 11 : i64} {
  func.func @kernel(%arg0: i32, %arg1: memref<256x2xbf16, #tpu.memory_space<vmem>>, %arg2: memref<256x2xbf16, #tpu.memory_space<vmem>>, %arg3: memref<2x4xbf16, #tpu.memory_space<vmem>>, %arg4: memref<2x4xbf16, #tpu.memory_space<vmem>>, %arg5: memref<256x4xf32, #tpu.memory_space<vmem>>) attributes {dimension_semantics = [#tpu.dimension_semantics<parallel>], iteration_bounds = array<i64: 2>, scalar_prefetch = 0 : i64, scratch_operands = 0 : i64, tpu.core_type = #tpu.core_type<tc>, window_params = [{transform_indices = @transform_0, window_bounds = array<i64: 256, 2>}, {transform_indices = @transform_1, window_bounds = array<i64: 256, 2>}, {pipeline_mode = #tpu.pipeline_mode<synchronous>, transform_indices = @transform_2, window_bounds = array<i64: 2, 4>}, {pipeline_mode = #tpu.pipeline_mode<synchronous>, transform_indices = @transform_3, window_bounds = array<i64: 2, 4>}, {transform_indices = @transform_4, window_bounds = array<i64: 256, 4>}]} {
    %c0 = arith.constant 0 : index
    %c0_0 = arith.constant 0 : index
    %0 = vector.load %arg1[%c0, %c0_0] : memref<256x2xbf16, #tpu.memory_space<vmem>>, vector<256x2xbf16>
    %c0_1 = arith.constant 0 : index
    %c0_2 = arith.constant 0 : index
    %1 = vector.load %arg3[%c0_1, %c0_2] : memref<2x4xbf16, #tpu.memory_space<vmem>>, vector<2x4xbf16>
    %cst = arith.constant dense<0.000000e+00> : vector<256x4xf32>
    %2 = tpu.matmul %0, %1, %cst {dimension_numbers = #tpu.dot_dimension_numbers<[1], [0], [0], [1], [0, 0, 1, 1], [], []>} : vector<256x2xbf16>, vector<2x4xbf16>, vector<256x4xf32> -> vector<256x4xf32>
    %c0_3 = arith.constant 0 : index
    %c0_4 = arith.constant 0 : index
    %3 = vector.load %arg2[%c0_3, %c0_4] : memref<256x2xbf16, #tpu.memory_space<vmem>>, vector<256x2xbf16>
    %c0_5 = arith.constant 0 : index
    %c0_6 = arith.constant 0 : index
    %4 = vector.load %arg4[%c0_5, %c0_6] : memref<2x4xbf16, #tpu.memory_space<vmem>>, vector<2x4xbf16>
    %cst_7 = arith.constant dense<0.000000e+00> : vector<256x4xf32>
    %5 = tpu.matmul %3, %4, %cst_7 {dimension_numbers = #tpu.dot_dimension_numbers<[1], [0], [0], [1], [0, 0, 1, 1], [], []>} : vector<256x2xbf16>, vector<2x4xbf16>, vector<256x4xf32> -> vector<256x4xf32>
    %6 = arith.addf %2, %5 : vector<256x4xf32>
    %7 = arith.negf %6 : vector<256x4xf32>
    %8 = math.exp %7 : vector<256x4xf32>
    %cst_8 = arith.constant 1.000000e+00 : f32
    %9 = vector.broadcast %cst_8 : f32 to vector<256x4xf32>
    %10 = arith.addf %9, %8 : vector<256x4xf32>
    %11 = arith.divf %9, %10 : vector<256x4xf32>
    %12 = arith.mulf %6, %11 : vector<256x4xf32>
    %c0_9 = arith.constant 0 : index
    %c0_10 = arith.constant 0 : index
    %13 = vector.load %arg5[%c0_9, %c0_10] : memref<256x4xf32, #tpu.memory_space<vmem>>, vector<256x4xf32>
    tpu.vector_store %arg5[%c0_9, %c0_10], %12 {strides = array<i32>} : memref<256x4xf32, #tpu.memory_space<vmem>>, vector<256x4xf32>,
    return
  }
  func.func @transform_0(%arg0: i32) -> (i32, i32) {
    %c0_i32 = arith.constant 0 : i32
    %c0_i32_0 = arith.constant 0 : i32
    return %arg0, %c0_i32 : i32, i32
  }
  func.func @transform_1(%arg0: i32) -> (i32, i32) {
    %c0_i32 = arith.constant 0 : i32
    %c0_i32_0 = arith.constant 0 : i32
    return %arg0, %c0_i32 : i32, i32
  }
  func.func @transform_2(%arg0: i32) -> (i32, i32) {
    %c0_i32 = arith.constant 0 : i32
    %c0_i32_0 = arith.constant 0 : i32
    %c0_i32_1 = arith.constant 0 : i32
    return %c0_i32, %c0_i32_0 : i32, i32
  }
  func.func @transform_3(%arg0: i32) -> (i32, i32) {
    %c0_i32 = arith.constant 0 : i32
    %c0_i32_0 = arith.constant 0 : i32
    %c0_i32_1 = arith.constant 0 : i32
    return %c0_i32, %c0_i32_0 : i32, i32
  }
  func.func @transform_4(%arg0: i32) -> (i32, i32) {
    %c0_i32 = arith.constant 0 : i32
    %c0_i32_0 = arith.constant 0 : i32
    return %arg0, %c0_i32 : i32, i32
  }
}

</mosaic_0001>

<bundles_post_ra>
// kernel: c3_forward.4
= control target key start
LH: loop header
LB: loop body
LE: loop exit
PB: predicated region body
PF: predicated region fallthrough
CT: control target
= control target key end

     0   :  { %s1497_s12 = smov 0   ;;  %s1859_s0 = inlined_call_operand.vmem [shape: bf16[512,4], index: 0, kind: input, shape index: {}]   ;;  %s1860_s1 = inlined_call_operand.vmem [shape: bf16[4,4], index: 1, kind: input, shape index: {}]   ;;  %s1861_s2 = inlined_call_operand.vmem [shape: bf16[512,2], index: 2, kind: output, shape index: {0}]   ;;  %s1862_s3 = inlined_call_operand.vmem [shape: bf16[512,2], index: 3, kind: output, shape index: {1}]  }
   0x1 LB: > { %s1119_s13 = sadd.s32 4294967295, %s1474_s12   ;;  %p1123_p0 = scmp.ge.s32.totalorder %s1474_s12, 1  ;;  %s1474_s12 = sphi %s1497_s12, %s14_s12  }
   0x2   : > { %p141_p1 = scmp.lt.s32.totalorder %s1474_s12, 3 }
   0x4   : > { %p142_p2 = pnand %p1123_p0, %p141_p1 }
   0x5   : > { %v221_v0 = vld [vmem:[%s1860_s1] sm:$0x3] (!%p142_p2)  ;;  %vm351_vm0 = vcmask (!%p142_p2), 1041408   ;;  %s1124_s16 = sshll.u32 (!%p142_p2), %s1119_s13, 5  ;;  %vm302_vm1 = vcmask (!%p142_p2), 31744   ;;  %vm868_vm2 = vcmask (!%p142_p2), 11264  }
   0x6   : > { %145 = sbr.rel (%p142_p2) target bundleno = 444 (0x1bc), region = 28  ;;  %1313 = vmatprep.subr.msk.bf16.mxu0 (!%p142_p2), %vm351_vm0, %v221_v0  ;;  %1314 = vmatprep.subr.msk.bf16.mxu1 (!%p142_p2), %vm351_vm0, %v221_v0  ;;  %v353_v1 = vsel (!%p142_p2), %vm351_vm0, %v221_v0, 0  ;;  %p171_p3 = scmp.lt.s32.totalorder (!%p142_p2), %s1124_s16, 63 }
   0x7   : > { %1278 = vmatpush3.bf16.msra.mxu0 (!%p142_p2), %v353_v1  ;;  %1312 = vmatpush3.bf16.msra.mxu1 (!%p142_p2), %v353_v1  ;;  %s1476_s24 = smov (!%p142_p2), 126  }
   0xd   : > { %s1864_s16 = smov (!%p171_p3, %s1124_s16), 63 }
   0xe   : > { %s1508_s17 = sshll.u32 %s1864_s16, 2 }
   0xf   : > { %s1514_s20 = scalar_lea.vmem %s1859_s0, %s1508_s17  ;;  %s1635_s23 = scalar_lea.vmem %s1861_s2, %s1508_s17 }
  0x10   : > { %v1324_v2 = vld [vmem:[%s1514_s20] sm:$0xff]   ;;  %v1326_v4 = vld [vmem:[%s1514_s20 + $0x8] sm:$0xff]   ;;  %v1328_v6 = vld [vmem:[%s1514_s20 + $0x10] sm:$0xff]   ;;  %s1790_s27 = scalar_lea.vmem %s1862_s3, %s1508_s17 }
  0x11   : > { %v1325_v3 = vld [vmem:[%s1514_s20 + $0x40] sm:$0xff]   ;;  %1279 = vmatprep.mubr.msk.bf16.mxu0 %vm302_vm1, %v1324_v2  ;;  %v1327_v5 = vld [vmem:[%s1514_s20 + $0x48] sm:$0xff]   ;;  %v1329_v7 = vld [vmem:[%s1514_s20 + $0x50] sm:$0xff]  }
  0x12   : > { %1295 = vmatprep.mubr.msk.bf16.mxu1 %vm302_vm1, %v1325_v3  ;;  %1280 = vmatmul.mubr.msk.bf16.vlgmr.msra.gmra.mrb[0].mxu0 %vm302_vm1, %v1326_v4  ;;  %v1330_v8 = vld [vmem:[%s1514_s20 + $0x18] sm:$0xff]   ;;  %v1332_v10 = vld [vmem:[%s1514_s20 + $0x20] sm:$0xff]   ;;  %v1334_v12 = vld [vmem:[%s1514_s20 + $0x28] sm:$0xff]  }
  0x13   : > { %1296 = vmatmul.mubr.msk.bf16.vlgmr.msra.gmra.mrb[0].mxu1 %vm302_vm1, %v1327_v5  ;;  %1283 = vmatprep.mubr.msk.bf16.mxu0 %vm302_vm1, %v1328_v6  ;;  %v1331_v9 = vld [vmem:[%s1514_s20 + $0x58] sm:$0xff]   ;;  %v1333_v11 = vld [vmem:[%s1514_s20 + $0x60] sm:$0xff]   ;;  %v1335_v13 = vld [vmem:[%s1514_s20 + $0x68] sm:$0xff]  }
  0x14   : > { %1299 = vmatprep.mubr.msk.bf16.mxu1 %vm302_vm1, %v1329_v7  ;;  %v1336_v14 = vld [vmem:[%s1514_s20 + $0x30] sm:$0xff]   ;;  %v1338_v16 = vld [vmem:[%s1514_s20 + $0x38] sm:$0xff]  }
  0x15   : > { %v1337_v15 = vld [vmem:[%s1514_s20 + $0x70] sm:$0xff]   ;;  %v1339_v17 = vld [vmem:[%s1514_s20 + $0x78] sm:$0xff]  }
  0x1a   : > { %1284 = vmatmul.mubr.msk.bf16.gmra.mrb[4].mxu0 %vm302_vm1, %v1330_v8 }
  0x1b   : > { %1300 = vmatmul.mubr.msk.bf16.gmra.mrb[4].mxu1 %vm302_vm1, %v1331_v9  ;;  %1287 = vmatprep.mubr.msk.bf16.mxu0 %vm302_vm1, %v1332_v10 }
  0x1c   : > { %1303 = vmatprep.mubr.msk.bf16.mxu1 %vm302_vm1, %v1333_v11 }
  0x22   : > { %1288 = vmatmul.mubr.msk.bf16.gmra.mrb[8].mxu0 %vm302_vm1, %v1334_v12 }
  0x23   : > { %1304 = vmatmul.mubr.msk.bf16.gmra.mrb[8].mxu1 %vm302_vm1, %v1335_v13  ;;  %1291 = vmatprep.mubr.msk.bf16.mxu0 %vm302_vm1, %v1336_v14 }
  0x24   : > { %1307 = vmatprep.mubr.msk.bf16.mxu1 %vm302_vm1, %v1337_v15 }
  0x2a   : > { %1292 = vmatmul.mubr.msk.bf16.gmra.mrb[12].mxu0 %vm302_vm1, %v1338_v16 }
  0x2b   : > { %1308 = vmatmul.mubr.msk.bf16.gmra.mrb[12].mxu1 %vm302_vm1, %v1339_v17 }
  0xe5   : > { %v1548_v18 = vpop.f32.mrb[0].mxu0 }
  0xe6   : > { %v1164_v19 = vmul.f32 -1.442695, %v1548_v18  ;;  %v1551_v20 = vpop.f32.mrb[0].mxu1  ;;  %v1553_v21 = vpop.f32.mrb[1].mxu0 }
  0xe7   : > { %v1180_v22 = vmul.f32 -1.442695, %v1551_v20  ;;  %v1162_v23 = vmul.f32 -1.442695, %v1553_v21  ;;  %v1557_v24 = vpop.f32.mrb[1].mxu1  ;;  %v1559_v25 = vpop.f32.mrb[2].mxu0 }
  0xe8   : > { %1340 = vpow2.f32 %v1164_v19  ;;  %v1178_v26 = vmul.f32 -1.442695, %v1557_v24  ;;  %v1165_v27 = vmul.f32 -1.442695, %v1559_v25  ;;  %v1563_v28 = vpop.f32.mrb[2].mxu1  ;;  %v1565_v29 = vpop.f32.mrb[3].mxu0 }
  0xe9   : > { %1342 = vpow2.f32 %v1180_v22  ;;  %v1181_v30 = vmul.f32 -1.442695, %v1563_v28  ;;  %v1568_v31 = vpop.f32.mrb[3].mxu1  ;;  %v1163_v32 = vmul.f32 -1.442695, %v1565_v29 }
  0xea   : > { %1344 = vpow2.f32 %v1162_v23  ;;  %v1179_v33 = vmul.f32 -1.442695, %v1568_v31 }
  0xeb   : > { %1346 = vpow2.f32 %v1178_v26 }
  0xec   : > { %1348 = vpow2.f32 %v1165_v27 }
  0xed   : > { %1350 = vpow2.f32 %v1181_v30  ;;  %v1572_v34 = vpop.f32.mrb[4].mxu0 }
  0xee   : > { %1352 = vpow2.f32 %v1163_v32  ;;  %v1168_v35 = vmul.f32 -1.442695, %v1572_v34  ;;  %v1575_v36 = vpop.f32.mrb[4].mxu1  ;;  %v1577_v37 = vpop.f32.mrb[5].mxu0 }
  0xef   : > { %1354 = vpow2.f32 %v1179_v33  ;;  %v1184_v38 = vmul.f32 -1.442695, %v1575_v36  ;;  %v1166_v39 = vmul.f32 -1.442695, %v1577_v37  ;;  %v1581_v40 = vpop.f32.mrb[5].mxu1  ;;  %v1583_v41 = vpop.f32.mrb[6].mxu0 }
  0xf0   : > { %1356 = vpow2.f32 %v1168_v35  ;;  %v1182_v42 = vmul.f32 -1.442695, %v1581_v40  ;;  %v1169_v43 = vmul.f32 -1.442695, %v1583_v41  ;;  %v1587_v44 = vpop.f32.mrb[6].mxu1  ;;  %v1589_v45 = vpop.f32.mrb[7].mxu0 }
  0xf1   : > { %1358 = vpow2.f32 %v1184_v38  ;;  %v1591_v46 = vpop.f32.mrb[7].mxu1  ;;  %v1185_v17 = vmul.f32 -1.442695, %v1587_v44  ;;  %v1167_v27 = vmul.f32 -1.442695, %v1589_v45 }
  0xf2   : > { %v1341_v47 = vpop.eup %1340  ;;  %1360 = vpow2.f32 %v1166_v39  ;;  %v1183_v35 = vmul.f32 -1.442695, %v1591_v46 }
  0xf3   : > { %v1343_v48 = vpop.eup %1342  ;;  %v614_v49 = vadd.f32 1.0, %v1341_v47  ;;  %1362 = vpow2.f32 %v1182_v42 }
  0xf4   : > { %v1345_v50 = vpop.eup %1344  ;;  %v630_v51 = vadd.f32 1.0, %v1343_v48  ;;  %1364 = vpow2.f32 %v1169_v43 }
  0xf5   : > { %v1347_v52 = vpop.eup %1346  ;;  %1366 = vrcp.f32 %v614_v49  ;;  %v612_v53 = vadd.f32 1.0, %v1345_v50  ;;  %v1593_v54 = vpop.f32.mrb[8].mxu0 }
  0xf6   : > { %v1349_v55 = vpop.eup %1348  ;;  %1368 = vrcp.f32 %v630_v51  ;;  %v628_v56 = vadd.f32 1.0, %v1347_v52  ;;  %v1595_v57 = vpop.f32.mrb[8].mxu1  ;;  %v1172_v47 = vmul.f32 -1.442695, %v1593_v54 }
  0xf7   : > { %v1597_v58 = vpop.f32.mrb[9].mxu0  ;;  %v1351_v59 = vpop.eup %1350  ;;  %1370 = vrcp.f32 %v612_v53  ;;  %v615_v60 = vadd.f32 1.0, %v1349_v55  ;;  %v1188_v51 = vmul.f32 -1.442695, %v1595_v57 }
  0xf8   : > { %v1599_v61 = vpop.f32.mrb[9].mxu1  ;;  %v1353_v62 = vpop.eup %1352  ;;  %1372 = vrcp.f32 %v628_v56  ;;  %v631_v63 = vadd.f32 1.0, %v1351_v59 }
  0xf9   : > { %v1601_v0 = vpop.f32.mrb[10].mxu0  ;;  %v1603_v1 = vpop.f32.mrb[10].mxu1  ;;  %1374 = vrcp.f32 %v615_v60  ;;  %v613_v3 = vadd.f32 1.0, %v1353_v62 }
  0xfa   : > { %v1355_v2 = vpop.eup %1354  ;;  %v1605_v4 = vpop.f32.mrb[11].mxu0  ;;  %1376 = vrcp.f32 %v631_v63 }
  0xfb   : > { %v1357_v5 = vpop.eup %1356  ;;  %v629_v6 = vadd.f32 1.0, %v1355_v2  ;;  %v1607_v7 = vpop.f32.mrb[11].mxu1  ;;  %1378 = vrcp.f32 %v613_v3 }
  0xfc   : > { %v1359_v8 = vpop.eup %1358  ;;  %v618_v9 = vadd.f32 1.0, %v1357_v5 }
  0xfd   : > { %v1361_v10 = vpop.eup %1360  ;;  %1380 = vrcp.f32 %v629_v6  ;;  %v634_v11 = vadd.f32 1.0, %v1359_v8  ;;  %v1609_v14 = vpop.f32.mrb[12].mxu0 }
  0xfe   : > { %v1363_v12 = vpop.eup %1362  ;;  %1382 = vrcp.f32 %v618_v9  ;;  %v616_v13 = vadd.f32 1.0, %v1361_v10  ;;  %v1612_v19 = vpop.f32.mrb[12].mxu1 }
  0xff   : > { %v1365_v15 = vpop.eup %1364  ;;  %1384 = vrcp.f32 %v634_v11  ;;  %v632_v16 = vadd.f32 1.0, %v1363_v12  ;;  %v1614_v22 = vpop.f32.mrb[13].mxu0  ;;  %v1171_v11 = vmul.f32 -1.442695, %v1605_v4 }
 0x100   : > { %v1367_v23 = vpop.eup %1366  ;;  %1386 = vrcp.f32 %v616_v13  ;;  %v619_v26 = vadd.f32 1.0, %v1365_v15  ;;  %v1617_v30 = vpop.f32.mrb[13].mxu1  ;;  %v1187_v15 = vmul.f32 -1.442695, %v1607_v7 }
 0x101   : > { %v1369_v32 = vpop.eup %1368  ;;  %v710_v33 = vmul.f32 %v1367_v23, %v1548_v18  ;;  %1388 = vrcp.f32 %v632_v16  ;;  %v1621_v38 = vpop.f32.mrb[14].mxu0  ;;  %v1176_v23 = vmul.f32 -1.442695, %v1609_v14 }
 0x102   : > { %v1623_v39 = vpop.f32.mrb[14].mxu1  ;;  %v1371_v42 = vpop.eup %1370  ;;  %v726_v43 = vmul.f32 %v1369_v32, %v1551_v20  ;;  %1390 = vrcp.f32 %v619_v26  ;;  %v1170_v20 = vmul.f32 -1.442695, %v1597_v58  ;;  %v1192_v32 = vmul.f32 -1.442695, %v1612_v19 }
 0x103   : > { %v1627_v48 = vpop.f32.mrb[15].mxu0  ;;  %v1629_v49 = vpop.f32.mrb[15].mxu1  ;;  %v708_v18 = vmul.f32 %v1371_v42, %v1553_v21  ;;  %1392 = vpow2.f32 %v1185_v17  ;;  %v1230_v56 = vpack.c.bf16 %v710_v33, %v710_v33  ;;  %v1186_v21 = vmul.f32 -1.442695, %v1599_v61 }
 0x104   : > { %v1373_v50 = vpop.eup %1372  ;;  %1394 = vpow2.f32 %v1167_v27  ;;  %v1246_v55 = vpack.c.bf16 %v726_v43, %v726_v43 }
 0x105   : > { %v1375_v52 = vpop.eup %1374  ;;  %v724_v53 = vmul.f32 %v1373_v50, %v1557_v24  ;;  %v1228_v60 = vpack.c.bf16 %v708_v18, %v708_v18  ;;  %1396 = vpow2.f32 %v1183_v35  ;;  %v1173_v24 = vmul.f32 -1.442695, %v1601_v0  ;;  %905 = vrot.lane.b32.xlu1 %v1230_v56, %s1476_s24  ;;  %871 = vst.msk [vmem:[%s1635_s23 + $0x8] sm:$0xf] %vm868_vm2, %v1230_v56 }
 0x106   : > { %v1377_v59 = vpop.eup %1376  ;;  %v711_v62 = vmul.f32 %v1375_v52, %v1559_v25  ;;  %1398 = vpow2.f32 %v1172_v47  ;;  %937 = vrot.lane.b32.xlu0 %v1246_v55, %s1476_s24  ;;  %887 = vst.msk [vmem:[%s1635_s23 + $0x48] sm:$0xf] %vm868_vm2, %v1246_v55 }
 0x107   : > { %v1379_v63 = vpop.eup %1378  ;;  %v1244_v2 = vpack.c.bf16 %v724_v53, %v724_v53  ;;  %v727_v3 = vmul.f32 %v1377_v59, %v1563_v28  ;;  %869 = vst.msk [vmem:[%s1635_s23] sm:$0xf] %vm868_vm2, %v1228_v60  ;;  %1400 = vpow2.f32 %v1188_v51  ;;  %v1189_v28 = vmul.f32 -1.442695, %v1603_v1 }
 0x108   : > { %v1381_v25 = vpop.eup %1380  ;;  %v1231_v5 = vpack.c.bf16 %v711_v62, %v711_v62  ;;  %v709_v6 = vmul.f32 %v1379_v63, %v1565_v29  ;;  %1402 = vpow2.f32 %v1170_v20 }
 0x109   : > { %v1383_v8 = vpop.eup %1382  ;;  %885 = vst.msk [vmem:[%s1635_s23 + $0x40] sm:$0xf] %vm868_vm2, %v1244_v2  ;;  %v1247_v9 = vpack.c.bf16 %v727_v3, %v727_v3  ;;  %v725_v10 = vmul.f32 %v1381_v25, %v1568_v31  ;;  %1404 = vpow2.f32 %v1186_v21 }
 0x10a   : > { %v1385_v12 = vpop.eup %1384  ;;  %872 = vst.msk [vmem:[%s1635_s23 + $0xc] sm:$0xf] %vm868_vm2, %v1231_v5  ;;  %v1229_v13 = vpack.c.bf16 %v709_v6, %v709_v6  ;;  %v714_v29 = vmul.f32 %v1383_v8, %v1572_v34  ;;  %1406 = vpow2.f32 %v1173_v24  ;;  %901 = vrot.lane.b32.xlu0 %v1228_v60, %s1476_s24  ;;  %907 = vrot.lane.b32.xlu1 %v1231_v5, %s1476_s24 }
 0x10b   : > { %v1387_v16 = vpop.eup %1386  ;;  %888 = vst.msk [vmem:[%s1635_s23 + $0x4c] sm:$0xf] %vm868_vm2, %v1247_v9  ;;  %v1245_v17 = vpack.c.bf16 %v725_v10, %v725_v10  ;;  %v730_v31 = vmul.f32 %v1385_v12, %v1575_v36  ;;  %1408 = vpow2.f32 %v1189_v28 }
 0x10c   : > { %v1389_v26 = vpop.eup %1388  ;;  %870 = vst.msk [vmem:[%s1635_s23 + $0x4] sm:$0xf] %vm868_vm2, %v1229_v13  ;;  %v1234_v34 = vpack.c.bf16 %v714_v29, %v714_v29  ;;  %v712_v27 = vmul.f32 %v1387_v16, %v1577_v37  ;;  %1410 = vpow2.f32 %v1171_v11  ;;  %v1174_v11 = vmul.f32 -1.442695, %v1614_v22 }
 0x10d   : > { %v1391_v33 = vpop.eup %1390  ;;  %886 = vst.msk [vmem:[%s1635_s23 + $0x44] sm:$0xf] %vm868_vm2, %v1245_v17  ;;  %v1250_v36 = vpack.c.bf16 %v730_v31, %v730_v31  ;;  %v728_v35 = vmul.f32 %v1389_v26, %v1581_v40  ;;  %1412 = vpow2.f32 %v1187_v15  ;;  %v1190_v29 = vmul.f32 -1.442695, %v1617_v30 }
 0x10e   : > { %v1393_v42 = vpop.eup %1392  ;;  %875 = vst.msk [vmem:[%s1635_s23 + $0x18] sm:$0xf] %vm868_vm2, %v1234_v34  ;;  %v1678_v43 = vpack.c.bf16 %v712_v27, %v712_v27  ;;  %v715_v47 = vmul.f32 %v1391_v33, %v1583_v41  ;;  %1414 = vpow2.f32 %v1176_v23  ;;  %933 = vrot.lane.b32.xlu0 %v1244_v2, %s1476_s24  ;;  %939 = vrot.lane.b32.xlu1 %v1247_v9, %s1476_s24  ;;  %v1193_v26 = vmul.f32 -1.442695, %v1623_v39 }
 0x10f   : > { %v1395_v37 = vpop.eup %1394  ;;  %891 = vst.msk [vmem:[%s1635_s23 + $0x58] sm:$0xf] %vm868_vm2, %v1250_v36  ;;  %v1683_v50 = vpack.c.bf16 %v728_v35, %v728_v35  ;;  %v635_v18 = vadd.f32 1.0, %v1393_v42  ;;  %1416 = vpow2.f32 %v1192_v32  ;;  %v1175_v33 = vmul.f32 -1.442695, %v1627_v48 }
 0x110   : > { %v1397_v40 = vpop.eup %1396  ;;  %873 = vst.msk [vmem:[%s1635_s23 + $0x10] sm:$0xf] %vm868_vm2, %v1678_v43  ;;  %v1235_v51 = vpack.c.bf16 %v715_v47, %v715_v47  ;;  %v617_v20 = vadd.f32 1.0, %v1395_v37  ;;  %v1191_v42 = vmul.f32 -1.442695, %v1629_v49 }
 0x111   : > { %v1399_v41 = vpop.eup %1398  ;;  %889 = vst.msk [vmem:[%s1635_s23 + $0x50] sm:$0xf] %vm868_vm2, %v1683_v50  ;;  %1418 = vrcp.f32 %v635_v18  ;;  %v633_v52 = vadd.f32 1.0, %v1397_v40 }
 0x112   : > { %v1401_v53 = vpop.eup %1400  ;;  %876 = vst.msk [vmem:[%s1635_s23 + $0x1c] sm:$0xf] %vm868_vm2, %v1235_v51  ;;  %1420 = vrcp.f32 %v617_v20  ;;  %v622_v55 = vadd.f32 1.0, %v1399_v41  ;;  %935 = vrot.lane.b32.xlu1 %v1245_v17, %s1476_s24  ;;  %903 = vrot.lane.b32.xlu0 %v1229_v13, %s1476_s24  ;;  %v1177_v17 = vmul.f32 -1.442695, %v1621_v38 }
 0x113   : > { %v1403_v56 = vpop.eup %1402  ;;  %1422 = vrcp.f32 %v633_v52  ;;  %v638_v59 = vadd.f32 1.0, %v1401_v53 }
 0x114   : > { %v1405_v60 = vpop.eup %1404  ;;  %1424 = vrcp.f32 %v622_v55  ;;  %v620_v62 = vadd.f32 1.0, %v1403_v56 }
 0x115   : > { %v1407_v21 = vpop.eup %1406  ;;  %1426 = vrcp.f32 %v638_v59  ;;  %v636_v63 = vadd.f32 1.0, %v1405_v60 }
 0x116   : > { %v1409_v2 = vpop.eup %1408  ;;  %1428 = vrcp.f32 %v620_v62  ;;  %v623_v3 = vadd.f32 1.0, %v1407_v21  ;;  %913 = vrot.lane.b32.xlu0 %v1234_v34, %s1476_s24  ;;  %915 = vrot.lane.b32.xlu1 %v1235_v51, %s1476_s24 }
 0x117   : > { %v1411_v24 = vpop.eup %1410  ;;  %1430 = vrcp.f32 %v636_v63  ;;  %v639_v25 = vadd.f32 1.0, %v1409_v2 }
 0x118   : > { %v1413_v5 = vpop.eup %1412  ;;  %1432 = vrcp.f32 %v623_v3  ;;  %v621_v6 = vadd.f32 1.0, %v1411_v24 }
 0x119   : > { %v1415_v28 = vpop.eup %1414  ;;  %1434 = vrcp.f32 %v639_v25  ;;  %v637_v8 = vadd.f32 1.0, %v1413_v5 }
 0x11a   : > { %v1417_v9 = vpop.eup %1416  ;;  %1436 = vrcp.f32 %v621_v6  ;;  %v626_v10 = vadd.f32 1.0, %v1415_v28  ;;  %945 = vrot.lane.b32.xlu0 %v1250_v36, %s1476_s24 }
 0x11b   : > { %v1419_v12 = vpop.eup %1418  ;;  %1438 = vrcp.f32 %v637_v8  ;;  %v642_v13 = vadd.f32 1.0, %v1417_v9 }
 0x11c   : > { %v1421_v15 = vpop.eup %1420  ;;  %v731_v16 = vmul.f32 %v1419_v12, %v1587_v44  ;;  %1440 = vrcp.f32 %v626_v10 }
 0x11d   : > { %v1423_v31 = vpop.eup %1422  ;;  %v713_v23 = vmul.f32 %v1421_v15, %v1589_v45  ;;  %1442 = vrcp.f32 %v642_v13 }
 0x11e   : > { %v1425_v34 = vpop.eup %1424  ;;  %v1251_v27 = vpack.c.bf16 %v731_v16, %v731_v16  ;;  %v729_v32 = vmul.f32 %v1423_v31, %v1591_v46  ;;  %1444 = vpow2.f32 %v1174_v11  ;;  %909 = vrot.lane.b32.xlu0 %v1678_v43, %s1476_s24 }
 0x11f   : > { %v1427_v36 = vpop.eup %1426  ;;  %v1233_v44 = vpack.c.bf16 %v713_v23, %v713_v23  ;;  %v718_v35 = vmul.f32 %v1425_v34, %v1593_v54  ;;  %1446 = vpow2.f32 %v1190_v29 }
 0x120   : > { %v1429_v45 = vpop.eup %1428  ;;  %892 = vst.msk [vmem:[%s1635_s23 + $0x5c] sm:$0xf] %vm868_vm2, %v1251_v27  ;;  %v1249_v46 = vpack.c.bf16 %v729_v32, %v729_v32  ;;  %v734_v47 = vmul.f32 %v1427_v36, %v1595_v57  ;;  %1448 = vpow2.f32 %v1177_v17  ;;  %947 = vrot.lane.b32.xlu1 %v1251_v27, %s1476_s24 }
 0x121   : > { %v1431_v37 = vpop.eup %1430  ;;  %874 = vst.msk [vmem:[%s1635_s23 + $0x14] sm:$0xf] %vm868_vm2, %v1233_v44  ;;  %v1238_v54 = vpack.c.bf16 %v718_v35, %v718_v35  ;;  %v716_v18 = vmul.f32 %v1429_v45, %v1597_v58  ;;  %1450 = vpow2.f32 %v1193_v26 }
 0x122   : > { %v1433_v40 = vpop.eup %1432  ;;  %890 = vst.msk [vmem:[%s1635_s23 + $0x54] sm:$0xf] %vm868_vm2, %v1249_v46  ;;  %v1254_v43 = vpack.c.bf16 %v734_v47, %v734_v47  ;;  %v732_v51 = vmul.f32 %v1431_v37, %v1599_v61  ;;  %1452 = vpow2.f32 %v1175_v33  ;;  %941 = vrot.lane.b32.xlu0 %v1683_v50, %s1476_s24 }
 0x123   : > { %v1435_v57 = vpop.eup %1434  ;;  %879 = vst.msk [vmem:[%s1635_s23 + $0x28] sm:$0xf] %vm868_vm2, %v1238_v54  ;;  %v1236_v20 = vpack.c.bf16 %v716_v18, %v716_v18  ;;  %v719_v41 = vmul.f32 %v1433_v40, %v1601_v0  ;;  %1454 = vpow2.f32 %v1191_v42 }
 0x124   : > { %v1437_v58 = vpop.eup %1436  ;;  %895 = vst.msk [vmem:[%s1635_s23 + $0x68] sm:$0xf] %vm868_vm2, %v1254_v43  ;;  %v1252_v52 = vpack.c.bf16 %v732_v51, %v732_v51  ;;  %v735_v53 = vmul.f32 %v1435_v57, %v1603_v1  ;;  %911 = vrot.lane.b32.xlu1 %v1233_v44, %s1476_s24 }
 0x125   : > { %v1439_v61 = vpop.eup %1438  ;;  %877 = vst.msk [vmem:[%s1635_s23 + $0x20] sm:$0xf] %vm868_vm2, %v1236_v20  ;;  %v1239_v55 = vpack.c.bf16 %v719_v41, %v719_v41  ;;  %v717_v0 = vmul.f32 %v1437_v58, %v1605_v4 }
 0x126   : > { %v1441_v56 = vpop.eup %1440  ;;  %893 = vst.msk [vmem:[%s1635_s23 + $0x60] sm:$0xf] %vm868_vm2, %v1252_v52  ;;  %v1255_v50 = vpack.c.bf16 %v735_v53, %v735_v53  ;;  %v733_v59 = vmul.f32 %v1439_v61, %v1607_v7  ;;  %921 = vrot.lane.b32.xlu0 %v1238_v54, %s1476_s24 }
 0x127   : > { %v1443_v60 = vpop.eup %1442  ;;  %880 = vst.msk [vmem:[%s1635_s23 + $0x2c] sm:$0xf] %vm868_vm2, %v1239_v55  ;;  %v1237_v1 = vpack.c.bf16 %v717_v0, %v717_v0  ;;  %v722_v62 = vmul.f32 %v1441_v56, %v1609_v14 }
 0x128   : > { %v1445_v21 = vpop.eup %1444  ;;  %896 = vst.msk [vmem:[%s1635_s23 + $0x6c] sm:$0xf] %vm868_vm2, %v1255_v50  ;;  %v1253_v4 = vpack.c.bf16 %v733_v59, %v733_v59  ;;  %v738_v63 = vmul.f32 %v1443_v60, %v1612_v19  ;;  %943 = vrot.lane.b32.xlu1 %v1249_v46, %s1476_s24 }
 0x129   : > { %v1447_v7 = vpop.eup %1446  ;;  %878 = vst.msk [vmem:[%s1635_s23 + $0x24] sm:$0xf] %vm868_vm2, %v1237_v1  ;;  %v1242_v2 = vpack.c.bf16 %v722_v62, %v722_v62  ;;  %v624_v3 = vadd.f32 1.0, %v1445_v21 }
 0x12a   : > { %v1449_v24 = vpop.eup %1448  ;;  %894 = vst.msk [vmem:[%s1635_s23 + $0x64] sm:$0xf] %vm868_vm2, %v1253_v4  ;;  %v1258_v14 = vpack.c.bf16 %v738_v63, %v738_v63  ;;  %v640_v25 = vadd.f32 1.0, %v1447_v7  ;;  %953 = vrot.lane.b32.xlu0 %v1254_v43, %s1476_s24 }
 0x12b   : > { %v1451_v5 = vpop.eup %1450  ;;  %883 = vst.msk [vmem:[%s1635_s23 + $0x38] sm:$0xf] %vm868_vm2, %v1242_v2  ;;  %1456 = vrcp.f32 %v624_v3  ;;  %v627_v6 = vadd.f32 1.0, %v1449_v24 }
 0x12c   : > { %v1453_v19 = vpop.eup %1452  ;;  %899 = vst.msk [vmem:[%s1635_s23 + $0x78] sm:$0xf] %vm868_vm2, %v1258_v14  ;;  %1458 = vrcp.f32 %v640_v25  ;;  %v643_v28 = vadd.f32 1.0, %v1451_v5  ;;  %923 = vrot.lane.b32.xlu1 %v1239_v55, %s1476_s24 }
 0x12d   : > { %v1455_v8 = vpop.eup %1454  ;;  %1460 = vrcp.f32 %v627_v6  ;;  %v625_v9 = vadd.f32 1.0, %v1453_v19 }
 0x12e   : > { %1462 = vrcp.f32 %v643_v28  ;;  %v641_v10 = vadd.f32 1.0, %v1455_v8  ;;  %917 = vrot.lane.b32.xlu0 %v1236_v20, %s1476_s24 }
 0x12f   : > { %1464 = vrcp.f32 %v625_v9 }
 0x130   : > { %1466 = vrcp.f32 %v641_v10  ;;  %955 = vrot.lane.b32.xlu1 %v1255_v50, %s1476_s24 }
 0x132   : > { %949 = vrot.lane.b32.xlu0 %v1252_v52, %s1476_s24 }
 0x134   : > { %919 = vrot.lane.b32.xlu1 %v1237_v1, %s1476_s24 }
 0x135   : > { %v1457_v11 = vpop.eup %1456 }
 0x136   : > { %v1459_v12 = vpop.eup %1458  ;;  %v720_v13 = vmul.f32 %v1457_v11, %v1614_v22  ;;  %929 = vrot.lane.b32.xlu0 %v1242_v2, %s1476_s24 }
 0x137   : > { %v1461_v29 = vpop.eup %1460  ;;  %v736_v15 = vmul.f32 %v1459_v12, %v1617_v30 }
 0x138   : > { %v1463_v16 = vpop.eup %1462  ;;  %v1240_v17 = vpack.c.bf16 %v720_v13, %v720_v13  ;;  %v723_v31 = vmul.f32 %v1461_v29, %v1621_v38  ;;  %951 = vrot.lane.b32.xlu1 %v1253_v4, %s1476_s24 }
 0x139   : > { %v1465_v23 = vpop.eup %1464  ;;  %v1256_v26 = vpack.c.bf16 %v736_v15, %v736_v15  ;;  %v739_v34 = vmul.f32 %v1463_v16, %v1623_v39 }
 0x13a   : > { %v1467_v22 = vpop.eup %1466  ;;  %881 = vst.msk [vmem:[%s1635_s23 + $0x30] sm:$0xf] %vm868_vm2, %v1240_v17  ;;  %v1243_v30 = vpack.c.bf16 %v723_v31, %v723_v31  ;;  %v721_v27 = vmul.f32 %v1465_v23, %v1627_v48  ;;  %925 = vrot.lane.b32.xlu0 %v1240_v17, %s1476_s24 }
 0x13b   : > { %897 = vst.msk [vmem:[%s1635_s23 + $0x70] sm:$0xf] %vm868_vm2, %v1256_v26  ;;  %v1259_v32 = vpack.c.bf16 %v739_v34, %v739_v34  ;;  %v737_v38 = vmul.f32 %v1467_v22, %v1629_v49 }
 0x13c   : > { %884 = vst.msk [vmem:[%s1635_s23 + $0x3c] sm:$0xf] %vm868_vm2, %v1243_v30  ;;  %v1241_v33 = vpack.c.bf16 %v721_v27, %v721_v27  ;;  %931 = vrot.lane.b32.xlu1 %v1243_v30, %s1476_s24 }
 0x13d   : > { %900 = vst.msk [vmem:[%s1635_s23 + $0x7c] sm:$0xf] %vm868_vm2, %v1259_v32  ;;  %v1257_v39 = vpack.c.bf16 %v737_v38, %v737_v38 }
 0x13e   : > { %882 = vst.msk [vmem:[%s1635_s23 + $0x34] sm:$0xf] %vm868_vm2, %v1241_v33  ;;  %957 = vrot.lane.b32.xlu0 %v1256_v26, %s1476_s24 }
 0x13f   : > { %898 = vst.msk [vmem:[%s1635_s23 + $0x74] sm:$0xf] %vm868_vm2, %v1257_v39 }
 0x140   : > { %927 = vrot.lane.b32.xlu1 %v1241_v33, %s1476_s24 }
 0x142   : > { %961 = vrot.lane.b32.xlu0 %v1258_v14, %s1476_s24 }
 0x144   : > { %959 = vrot.lane.b32.xlu1 %v1257_v39, %s1476_s24 }
 0x148   : > { %963 = vrot.lane.b32.xlu1 %v1259_v32, %s1476_s24 }
 0x177   : > { %v906_v49 = vpop.permute.xlu1 %905 }
 0x178   : > { %v938_v48 = vpop.permute.xlu0 %937  ;;  %999 = vst.msk [vmem:[%s1790_s27 + $0x8] sm:$0xf] %vm868_vm2, %v906_v49 }
 0x179   : > { %1015 = vst.msk [vmem:[%s1790_s27 + $0x48] sm:$0xf] %vm868_vm2, %v938_v48 }
 0x17c   : > { %v902_v36 = vpop.permute.xlu0 %901  ;;  %v908_v44 = vpop.permute.xlu1 %907 }
 0x17d   : > { %997 = vst.msk [vmem:[%s1790_s27] sm:$0xf] %vm868_vm2, %v902_v36  ;;  %1000 = vst.msk [vmem:[%s1790_s27 + $0xc] sm:$0xf] %vm868_vm2, %v908_v44 }
 0x180   : > { %v934_v35 = vpop.permute.xlu0 %933  ;;  %v940_v42 = vpop.permute.xlu1 %939 }
 0x181   : > { %1013 = vst.msk [vmem:[%s1790_s27 + $0x40] sm:$0xf] %vm868_vm2, %v934_v35  ;;  %1016 = vst.msk [vmem:[%s1790_s27 + $0x4c] sm:$0xf] %vm868_vm2, %v940_v42 }
 0x184   : > { %v936_v45 = vpop.permute.xlu1 %935  ;;  %v904_v46 = vpop.permute.xlu0 %903 }
 0x185   : > { %1014 = vst.msk [vmem:[%s1790_s27 + $0x44] sm:$0xf] %vm868_vm2, %v936_v45  ;;  %998 = vst.msk [vmem:[%s1790_s27 + $0x4] sm:$0xf] %vm868_vm2, %v904_v46 }
 0x188   : > { %v914_v47 = vpop.permute.xlu0 %913  ;;  %v916_v37 = vpop.permute.xlu1 %915 }
 0x189   : > { %1003 = vst.msk [vmem:[%s1790_s27 + $0x18] sm:$0xf] %vm868_vm2, %v914_v47  ;;  %1004 = vst.msk [vmem:[%s1790_s27 + $0x1c] sm:$0xf] %vm868_vm2, %v916_v37 }
 0x18c   : > { %v946_v54 = vpop.permute.xlu0 %945 }
 0x18d   : > { %1019 = vst.msk [vmem:[%s1790_s27 + $0x58] sm:$0xf] %vm868_vm2, %v946_v54 }
 0x190   : > { %v910_v18 = vpop.permute.xlu0 %909 }
 0x191   : > { %1001 = vst.msk [vmem:[%s1790_s27 + $0x10] sm:$0xf] %vm868_vm2, %v910_v18 }
 0x192   : > { %v948_v40 = vpop.permute.xlu1 %947 }
 0x193   : > { %1020 = vst.msk [vmem:[%s1790_s27 + $0x5c] sm:$0xf] %vm868_vm2, %v948_v40 }
 0x194   : > { %v942_v43 = vpop.permute.xlu0 %941 }
 0x195   : > { %1017 = vst.msk [vmem:[%s1790_s27 + $0x50] sm:$0xf] %vm868_vm2, %v942_v43 }
 0x196   : > { %v912_v51 = vpop.permute.xlu1 %911 }
 0x197   : > { %1002 = vst.msk [vmem:[%s1790_s27 + $0x14] sm:$0xf] %vm868_vm2, %v912_v51 }
 0x198   : > { %v922_v57 = vpop.permute.xlu0 %921 }
 0x199   : > { %1007 = vst.msk [vmem:[%s1790_s27 + $0x28] sm:$0xf] %vm868_vm2, %v922_v57 }
 0x19a   : > { %v944_v20 = vpop.permute.xlu1 %943 }
 0x19b   : > { %1018 = vst.msk [vmem:[%s1790_s27 + $0x54] sm:$0xf] %vm868_vm2, %v944_v20 }
 0x19c   : > { %v954_v41 = vpop.permute.xlu0 %953 }
 0x19d   : > { %1023 = vst.msk [vmem:[%s1790_s27 + $0x68] sm:$0xf] %vm868_vm2, %v954_v41 }
 0x19e   : > { %v924_v58 = vpop.permute.xlu1 %923 }
 0x19f   : > { %1008 = vst.msk [vmem:[%s1790_s27 + $0x2c] sm:$0xf] %vm868_vm2, %v924_v58 }
 0x1a0   : > { %v918_v52 = vpop.permute.xlu0 %917 }
 0x1a1   : > { %1005 = vst.msk [vmem:[%s1790_s27 + $0x20] sm:$0xf] %vm868_vm2, %v918_v52 }
 0x1a2   : > { %v956_v53 = vpop.permute.xlu1 %955 }
 0x1a3   : > { %1024 = vst.msk [vmem:[%s1790_s27 + $0x6c] sm:$0xf] %vm868_vm2, %v956_v53 }
 0x1a4   : > { %v950_v61 = vpop.permute.xlu0 %949 }
 0x1a5   : > { %1021 = vst.msk [vmem:[%s1790_s27 + $0x60] sm:$0xf] %vm868_vm2, %v950_v61 }
 0x1a6   : > { %v920_v55 = vpop.permute.xlu1 %919 }
 0x1a7   : > { %1006 = vst.msk [vmem:[%s1790_s27 + $0x24] sm:$0xf] %vm868_vm2, %v920_v55 }
 0x1a8   : > { %v930_v0 = vpop.permute.xlu0 %929 }
 0x1a9   : > { %1011 = vst.msk [vmem:[%s1790_s27 + $0x38] sm:$0xf] %vm868_vm2, %v930_v0 }
 0x1aa   : > { %v952_v56 = vpop.permute.xlu1 %951 }
 0x1ab   : > { %1022 = vst.msk [vmem:[%s1790_s27 + $0x64] sm:$0xf] %vm868_vm2, %v952_v56 }
 0x1ac   : > { %v926_v50 = vpop.permute.xlu0 %925 }
 0x1ad   : > { %1009 = vst.msk [vmem:[%s1790_s27 + $0x30] sm:$0xf] %vm868_vm2, %v926_v50 }
 0x1ae   : > { %v932_v59 = vpop.permute.xlu1 %931 }
 0x1af   : > { %1012 = vst.msk [vmem:[%s1790_s27 + $0x3c] sm:$0xf] %vm868_vm2, %v932_v59 }
 0x1b0   : > { %v958_v60 = vpop.permute.xlu0 %957 }
 0x1b1   : > { %1025 = vst.msk [vmem:[%s1790_s27 + $0x70] sm:$0xf] %vm868_vm2, %v958_v60 }
 0x1b2   : > { %v928_v1 = vpop.permute.xlu1 %927 }
 0x1b3   : > { %1010 = vst.msk [vmem:[%s1790_s27 + $0x34] sm:$0xf] %vm868_vm2, %v928_v1 }
 0x1b4   : > { %v962_v62 = vpop.permute.xlu0 %961 }
 0x1b5   : > { %1027 = vst.msk [vmem:[%s1790_s27 + $0x78] sm:$0xf] %vm868_vm2, %v962_v62 }
 0x1b6   : > { %v960_v21 = vpop.permute.xlu1 %959 }
 0x1b7   : > { %1026 = vst.msk [vmem:[%s1790_s27 + $0x74] sm:$0xf] %vm868_vm2, %v960_v21 }
 0x1ba   : > { %v964_v4 = vpop.permute.xlu1 %963 }
 0x1bb   : > { %1028 = vst.msk [vmem:[%s1790_s27 + $0x7c] sm:$0xf] %vm868_vm2, %v964_v4 }
 0x1bc PF: > { %s14_s12 = sadd.s32 1, %s1474_s12  }
 0x1bd   : > { %p11_p4 = scmp.ge.s32.totalorder %s14_s12, 4  }
 0x1bf   :  { %13 = sbr.rel (!%p11_p4) target bundleno = 1 (0x1), region = 70 }

// kernel: c3_forward.5
= control target key start
LH: loop header
LB: loop body
LE: loop exit
PB: predicated region body
PF: predicated region fallthrough
CT: control target
= control target key end

     0   :  { %s1285_s9 = smov 0   ;;  %s1540_s0 = inlined_call_operand.vmem [shape: bf16[512,2], index: 0, kind: input, shape index: {}]   ;;  %s1541_s1 = inlined_call_operand.vmem [shape: bf16[2,2], index: 1, kind: input, shape index: {}]   ;;  %s1542_s2 = inlined_call_operand.vmem [shape: bf16[512,2], index: 2, kind: output, shape index: {}]  }
   0x1 LB: > { %s916_s10 = sadd.s32 4294967295, %s1268_s9   ;;  %p920_p0 = scmp.ge.s32.totalorder %s1268_s9, 1  ;;  %s1268_s9 = sphi %s1285_s9, %s12_s9  }
   0x2   : > { %p113_p1 = scmp.lt.s32.totalorder %s1268_s9, 3 }
   0x4   : > { %p114_p2 = pnand %p920_p0, %p113_p1 }
   0x5   : > { %v180_v0 = vld [vmem:[%s1541_s1] sm:$0x1] (!%p114_p2)  ;;  %vm310_vm0 = vcmask (!%p114_p2), 1040384   ;;  %s921_s13 = sshll.u32 (!%p114_p2), %s916_s10, 5  ;;  %vm261_vm1 = vcmask (!%p114_p2), 15360   ;;  %vm827_vm2 = vcmask (!%p114_p2), 11264  }
   0x6   : > { %117 = sbr.rel (%p114_p2) target bundleno = 320 (0x140), region = 28  ;;  %1108 = vmatprep.subr.msk.bf16.mxu0 (!%p114_p2), %vm310_vm0, %v180_v0  ;;  %1109 = vmatprep.subr.msk.bf16.mxu1 (!%p114_p2), %vm310_vm0, %v180_v0  ;;  %v312_v1 = vsel (!%p114_p2), %vm310_vm0, %v180_v0, 0  ;;  %p136_p3 = scmp.lt.s32.totalorder (!%p114_p2), %s921_s13, 63 }
   0x7   : > { %1073 = vmatpush3.bf16.msra.mxu0 (!%p114_p2), %v312_v1  ;;  %1107 = vmatpush3.bf16.msra.mxu1 (!%p114_p2), %v312_v1 }
   0xd   : > { %s1544_s13 = smov (!%p136_p3, %s921_s13), 63 }
   0xe   : > { %s922_s14 = sshll.u32 %s1544_s13, 2 }
   0xf   : > { %s1304_s17 = scalar_lea.vmem %s1540_s0, %s922_s14  ;;  %s1420_s20 = scalar_lea.vmem %s1542_s2, %s922_s14 }
  0x10   : > { %v1118_v2 = vld [vmem:[%s1304_s17] sm:$0xff]   ;;  %v1120_v4 = vld [vmem:[%s1304_s17 + $0x8] sm:$0xff]   ;;  %v1122_v6 = vld [vmem:[%s1304_s17 + $0x10] sm:$0xff]  }
  0x11   : > { %v1119_v3 = vld [vmem:[%s1304_s17 + $0x40] sm:$0xff]   ;;  %1074 = vmatprep.mubr.msk.bf16.mxu0 %vm261_vm1, %v1118_v2  ;;  %v1121_v5 = vld [vmem:[%s1304_s17 + $0x48] sm:$0xff]   ;;  %v1123_v7 = vld [vmem:[%s1304_s17 + $0x50] sm:$0xff]  }
  0x12   : > { %1090 = vmatprep.mubr.msk.bf16.mxu1 %vm261_vm1, %v1119_v3  ;;  %1075 = vmatmul.mubr.msk.bf16.vlgmr.msra.gmra.mrb[0].mxu0 %vm261_vm1, %v1120_v4  ;;  %v1124_v8 = vld [vmem:[%s1304_s17 + $0x18] sm:$0xff]   ;;  %v1126_v10 = vld [vmem:[%s1304_s17 + $0x20] sm:$0xff]   ;;  %v1128_v12 = vld [vmem:[%s1304_s17 + $0x28] sm:$0xff]  }
  0x13   : > { %1091 = vmatmul.mubr.msk.bf16.vlgmr.msra.gmra.mrb[0].mxu1 %vm261_vm1, %v1121_v5  ;;  %1078 = vmatprep.mubr.msk.bf16.mxu0 %vm261_vm1, %v1122_v6  ;;  %v1125_v9 = vld [vmem:[%s1304_s17 + $0x58] sm:$0xff]   ;;  %v1127_v11 = vld [vmem:[%s1304_s17 + $0x60] sm:$0xff]   ;;  %v1129_v13 = vld [vmem:[%s1304_s17 + $0x68] sm:$0xff]  }
  0x14   : > { %1094 = vmatprep.mubr.msk.bf16.mxu1 %vm261_vm1, %v1123_v7  ;;  %v1130_v14 = vld [vmem:[%s1304_s17 + $0x30] sm:$0xff]   ;;  %v1132_v16 = vld [vmem:[%s1304_s17 + $0x38] sm:$0xff]  }
  0x15   : > { %v1131_v15 = vld [vmem:[%s1304_s17 + $0x70] sm:$0xff]   ;;  %v1133_v17 = vld [vmem:[%s1304_s17 + $0x78] sm:$0xff]  }
  0x1a   : > { %1079 = vmatmul.mubr.msk.bf16.gmra.mrb[4].mxu0 %vm261_vm1, %v1124_v8 }
  0x1b   : > { %1095 = vmatmul.mubr.msk.bf16.gmra.mrb[4].mxu1 %vm261_vm1, %v1125_v9  ;;  %1082 = vmatprep.mubr.msk.bf16.mxu0 %vm261_vm1, %v1126_v10 }
  0x1c   : > { %1098 = vmatprep.mubr.msk.bf16.mxu1 %vm261_vm1, %v1127_v11 }
  0x22   : > { %1083 = vmatmul.mubr.msk.bf16.gmra.mrb[8].mxu0 %vm261_vm1, %v1128_v12 }
  0x23   : > { %1099 = vmatmul.mubr.msk.bf16.gmra.mrb[8].mxu1 %vm261_vm1, %v1129_v13  ;;  %1086 = vmatprep.mubr.msk.bf16.mxu0 %vm261_vm1, %v1130_v14 }
  0x24   : > { %1102 = vmatprep.mubr.msk.bf16.mxu1 %vm261_vm1, %v1131_v15 }
  0x2a   : > { %1087 = vmatmul.mubr.msk.bf16.gmra.mrb[12].mxu0 %vm261_vm1, %v1132_v16 }
  0x2b   : > { %1103 = vmatmul.mubr.msk.bf16.gmra.mrb[12].mxu1 %vm261_vm1, %v1133_v17 }
  0xe5   : > { %v1338_v18 = vpop.f32.mrb[0].mxu0 }
  0xe6   : > { %v959_v19 = vmul.f32 -1.442695, %v1338_v18  ;;  %v1341_v20 = vpop.f32.mrb[0].mxu1  ;;  %v1343_v21 = vpop.f32.mrb[1].mxu0 }
  0xe7   : > { %v975_v22 = vmul.f32 -1.442695, %v1341_v20  ;;  %v957_v23 = vmul.f32 -1.442695, %v1343_v21  ;;  %v1347_v24 = vpop.f32.mrb[1].mxu1  ;;  %v1349_v25 = vpop.f32.mrb[2].mxu0 }
  0xe8   : > { %1134 = vpow2.f32 %v959_v19  ;;  %v973_v26 = vmul.f32 -1.442695, %v1347_v24  ;;  %v960_v27 = vmul.f32 -1.442695, %v1349_v25  ;;  %v1353_v28 = vpop.f32.mrb[2].mxu1  ;;  %v1355_v29 = vpop.f32.mrb[3].mxu0 }
  0xe9   : > { %1136 = vpow2.f32 %v975_v22  ;;  %v976_v30 = vmul.f32 -1.442695, %v1353_v28  ;;  %v1358_v31 = vpop.f32.mrb[3].mxu1  ;;  %v958_v32 = vmul.f32 -1.442695, %v1355_v29 }
  0xea   : > { %1138 = vpow2.f32 %v957_v23  ;;  %v974_v33 = vmul.f32 -1.442695, %v1358_v31 }
  0xeb   : > { %1140 = vpow2.f32 %v973_v26 }
  0xec   : > { %1142 = vpow2.f32 %v960_v27 }
  0xed   : > { %1144 = vpow2.f32 %v976_v30  ;;  %v1362_v34 = vpop.f32.mrb[4].mxu0 }
  0xee   : > { %1146 = vpow2.f32 %v958_v32  ;;  %v963_v35 = vmul.f32 -1.442695, %v1362_v34  ;;  %v1365_v36 = vpop.f32.mrb[4].mxu1  ;;  %v1367_v37 = vpop.f32.mrb[5].mxu0 }
  0xef   : > { %1148 = vpow2.f32 %v974_v33  ;;  %v979_v38 = vmul.f32 -1.442695, %v1365_v36  ;;  %v961_v39 = vmul.f32 -1.442695, %v1367_v37  ;;  %v1371_v40 = vpop.f32.mrb[5].mxu1  ;;  %v1373_v41 = vpop.f32.mrb[6].mxu0 }
  0xf0   : > { %1150 = vpow2.f32 %v963_v35  ;;  %v977_v42 = vmul.f32 -1.442695, %v1371_v40  ;;  %v964_v43 = vmul.f32 -1.442695, %v1373_v41  ;;  %v1377_v44 = vpop.f32.mrb[6].mxu1  ;;  %v1379_v45 = vpop.f32.mrb[7].mxu0 }
  0xf1   : > { %1152 = vpow2.f32 %v979_v38  ;;  %v1381_v46 = vpop.f32.mrb[7].mxu1  ;;  %v980_v17 = vmul.f32 -1.442695, %v1377_v44  ;;  %v962_v27 = vmul.f32 -1.442695, %v1379_v45 }
  0xf2   : > { %v1135_v47 = vpop.eup %1134  ;;  %1154 = vpow2.f32 %v961_v39  ;;  %v978_v35 = vmul.f32 -1.442695, %v1381_v46 }
  0xf3   : > { %v1137_v48 = vpop.eup %1136  ;;  %v573_v49 = vadd.f32 1.0, %v1135_v47  ;;  %1156 = vpow2.f32 %v977_v42 }
  0xf4   : > { %v1139_v50 = vpop.eup %1138  ;;  %v589_v51 = vadd.f32 1.0, %v1137_v48  ;;  %1158 = vpow2.f32 %v964_v43 }
  0xf5   : > { %v1141_v52 = vpop.eup %1140  ;;  %1160 = vrcp.f32 %v573_v49  ;;  %v571_v53 = vadd.f32 1.0, %v1139_v50  ;;  %v1383_v54 = vpop.f32.mrb[8].mxu0 }
  0xf6   : > { %v1143_v55 = vpop.eup %1142  ;;  %1162 = vrcp.f32 %v589_v51  ;;  %v587_v56 = vadd.f32 1.0, %v1141_v52  ;;  %v1385_v57 = vpop.f32.mrb[8].mxu1 }
  0xf7   : > { %v1387_v58 = vpop.f32.mrb[9].mxu0  ;;  %v1145_v59 = vpop.eup %1144  ;;  %1164 = vrcp.f32 %v571_v53  ;;  %v574_v60 = vadd.f32 1.0, %v1143_v55  ;;  %v983_v52 = vmul.f32 -1.442695, %v1385_v57 }
  0xf8   : > { %v1389_v61 = vpop.f32.mrb[9].mxu1  ;;  %v1147_v62 = vpop.eup %1146  ;;  %1166 = vrcp.f32 %v587_v56  ;;  %v590_v63 = vadd.f32 1.0, %v1145_v59  ;;  %v965_v56 = vmul.f32 -1.442695, %v1387_v58 }
  0xf9   : > { %v1391_v0 = vpop.f32.mrb[10].mxu0  ;;  %v1393_v1 = vpop.f32.mrb[10].mxu1  ;;  %1168 = vrcp.f32 %v574_v60  ;;  %v572_v3 = vadd.f32 1.0, %v1147_v62 }
  0xfa   : > { %v1149_v2 = vpop.eup %1148  ;;  %v1395_v4 = vpop.f32.mrb[11].mxu0  ;;  %1170 = vrcp.f32 %v590_v63 }
  0xfb   : > { %v1151_v5 = vpop.eup %1150  ;;  %v588_v6 = vadd.f32 1.0, %v1149_v2  ;;  %v1397_v7 = vpop.f32.mrb[11].mxu1  ;;  %1172 = vrcp.f32 %v572_v3  ;;  %v968_v3 = vmul.f32 -1.442695, %v1391_v0 }
  0xfc   : > { %v1153_v8 = vpop.eup %1152  ;;  %v577_v9 = vadd.f32 1.0, %v1151_v5 }
  0xfd   : > { %v1155_v10 = vpop.eup %1154  ;;  %1174 = vrcp.f32 %v588_v6  ;;  %v593_v11 = vadd.f32 1.0, %v1153_v8  ;;  %v1399_v14 = vpop.f32.mrb[12].mxu0  ;;  %v984_v8 = vmul.f32 -1.442695, %v1393_v1 }
  0xfe   : > { %v1157_v12 = vpop.eup %1156  ;;  %1176 = vrcp.f32 %v577_v9  ;;  %v575_v13 = vadd.f32 1.0, %v1155_v10  ;;  %v1402_v19 = vpop.f32.mrb[12].mxu1 }
  0xff   : > { %v1159_v15 = vpop.eup %1158  ;;  %1178 = vrcp.f32 %v593_v11  ;;  %v591_v16 = vadd.f32 1.0, %v1157_v12  ;;  %v1404_v22 = vpop.f32.mrb[13].mxu0  ;;  %v966_v11 = vmul.f32 -1.442695, %v1395_v4 }
 0x100   : > { %v1161_v23 = vpop.eup %1160  ;;  %1180 = vrcp.f32 %v575_v13  ;;  %v578_v26 = vadd.f32 1.0, %v1159_v15  ;;  %v1407_v30 = vpop.f32.mrb[13].mxu1  ;;  %v982_v15 = vmul.f32 -1.442695, %v1397_v7 }
 0x101   : > { %v1163_v32 = vpop.eup %1162  ;;  %v669_v33 = vmul.f32 %v1161_v23, %v1338_v18  ;;  %1182 = vrcp.f32 %v591_v16  ;;  %v1411_v38 = vpop.f32.mrb[14].mxu0  ;;  %v967_v18 = vmul.f32 -1.442695, %v1383_v54  ;;  %v971_v23 = vmul.f32 -1.442695, %v1399_v14 }
 0x102   : > { %v1413_v39 = vpop.f32.mrb[14].mxu1  ;;  %v1165_v42 = vpop.eup %1164  ;;  %v685_v43 = vmul.f32 %v1163_v32, %v1341_v20  ;;  %1184 = vrcp.f32 %v578_v26  ;;  %v987_v32 = vmul.f32 -1.442695, %v1402_v19 }
 0x103   : > { %v1424_v47 = vpop.f32.mrb[15].mxu0  ;;  %v1426_v48 = vpop.f32.mrb[15].mxu1  ;;  %v1025_v50 = vpack.c.bf16 %v669_v33, %v669_v33  ;;  %v667_v51 = vmul.f32 %v1165_v42, %v1343_v21  ;;  %1186 = vpow2.f32 %v980_v17  ;;  %v981_v21 = vmul.f32 -1.442695, %v1389_v61 }
 0x104   : > { %v1167_v49 = vpop.eup %1166  ;;  %v1041_v55 = vpack.c.bf16 %v685_v43, %v685_v43  ;;  %1188 = vpow2.f32 %v962_v27 }
 0x105   : > { %v1169_v53 = vpop.eup %1168  ;;  %v683_v20 = vmul.f32 %v1167_v49, %v1347_v24  ;;  %830 = vst.msk [vmem:[%s1420_s20 + $0x8] sm:$0xf] %vm827_vm2, %v1025_v50  ;;  %v1023_v60 = vpack.c.bf16 %v667_v51, %v667_v51  ;;  %1190 = vpow2.f32 %v978_v35 }
 0x106   : > { %v1171_v59 = vpop.eup %1170  ;;  %v670_v62 = vmul.f32 %v1169_v53, %v1349_v25  ;;  %846 = vst.msk [vmem:[%s1420_s20 + $0x48] sm:$0xf] %vm827_vm2, %v1041_v55  ;;  %1192 = vpow2.f32 %v967_v18 }
 0x107   : > { %v1173_v63 = vpop.eup %1172  ;;  %v1039_v2 = vpack.c.bf16 %v683_v20, %v683_v20  ;;  %v686_v24 = vmul.f32 %v1171_v59, %v1353_v28  ;;  %828 = vst.msk [vmem:[%s1420_s20] sm:$0xf] %vm827_vm2, %v1023_v60  ;;  %1194 = vpow2.f32 %v983_v52 }
 0x108   : > { %v1175_v5 = vpop.eup %1174  ;;  %v1026_v6 = vpack.c.bf16 %v670_v62, %v670_v62  ;;  %v668_v25 = vmul.f32 %v1173_v63, %v1355_v29  ;;  %1196 = vpow2.f32 %v965_v56 }
 0x109   : > { %v1177_v9 = vpop.eup %1176  ;;  %844 = vst.msk [vmem:[%s1420_s20 + $0x40] sm:$0xf] %vm827_vm2, %v1039_v2  ;;  %v1042_v10 = vpack.c.bf16 %v686_v24, %v686_v24  ;;  %v684_v28 = vmul.f32 %v1175_v5, %v1358_v31  ;;  %1198 = vpow2.f32 %v981_v21 }
 0x10a   : > { %v1179_v12 = vpop.eup %1178  ;;  %831 = vst.msk [vmem:[%s1420_s20 + $0xc] sm:$0xf] %vm827_vm2, %v1026_v6  ;;  %v1024_v13 = vpack.c.bf16 %v668_v25, %v668_v25  ;;  %v673_v29 = vmul.f32 %v1177_v9, %v1362_v34  ;;  %1200 = vpow2.f32 %v968_v3 }
 0x10b   : > { %v1181_v16 = vpop.eup %1180  ;;  %847 = vst.msk [vmem:[%s1420_s20 + $0x4c] sm:$0xf] %vm827_vm2, %v1042_v10  ;;  %v1040_v17 = vpack.c.bf16 %v684_v28, %v684_v28  ;;  %v689_v31 = vmul.f32 %v1179_v12, %v1365_v36  ;;  %1202 = vpow2.f32 %v984_v8 }
 0x10c   : > { %v1183_v26 = vpop.eup %1182  ;;  %829 = vst.msk [vmem:[%s1420_s20 + $0x4] sm:$0xf] %vm827_vm2, %v1024_v13  ;;  %v1029_v27 = vpack.c.bf16 %v673_v29, %v673_v29  ;;  %v671_v34 = vmul.f32 %v1181_v16, %v1367_v37  ;;  %1204 = vpow2.f32 %v966_v11  ;;  %v969_v11 = vmul.f32 -1.442695, %v1404_v22 }
 0x10d   : > { %v1185_v33 = vpop.eup %1184  ;;  %845 = vst.msk [vmem:[%s1420_s20 + $0x44] sm:$0xf] %vm827_vm2, %v1040_v17  ;;  %v1045_v35 = vpack.c.bf16 %v689_v31, %v689_v31  ;;  %v687_v36 = vmul.f32 %v1183_v26, %v1371_v40  ;;  %1206 = vpow2.f32 %v982_v15  ;;  %v985_v29 = vmul.f32 -1.442695, %v1407_v30 }
 0x10e   : > { %v1187_v42 = vpop.eup %1186  ;;  %834 = vst.msk [vmem:[%s1420_s20 + $0x18] sm:$0xf] %vm827_vm2, %v1029_v27  ;;  %v1027_v43 = vpack.c.bf16 %v671_v34, %v671_v34  ;;  %v674_v18 = vmul.f32 %v1185_v33, %v1373_v41  ;;  %1208 = vpow2.f32 %v971_v23  ;;  %v972_v17 = vmul.f32 -1.442695, %v1411_v38 }
 0x10f   : > { %v1189_v37 = vpop.eup %1188  ;;  %850 = vst.msk [vmem:[%s1420_s20 + $0x58] sm:$0xf] %vm827_vm2, %v1045_v35  ;;  %v1043_v49 = vpack.c.bf16 %v687_v36, %v687_v36  ;;  %v594_v50 = vadd.f32 1.0, %v1187_v42  ;;  %1210 = vpow2.f32 %v987_v32  ;;  %v988_v26 = vmul.f32 -1.442695, %v1413_v39 }
 0x110   : > { %v1191_v51 = vpop.eup %1190  ;;  %832 = vst.msk [vmem:[%s1420_s20 + $0x10] sm:$0xf] %vm827_vm2, %v1027_v43  ;;  %v1030_v40 = vpack.c.bf16 %v674_v18, %v674_v18  ;;  %v576_v52 = vadd.f32 1.0, %v1189_v37  ;;  %v970_v33 = vmul.f32 -1.442695, %v1424_v47 }
 0x111   : > { %v1193_v53 = vpop.eup %1192  ;;  %848 = vst.msk [vmem:[%s1420_s20 + $0x50] sm:$0xf] %vm827_vm2, %v1043_v49  ;;  %1212 = vrcp.f32 %v594_v50  ;;  %v592_v55 = vadd.f32 1.0, %v1191_v51  ;;  %v986_v42 = vmul.f32 -1.442695, %v1426_v48 }
 0x112   : > { %v1195_v41 = vpop.eup %1194  ;;  %835 = vst.msk [vmem:[%s1420_s20 + $0x1c] sm:$0xf] %vm827_vm2, %v1030_v40  ;;  %1214 = vrcp.f32 %v576_v52  ;;  %v581_v20 = vadd.f32 1.0, %v1193_v53 }
 0x113   : > { %v1197_v56 = vpop.eup %1196  ;;  %1216 = vrcp.f32 %v592_v55  ;;  %v597_v59 = vadd.f32 1.0, %v1195_v41 }
 0x114   : > { %v1199_v60 = vpop.eup %1198  ;;  %1218 = vrcp.f32 %v581_v20  ;;  %v579_v62 = vadd.f32 1.0, %v1197_v56 }
 0x115   : > { %v1201_v21 = vpop.eup %1200  ;;  %1220 = vrcp.f32 %v597_v59  ;;  %v595_v63 = vadd.f32 1.0, %v1199_v60 }
 0x116   : > { %v1203_v2 = vpop.eup %1202  ;;  %1222 = vrcp.f32 %v579_v62  ;;  %v582_v24 = vadd.f32 1.0, %v1201_v21 }
 0x117   : > { %v1205_v3 = vpop.eup %1204  ;;  %1224 = vrcp.f32 %v595_v63  ;;  %v598_v5 = vadd.f32 1.0, %v1203_v2 }
 0x118   : > { %v1207_v6 = vpop.eup %1206  ;;  %1226 = vrcp.f32 %v582_v24  ;;  %v580_v25 = vadd.f32 1.0, %v1205_v3 }
 0x119   : > { %v1209_v8 = vpop.eup %1208  ;;  %1228 = vrcp.f32 %v598_v5  ;;  %v596_v9 = vadd.f32 1.0, %v1207_v6 }
 0x11a   : > { %v1211_v10 = vpop.eup %1210  ;;  %1230 = vrcp.f32 %v580_v25  ;;  %v585_v28 = vadd.f32 1.0, %v1209_v8 }
 0x11b   : > { %v1213_v12 = vpop.eup %1212  ;;  %1232 = vrcp.f32 %v596_v9  ;;  %v601_v13 = vadd.f32 1.0, %v1211_v10 }
 0x11c   : > { %v1215_v15 = vpop.eup %1214  ;;  %v690_v16 = vmul.f32 %v1213_v12, %v1377_v44  ;;  %1234 = vrcp.f32 %v585_v28 }
 0x11d   : > { %v1217_v31 = vpop.eup %1216  ;;  %v672_v23 = vmul.f32 %v1215_v15, %v1379_v45  ;;  %1236 = vrcp.f32 %v601_v13 }
 0x11e   : > { %v1219_v27 = vpop.eup %1218  ;;  %v1046_v34 = vpack.c.bf16 %v690_v16, %v690_v16  ;;  %v688_v32 = vmul.f32 %v1217_v31, %v1381_v46  ;;  %1238 = vpow2.f32 %v969_v11 }
 0x11f   : > { %v1221_v35 = vpop.eup %1220  ;;  %v1028_v44 = vpack.c.bf16 %v672_v23, %v672_v23  ;;  %v677_v36 = vmul.f32 %v1219_v27, %v1383_v54  ;;  %1240 = vpow2.f32 %v985_v29 }
 0x120   : > { %v1223_v45 = vpop.eup %1222  ;;  %851 = vst.msk [vmem:[%s1420_s20 + $0x5c] sm:$0xf] %vm827_vm2, %v1046_v34  ;;  %v1044_v43 = vpack.c.bf16 %v688_v32, %v688_v32  ;;  %v693_v18 = vmul.f32 %v1221_v35, %v1385_v57  ;;  %1242 = vpow2.f32 %v972_v17 }
 0x121   : > { %v1225_v46 = vpop.eup %1224  ;;  %833 = vst.msk [vmem:[%s1420_s20 + $0x14] sm:$0xf] %vm827_vm2, %v1028_v44  ;;  %v1033_v37 = vpack.c.bf16 %v677_v36, %v677_v36  ;;  %v675_v49 = vmul.f32 %v1223_v45, %v1387_v58  ;;  %1244 = vpow2.f32 %v988_v26 }
 0x122   : > { %v1227_v54 = vpop.eup %1226  ;;  %849 = vst.msk [vmem:[%s1420_s20 + $0x54] sm:$0xf] %vm827_vm2, %v1044_v43  ;;  %v1049_v50 = vpack.c.bf16 %v693_v18, %v693_v18  ;;  %v691_v51 = vmul.f32 %v1225_v46, %v1389_v61  ;;  %1246 = vpow2.f32 %v970_v33 }
 0x123   : > { %v1229_v40 = vpop.eup %1228  ;;  %838 = vst.msk [vmem:[%s1420_s20 + $0x28] sm:$0xf] %vm827_vm2, %v1033_v37  ;;  %v1031_v57 = vpack.c.bf16 %v675_v49, %v675_v49  ;;  %v678_v52 = vmul.f32 %v1227_v54, %v1391_v0  ;;  %1248 = vpow2.f32 %v986_v42 }
 0x124   : > { %v1231_v53 = vpop.eup %1230  ;;  %854 = vst.msk [vmem:[%s1420_s20 + $0x68] sm:$0xf] %vm827_vm2, %v1049_v50  ;;  %v1047_v58 = vpack.c.bf16 %v691_v51, %v691_v51  ;;  %v694_v55 = vmul.f32 %v1229_v40, %v1393_v1 }
 0x125   : > { %v1233_v41 = vpop.eup %1232  ;;  %836 = vst.msk [vmem:[%s1420_s20 + $0x20] sm:$0xf] %vm827_vm2, %v1031_v57  ;;  %v1034_v61 = vpack.c.bf16 %v678_v52, %v678_v52  ;;  %v676_v20 = vmul.f32 %v1231_v53, %v1395_v4 }
 0x126   : > { %v1235_v56 = vpop.eup %1234  ;;  %852 = vst.msk [vmem:[%s1420_s20 + $0x60] sm:$0xf] %vm827_vm2, %v1047_v58  ;;  %v1050_v0 = vpack.c.bf16 %v694_v55, %v694_v55  ;;  %v692_v59 = vmul.f32 %v1233_v41, %v1397_v7 }
 0x127   : > { %v1237_v60 = vpop.eup %1236  ;;  %839 = vst.msk [vmem:[%s1420_s20 + $0x2c] sm:$0xf] %vm827_vm2, %v1034_v61  ;;  %v1032_v62 = vpack.c.bf16 %v676_v20, %v676_v20  ;;  %v681_v1 = vmul.f32 %v1235_v56, %v1399_v14 }
 0x128   : > { %v1239_v21 = vpop.eup %1238  ;;  %855 = vst.msk [vmem:[%s1420_s20 + $0x6c] sm:$0xf] %vm827_vm2, %v1050_v0  ;;  %v1048_v63 = vpack.c.bf16 %v692_v59, %v692_v59  ;;  %v697_v4 = vmul.f32 %v1237_v60, %v1402_v19 }
 0x129   : > { %v1241_v2 = vpop.eup %1240  ;;  %837 = vst.msk [vmem:[%s1420_s20 + $0x24] sm:$0xf] %vm827_vm2, %v1032_v62  ;;  %v1037_v24 = vpack.c.bf16 %v681_v1, %v681_v1  ;;  %v583_v3 = vadd.f32 1.0, %v1239_v21 }
 0x12a   : > { %v1243_v7 = vpop.eup %1242  ;;  %853 = vst.msk [vmem:[%s1420_s20 + $0x64] sm:$0xf] %vm827_vm2, %v1048_v63  ;;  %v1053_v5 = vpack.c.bf16 %v697_v4, %v697_v4  ;;  %v599_v6 = vadd.f32 1.0, %v1241_v2 }
 0x12b   : > { %v1245_v25 = vpop.eup %1244  ;;  %842 = vst.msk [vmem:[%s1420_s20 + $0x38] sm:$0xf] %vm827_vm2, %v1037_v24  ;;  %1250 = vrcp.f32 %v583_v3  ;;  %v586_v14 = vadd.f32 1.0, %v1243_v7 }
 0x12c   : > { %v1247_v8 = vpop.eup %1246  ;;  %858 = vst.msk [vmem:[%s1420_s20 + $0x78] sm:$0xf] %vm827_vm2, %v1053_v5  ;;  %1252 = vrcp.f32 %v599_v6  ;;  %v602_v19 = vadd.f32 1.0, %v1245_v25 }
 0x12d   : > { %v1249_v9 = vpop.eup %1248  ;;  %1254 = vrcp.f32 %v586_v14  ;;  %v584_v10 = vadd.f32 1.0, %v1247_v8 }
 0x12e   : > { %1256 = vrcp.f32 %v602_v19  ;;  %v600_v28 = vadd.f32 1.0, %v1249_v9 }
 0x12f   : > { %1258 = vrcp.f32 %v584_v10 }
 0x130   : > { %1260 = vrcp.f32 %v600_v28 }
 0x135   : > { %v1251_v11 = vpop.eup %1250 }
 0x136   : > { %v1253_v12 = vpop.eup %1252  ;;  %v679_v13 = vmul.f32 %v1251_v11, %v1404_v22 }
 0x137   : > { %v1255_v29 = vpop.eup %1254  ;;  %v695_v15 = vmul.f32 %v1253_v12, %v1407_v30 }
 0x138   : > { %v1257_v16 = vpop.eup %1256  ;;  %v1035_v17 = vpack.c.bf16 %v679_v13, %v679_v13  ;;  %v682_v31 = vmul.f32 %v1255_v29, %v1411_v38 }
 0x139   : > { %v1259_v23 = vpop.eup %1258  ;;  %v1051_v26 = vpack.c.bf16 %v695_v15, %v695_v15  ;;  %v698_v27 = vmul.f32 %v1257_v16, %v1413_v39 }
 0x13a   : > { %v1261_v34 = vpop.eup %1260  ;;  %840 = vst.msk [vmem:[%s1420_s20 + $0x30] sm:$0xf] %vm827_vm2, %v1035_v17  ;;  %v1038_v32 = vpack.c.bf16 %v682_v31, %v682_v31  ;;  %v680_v22 = vmul.f32 %v1259_v23, %v1424_v47 }
 0x13b   : > { %856 = vst.msk [vmem:[%s1420_s20 + $0x70] sm:$0xf] %vm827_vm2, %v1051_v26  ;;  %v1054_v30 = vpack.c.bf16 %v698_v27, %v698_v27  ;;  %v696_v33 = vmul.f32 %v1261_v34, %v1426_v48 }
 0x13c   : > { %843 = vst.msk [vmem:[%s1420_s20 + $0x3c] sm:$0xf] %vm827_vm2, %v1038_v32  ;;  %v1036_v35 = vpack.c.bf16 %v680_v22, %v680_v22 }
 0x13d   : > { %859 = vst.msk [vmem:[%s1420_s20 + $0x7c] sm:$0xf] %vm827_vm2, %v1054_v30  ;;  %v1052_v38 = vpack.c.bf16 %v696_v33, %v696_v33 }
 0x13e   : > { %841 = vst.msk [vmem:[%s1420_s20 + $0x34] sm:$0xf] %vm827_vm2, %v1036_v35 }
 0x13f   : > { %857 = vst.msk [vmem:[%s1420_s20 + $0x74] sm:$0xf] %vm827_vm2, %v1052_v38 }
 0x140 PF: > { %s12_s9 = sadd.s32 1, %s1268_s9  }
 0x141   : > { %p9_p4 = scmp.ge.s32.totalorder %s12_s9, 4  }
 0x143   :  { %11 = sbr.rel (!%p9_p4) target bundleno = 1 (0x1), region = 58 }

// kernel: c3_forward.7
= control target key start
LH: loop header
LB: loop body
LE: loop exit
PB: predicated region body
PF: predicated region fallthrough
CT: control target
= control target key end

     0   :  { %s1647_s15 = smov 0   ;;  %s1939_s0 = inlined_call_operand.vmem [shape: bf16[512,2], index: 0, kind: input, shape index: {}]   ;;  %s1940_s1 = inlined_call_operand.vmem [shape: bf16[512,2], index: 1, kind: input, shape index: {}]   ;;  %s1941_s2 = inlined_call_operand.vmem [shape: bf16[2,4], index: 2, kind: input, shape index: {}]   ;;  %s1942_s3 = inlined_call_operand.vmem [shape: bf16[2,4], index: 3, kind: input, shape index: {}]   ;;  %s1943_s4 = inlined_call_operand.vmem [shape: f32[512,4], index: 4, kind: output, shape index: {}]  }
   0x1 LB: > { %s1201_s16 = sadd.s32 4294967295, %s1620_s15   ;;  %p1205_p0 = scmp.ge.s32.totalorder %s1620_s15, 1  ;;  %s1620_s15 = sphi %s1647_s15, %s14_s15  }
   0x2   : > { %p174_p1 = scmp.lt.s32.totalorder %s1620_s15, 3 }
   0x4   : > { %p175_p2 = pnand %p1205_p0, %p174_p1 }
   0x5   : > { %v289_v0 = vld [vmem:[%s1942_s3] sm:$0x1] (!%p175_p2)  ;;  %vm419_vm0 = vcmask (!%p175_p2), 1040384   ;;  %s1206_s21 = sshll.u32 (!%p175_p2), %s1201_s16, 5  ;;  %vm370_vm1 = vcmask (!%p175_p2), 15360   ;;  %vm1100_vm2 = vcmask (!%p175_p2), 31744  }
   0x6   : > { %178 = sbr.rel (%p175_p2) target bundleno = 326 (0x146), region = 36  ;;  %v256_v1 = vld [vmem:[%s1941_s2] sm:$0x1] (!%p175_p2)  ;;  %1444 = vmatprep.subr.msk.bf16.mxu1 (!%p175_p2), %vm419_vm0, %v289_v0  ;;  %v421_v2 = vsel (!%p175_p2), %vm419_vm0, %v289_v0, 0  ;;  %p206_p3 = scmp.lt.s32.totalorder (!%p175_p2), %s1206_s21, 63 }
   0x7   : > { %1445 = vmatprep.subr.msk.bf16.mxu0 (!%p175_p2), %vm419_vm0, %v256_v1  ;;  %v713_v3 = vsel (!%p175_p2), %vm419_vm0, %v256_v1, 0  ;;  %1345 = vmatpush3.bf16.msra.mxu1 (!%p175_p2), %v421_v2 }
   0x8   : > { %1379 = vmatpush3.bf16.msra.mxu0 (!%p175_p2), %v713_v3 }
   0xd   : > { %s1945_s21 = smov (!%p206_p3, %s1206_s21), 63 }
   0xe   : > { %s1207_s22 = sshll.u32 %s1945_s21, 2  ;;  %s1211_s29 = sshll.u32 %s1945_s21, 3 }
   0xf   : > { %s1667_s25 = scalar_lea.vmem %s1940_s1, %s1207_s22  ;;  %s1672_s28 = scalar_lea.vmem %s1939_s0, %s1207_s22 }
  0x10   : > { %v1454_v4 = vld [vmem:[%s1667_s25] sm:$0xff]   ;;  %v1456_v6 = vld [vmem:[%s1667_s25 + $0x8] sm:$0xff]   ;;  %v1458_v8 = vld [vmem:[%s1667_s25 + $0x10] sm:$0xff]   ;;  %s1785_s6 = scalar_lea.vmem %s1943_s4, %s1211_s29 }
  0x11   : > { %v1455_v5 = vld [vmem:[%s1672_s28] sm:$0xff]   ;;  %1346 = vmatprep.mubr.msk.bf16.mxu1 %vm370_vm1, %v1454_v4  ;;  %v1457_v7 = vld [vmem:[%s1672_s28 + $0x8] sm:$0xff]   ;;  %v1459_v9 = vld [vmem:[%s1672_s28 + $0x10] sm:$0xff]  }
  0x12   : > { %1380 = vmatprep.mubr.msk.bf16.mxu0 %vm370_vm1, %v1455_v5  ;;  %1347 = vmatmul.mubr.msk.bf16.vlgmr.msra.gmra.mrb[0].mxu1 %vm370_vm1, %v1456_v6  ;;  %v1460_v10 = vld [vmem:[%s1667_s25 + $0x18] sm:$0xff]   ;;  %v1462_v12 = vld [vmem:[%s1667_s25 + $0x20] sm:$0xff]   ;;  %v1464_v14 = vld [vmem:[%s1667_s25 + $0x28] sm:$0xff]  }
  0x13   : > { %1381 = vmatmul.mubr.msk.bf16.vlgmr.msra.gmra.mrb[0].mxu0 %vm370_vm1, %v1457_v7  ;;  %1350 = vmatprep.mubr.msk.bf16.mxu1 %vm370_vm1, %v1458_v8  ;;  %v1461_v11 = vld [vmem:[%s1672_s28 + $0x18] sm:$0xff]   ;;  %v1463_v13 = vld [vmem:[%s1672_s28 + $0x20] sm:$0xff]   ;;  %v1465_v15 = vld [vmem:[%s1672_s28 + $0x28] sm:$0xff]  }
  0x14   : > { %1384 = vmatprep.mubr.msk.bf16.mxu0 %vm370_vm1, %v1459_v9  ;;  %v1466_v16 = vld [vmem:[%s1667_s25 + $0x30] sm:$0xff]   ;;  %v1468_v18 = vld [vmem:[%s1667_s25 + $0x38] sm:$0xff]   ;;  %v1470_v20 = vld [vmem:[%s1667_s25 + $0x40] sm:$0xff]  }
  0x15   : > { %v1467_v17 = vld [vmem:[%s1672_s28 + $0x30] sm:$0xff]   ;;  %v1469_v19 = vld [vmem:[%s1672_s28 + $0x38] sm:$0xff]   ;;  %v1471_v21 = vld [vmem:[%s1672_s28 + $0x40] sm:$0xff]  }
  0x16   : > { %v1472_v22 = vld [vmem:[%s1667_s25 + $0x48] sm:$0xff]   ;;  %v1474_v24 = vld [vmem:[%s1667_s25 + $0x50] sm:$0xff]   ;;  %v1476_v26 = vld [vmem:[%s1667_s25 + $0x58] sm:$0xff]  }
  0x17   : > { %v1473_v23 = vld [vmem:[%s1672_s28 + $0x48] sm:$0xff]   ;;  %v1475_v25 = vld [vmem:[%s1672_s28 + $0x50] sm:$0xff]   ;;  %v1477_v27 = vld [vmem:[%s1672_s28 + $0x58] sm:$0xff]  }
  0x18   : > { %v1478_v28 = vld [vmem:[%s1667_s25 + $0x60] sm:$0xff]   ;;  %v1480_v30 = vld [vmem:[%s1667_s25 + $0x68] sm:$0xff]   ;;  %v1482_v32 = vld [vmem:[%s1667_s25 + $0x70] sm:$0xff]  }
  0x19   : > { %v1479_v29 = vld [vmem:[%s1672_s28 + $0x60] sm:$0xff]   ;;  %v1481_v31 = vld [vmem:[%s1672_s28 + $0x68] sm:$0xff]   ;;  %v1483_v33 = vld [vmem:[%s1672_s28 + $0x70] sm:$0xff]  }
  0x1a   : > { %1351 = vmatmul.mubr.msk.bf16.gmra.mrb[4].mxu1 %vm370_vm1, %v1460_v10  ;;  %v1484_v34 = vld [vmem:[%s1667_s25 + $0x78] sm:$0xff]  }
  0x1b   : > { %1385 = vmatmul.mubr.msk.bf16.gmra.mrb[4].mxu0 %vm370_vm1, %v1461_v11  ;;  %1354 = vmatprep.mubr.msk.bf16.mxu1 %vm370_vm1, %v1462_v12  ;;  %v1485_v35 = vld [vmem:[%s1672_s28 + $0x78] sm:$0xff]  }
  0x1c   : > { %1388 = vmatprep.mubr.msk.bf16.mxu0 %vm370_vm1, %v1463_v13 }
  0x22   : > { %1355 = vmatmul.mubr.msk.bf16.gmra.mrb[8].mxu1 %vm370_vm1, %v1464_v14 }
  0x23   : > { %1389 = vmatmul.mubr.msk.bf16.gmra.mrb[8].mxu0 %vm370_vm1, %v1465_v15  ;;  %1358 = vmatprep.mubr.msk.bf16.mxu1 %vm370_vm1, %v1466_v16 }
  0x24   : > { %1392 = vmatprep.mubr.msk.bf16.mxu0 %vm370_vm1, %v1467_v17 }
  0x2a   : > { %1359 = vmatmul.mubr.msk.bf16.gmra.mrb[12].mxu1 %vm370_vm1, %v1468_v18 }
  0x2b   : > { %1393 = vmatmul.mubr.msk.bf16.gmra.mrb[12].mxu0 %vm370_vm1, %v1469_v19  ;;  %1362 = vmatprep.mubr.msk.bf16.mxu1 %vm370_vm1, %v1470_v20 }
  0x2c   : > { %1396 = vmatprep.mubr.msk.bf16.mxu0 %vm370_vm1, %v1471_v21 }
  0x32   : > { %1363 = vmatmul.mubr.msk.bf16.gmra.mrb[16].mxu1 %vm370_vm1, %v1472_v22 }
  0x33   : > { %1397 = vmatmul.mubr.msk.bf16.gmra.mrb[16].mxu0 %vm370_vm1, %v1473_v23  ;;  %1366 = vmatprep.mubr.msk.bf16.mxu1 %vm370_vm1, %v1474_v24 }
  0x34   : > { %1400 = vmatprep.mubr.msk.bf16.mxu0 %vm370_vm1, %v1475_v25 }
  0x3a   : > { %1367 = vmatmul.mubr.msk.bf16.gmra.mrb[20].mxu1 %vm370_vm1, %v1476_v26 }
  0x3b   : > { %1401 = vmatmul.mubr.msk.bf16.gmra.mrb[20].mxu0 %vm370_vm1, %v1477_v27  ;;  %1370 = vmatprep.mubr.msk.bf16.mxu1 %vm370_vm1, %v1478_v28 }
  0x3c   : > { %1404 = vmatprep.mubr.msk.bf16.mxu0 %vm370_vm1, %v1479_v29 }
  0x42   : > { %1371 = vmatmul.mubr.msk.bf16.gmra.mrb[24].mxu1 %vm370_vm1, %v1480_v30 }
  0x43   : > { %1405 = vmatmul.mubr.msk.bf16.gmra.mrb[24].mxu0 %vm370_vm1, %v1481_v31  ;;  %1374 = vmatprep.mubr.msk.bf16.mxu1 %vm370_vm1, %v1482_v32 }
  0x44   : > { %1408 = vmatprep.mubr.msk.bf16.mxu0 %vm370_vm1, %v1483_v33 }
  0x4a   : > { %1375 = vmatmul.mubr.msk.bf16.gmra.mrb[28].mxu1 %vm370_vm1, %v1484_v34 }
  0x4b   : > { %1409 = vmatmul.mubr.msk.bf16.gmra.mrb[28].mxu0 %vm370_vm1, %v1485_v35 }
  0xe5   : > { %v1348_v36 = vpop.f32.mrb[0].mxu1 }
  0xe6   : > { %v1382_v37 = vpop.f32.mrb[0].mxu0  ;;  %v457_v38 = vpop.f32.mrb[1].mxu1 }
  0xe7   : > { %v1738_v39 = vadd.f32 %v1382_v37, %v1348_v36  ;;  %v749_v40 = vpop.f32.mrb[1].mxu0  ;;  %v1349_v41 = vpop.f32.mrb[2].mxu1 }
  0xe8   : > { %v1740_v42 = vadd.f32 %v749_v40, %v457_v38  ;;  %v1383_v43 = vpop.f32.mrb[2].mxu0  ;;  %v460_v44 = vpop.f32.mrb[3].mxu1 }
  0xe9   : > { %v1278_v45 = vmul.f32 -1.442695, %v1738_v39  ;;  %v1743_v46 = vadd.f32 %v1383_v43, %v1349_v41  ;;  %v752_v47 = vpop.f32.mrb[3].mxu0 }
  0xea   : > { %v1276_v48 = vmul.f32 -1.442695, %v1740_v42  ;;  %v1746_v49 = vadd.f32 %v752_v47, %v460_v44 }
  0xeb   : > { %1486 = vpow2.f32 %v1278_v45  ;;  %v1279_v50 = vmul.f32 -1.442695, %v1743_v46 }
  0xec   : > { %1488 = vpow2.f32 %v1276_v48  ;;  %v1277_v51 = vmul.f32 -1.442695, %v1746_v49 }
  0xed   : > { %1490 = vpow2.f32 %v1279_v50  ;;  %v1352_v52 = vpop.f32.mrb[4].mxu1 }
  0xee   : > { %1492 = vpow2.f32 %v1277_v51  ;;  %v1386_v53 = vpop.f32.mrb[4].mxu0  ;;  %v473_v54 = vpop.f32.mrb[5].mxu1 }
  0xef   : > { %v1750_v55 = vadd.f32 %v1386_v53, %v1352_v52  ;;  %v765_v56 = vpop.f32.mrb[5].mxu0  ;;  %v1353_v57 = vpop.f32.mrb[6].mxu1 }
  0xf0   : > { %v1752_v58 = vadd.f32 %v765_v56, %v473_v54  ;;  %v1387_v59 = vpop.f32.mrb[6].mxu0  ;;  %v476_v60 = vpop.f32.mrb[7].mxu1 }
  0xf1   : > { %v1282_v61 = vmul.f32 -1.442695, %v1750_v55  ;;  %v1755_v62 = vadd.f32 %v1387_v59, %v1353_v57  ;;  %v768_v63 = vpop.f32.mrb[7].mxu0 }
  0xf2   : > { %v1280_v0 = vmul.f32 -1.442695, %v1752_v58  ;;  %v1758_v1 = vadd.f32 %v768_v63, %v476_v60 }
  0xf3   : > { %1494 = vpow2.f32 %v1282_v61  ;;  %v1283_v2 = vmul.f32 -1.442695, %v1755_v62 }
  0xf4   : > { %1496 = vpow2.f32 %v1280_v0  ;;  %v1281_v3 = vmul.f32 -1.442695, %v1758_v1 }
  0xf5   : > { %v1487_v4 = vpop.eup %1486  ;;  %1498 = vpow2.f32 %v1283_v2  ;;  %v1356_v5 = vpop.f32.mrb[8].mxu1 }
  0xf6   : > { %v1489_v6 = vpop.eup %1488  ;;  %v974_v7 = vadd.f32 1.0, %v1487_v4  ;;  %1500 = vpow2.f32 %v1281_v3  ;;  %v1390_v8 = vpop.f32.mrb[8].mxu0 }
  0xf7   : > { %v489_v9 = vpop.f32.mrb[9].mxu1  ;;  %v1491_v10 = vpop.eup %1490  ;;  %v972_v11 = vadd.f32 1.0, %v1489_v6  ;;  %v1762_v12 = vadd.f32 %v1390_v8, %v1356_v5 }
  0xf8   : > { %v781_v13 = vpop.f32.mrb[9].mxu0  ;;  %v1357_v14 = vpop.f32.mrb[10].mxu1  ;;  %1502 = vrcp.f32 %v974_v7  ;;  %v975_v16 = vadd.f32 1.0, %v1491_v10 }
  0xf9   : > { %v1493_v15 = vpop.eup %1492  ;;  %v1764_v17 = vadd.f32 %v781_v13, %v489_v9  ;;  %v1391_v18 = vpop.f32.mrb[10].mxu0  ;;  %1504 = vrcp.f32 %v972_v11  ;;  %v1286_v21 = vmul.f32 -1.442695, %v1762_v12 }
  0xfa   : > { %v492_v19 = vpop.f32.mrb[11].mxu1  ;;  %v973_v20 = vadd.f32 1.0, %v1493_v15  ;;  %v1767_v22 = vadd.f32 %v1391_v18, %v1357_v14  ;;  %v784_v23 = vpop.f32.mrb[11].mxu0  ;;  %1506 = vrcp.f32 %v975_v16 }
  0xfb   : > { %v1284_v24 = vmul.f32 -1.442695, %v1764_v17  ;;  %v1770_v25 = vadd.f32 %v784_v23, %v492_v19 }
  0xfc   : > { %1508 = vrcp.f32 %v973_v20  ;;  %v1287_v26 = vmul.f32 -1.442695, %v1767_v22 }
  0xfd   : > { %1510 = vpow2.f32 %v1286_v21  ;;  %v1285_v27 = vmul.f32 -1.442695, %v1770_v25  ;;  %v1495_v28 = vpop.eup %1494  ;;  %v1360_v29 = vpop.f32.mrb[12].mxu1 }
  0xfe   : > { %1512 = vpow2.f32 %v1284_v24  ;;  %v1497_v30 = vpop.eup %1496  ;;  %v978_v31 = vadd.f32 1.0, %v1495_v28  ;;  %v1394_v32 = vpop.f32.mrb[12].mxu0 }
  0xff   : > { %1514 = vpow2.f32 %v1287_v26  ;;  %v505_v33 = vpop.f32.mrb[13].mxu1  ;;  %v1499_v34 = vpop.eup %1498  ;;  %v976_v35 = vadd.f32 1.0, %v1497_v30  ;;  %v1775_v36 = vadd.f32 %v1394_v32, %v1360_v29 }
 0x100   : > { %1516 = vpow2.f32 %v1285_v27  ;;  %v797_v37 = vpop.f32.mrb[13].mxu0  ;;  %v1361_v38 = vpop.f32.mrb[14].mxu1  ;;  %v979_v41 = vadd.f32 1.0, %v1499_v34 }
 0x101   : > { %v1501_v40 = vpop.eup %1500  ;;  %1518 = vrcp.f32 %v978_v31  ;;  %v1777_v43 = vadd.f32 %v797_v37, %v505_v33  ;;  %v1395_v44 = vpop.f32.mrb[14].mxu0  ;;  %v1290_v48 = vmul.f32 -1.442695, %v1775_v36 }
 0x102   : > { %v508_v45 = vpop.f32.mrb[15].mxu1  ;;  %1520 = vrcp.f32 %v976_v35  ;;  %v977_v47 = vadd.f32 1.0, %v1501_v40  ;;  %v1780_v50 = vadd.f32 %v1395_v44, %v1361_v38  ;;  %v800_v51 = vpop.f32.mrb[15].mxu0 }
 0x103   : > { %v1503_v52 = vpop.eup %1502  ;;  %1522 = vrcp.f32 %v979_v41  ;;  %v1288_v53 = vmul.f32 -1.442695, %v1777_v43  ;;  %v1788_v54 = vadd.f32 %v800_v51, %v508_v45 }
 0x104   : > { %v1505_v56 = vpop.eup %1504  ;;  %v1070_v57 = vmul.f32 %v1503_v52, %v1738_v39  ;;  %1524 = vrcp.f32 %v977_v47  ;;  %v1291_v59 = vmul.f32 -1.442695, %v1780_v50 }
 0x105   : > { %v1507_v60 = vpop.eup %1506  ;;  %v1068_v61 = vmul.f32 %v1505_v56, %v1740_v42  ;;  %1526 = vpow2.f32 %v1290_v48  ;;  %v1289_v63 = vmul.f32 -1.442695, %v1788_v54  ;;  %v1364_v3 = vpop.f32.mrb[16].mxu1 }
 0x106   : > { %v1509_v0 = vpop.eup %1508  ;;  %1103 = vst.msk [vmem:[%s1785_s6 + $0x10] sm:$0xff] %vm1100_vm2, %v1070_v57  ;;  %v1071_v2 = vmul.f32 %v1507_v60, %v1743_v46  ;;  %1528 = vpow2.f32 %v1288_v53  ;;  %v1398_v5 = vpop.f32.mrb[16].mxu0 }
 0x107   : > { %v1511_v4 = vpop.eup %1510  ;;  %1101 = vst.msk [vmem:[%s1785_s6] sm:$0xff] %vm1100_vm2, %v1068_v61  ;;  %v1069_v39 = vmul.f32 %v1509_v0, %v1746_v49  ;;  %1530 = vpow2.f32 %v1291_v59  ;;  %v521_v6 = vpop.f32.mrb[17].mxu1  ;;  %v1802_v8 = vadd.f32 %v1398_v5, %v1364_v3 }
 0x108   : > { %v1513_v42 = vpop.eup %1512  ;;  %1104 = vst.msk [vmem:[%s1785_s6 + $0x18] sm:$0xff] %vm1100_vm2, %v1071_v2  ;;  %v982_v7 = vadd.f32 1.0, %v1511_v4  ;;  %1532 = vpow2.f32 %v1289_v63  ;;  %v813_v9 = vpop.f32.mrb[17].mxu0 }
 0x109   : > { %v1365_v46 = vpop.f32.mrb[18].mxu1  ;;  %v1515_v10 = vpop.eup %1514  ;;  %1102 = vst.msk [vmem:[%s1785_s6 + $0x8] sm:$0xff] %vm1100_vm2, %v1069_v39  ;;  %v980_v11 = vadd.f32 1.0, %v1513_v42  ;;  %v1806_v13 = vadd.f32 %v813_v9, %v521_v6  ;;  %v1294_v18 = vmul.f32 -1.442695, %v1802_v8 }
 0x10a   : > { %v1399_v14 = vpop.f32.mrb[18].mxu0  ;;  %v524_v49 = vpop.f32.mrb[19].mxu1  ;;  %1534 = vrcp.f32 %v982_v7  ;;  %v983_v16 = vadd.f32 1.0, %v1515_v10 }
 0x10b   : > { %v1517_v15 = vpop.eup %1516  ;;  %v1809_v19 = vadd.f32 %v1399_v14, %v1365_v46  ;;  %v816_v20 = vpop.f32.mrb[19].mxu0  ;;  %1536 = vrcp.f32 %v980_v11  ;;  %v1292_v24 = vmul.f32 -1.442695, %v1806_v13 }
 0x10c   : > { %v1519_v21 = vpop.eup %1518  ;;  %v981_v23 = vadd.f32 1.0, %v1517_v15  ;;  %v1812_v26 = vadd.f32 %v816_v20, %v524_v49  ;;  %1538 = vrcp.f32 %v983_v16 }
 0x10d   : > { %v1521_v27 = vpop.eup %1520  ;;  %v1074_v28 = vmul.f32 %v1519_v21, %v1750_v55  ;;  %v1295_v29 = vmul.f32 -1.442695, %v1809_v19  ;;  %v1368_v35 = vpop.f32.mrb[20].mxu1 }
 0x10e   : > { %v1523_v30 = vpop.eup %1522  ;;  %v1072_v31 = vmul.f32 %v1521_v27, %v1752_v58  ;;  %1540 = vrcp.f32 %v981_v23  ;;  %v1293_v32 = vmul.f32 -1.442695, %v1812_v26  ;;  %v1402_v38 = vpop.f32.mrb[20].mxu0 }
 0x10f   : > { %v1525_v33 = vpop.eup %1524  ;;  %1107 = vst.msk [vmem:[%s1785_s6 + $0x30] sm:$0xff] %vm1100_vm2, %v1074_v28  ;;  %v1075_v34 = vmul.f32 %v1523_v30, %v1755_v62  ;;  %1542 = vpow2.f32 %v1294_v18  ;;  %v537_v40 = vpop.f32.mrb[21].mxu1  ;;  %v1826_v44 = vadd.f32 %v1402_v38, %v1368_v35 }
 0x110   : > { %v1527_v37 = vpop.eup %1526  ;;  %1105 = vst.msk [vmem:[%s1785_s6 + $0x20] sm:$0xff] %vm1100_vm2, %v1072_v31  ;;  %v1073_v55 = vmul.f32 %v1525_v33, %v1758_v1  ;;  %1544 = vpow2.f32 %v1292_v24  ;;  %v829_v45 = vpop.f32.mrb[21].mxu0 }
 0x111   : > { %v1529_v58 = vpop.eup %1528  ;;  %1108 = vst.msk [vmem:[%s1785_s6 + $0x38] sm:$0xff] %vm1100_vm2, %v1075_v34  ;;  %v986_v41 = vadd.f32 1.0, %v1527_v37  ;;  %1546 = vpow2.f32 %v1295_v29  ;;  %v1369_v62 = vpop.f32.mrb[22].mxu1  ;;  %v1830_v51 = vadd.f32 %v829_v45, %v537_v40  ;;  %v1298_v57 = vmul.f32 -1.442695, %v1826_v44 }
 0x112   : > { %v1531_v47 = vpop.eup %1530  ;;  %1106 = vst.msk [vmem:[%s1785_s6 + $0x28] sm:$0xff] %vm1100_vm2, %v1073_v55  ;;  %v984_v48 = vadd.f32 1.0, %v1529_v58  ;;  %1548 = vpow2.f32 %v1293_v32  ;;  %v1403_v1 = vpop.f32.mrb[22].mxu0 }
 0x113   : > { %v540_v52 = vpop.f32.mrb[23].mxu1  ;;  %v1533_v53 = vpop.eup %1532  ;;  %1550 = vrcp.f32 %v986_v41  ;;  %v987_v56 = vadd.f32 1.0, %v1531_v47  ;;  %v1833_v59 = vadd.f32 %v1403_v1, %v1369_v62  ;;  %v1296_v63 = vmul.f32 -1.442695, %v1830_v51 }
 0x114   : > { %v832_v60 = vpop.f32.mrb[23].mxu0  ;;  %1552 = vrcp.f32 %v984_v48  ;;  %v985_v61 = vadd.f32 1.0, %v1533_v53  ;;  %v1535_v2 = vpop.eup %1534 }
 0x115   : > { %v1836_v0 = vadd.f32 %v832_v60, %v540_v52  ;;  %1554 = vrcp.f32 %v987_v56  ;;  %v1299_v3 = vmul.f32 -1.442695, %v1833_v59  ;;  %v1537_v4 = vpop.eup %1536  ;;  %v1078_v39 = vmul.f32 %v1535_v2, %v1762_v12  ;;  %v1372_v7 = vpop.f32.mrb[24].mxu1 }
 0x116   : > { %1556 = vrcp.f32 %v985_v61  ;;  %v1539_v6 = vpop.eup %1538  ;;  %v1076_v42 = vmul.f32 %v1537_v4, %v1764_v17  ;;  %v1406_v10 = vpop.f32.mrb[24].mxu0 }
 0x117   : > { %v1297_v5 = vmul.f32 -1.442695, %v1836_v0  ;;  %1558 = vpow2.f32 %v1298_v57  ;;  %1111 = vst.msk [vmem:[%s1785_s6 + $0x50] sm:$0xff] %vm1100_vm2, %v1078_v39  ;;  %v1079_v46 = vmul.f32 %v1539_v6, %v1767_v22  ;;  %v553_v11 = vpop.f32.mrb[25].mxu1  ;;  %v1848_v49 = vadd.f32 %v1406_v10, %v1372_v7  ;;  %v845_v17 = vpop.f32.mrb[25].mxu0 }
 0x118   : > { %v1541_v9 = vpop.eup %1540  ;;  %1560 = vpow2.f32 %v1296_v63  ;;  %1109 = vst.msk [vmem:[%s1785_s6 + $0x40] sm:$0xff] %vm1100_vm2, %v1076_v42  ;;  %v1373_v15 = vpop.f32.mrb[26].mxu1  ;;  %v1852_v22 = vadd.f32 %v845_v17, %v553_v11 }
 0x119   : > { %v1543_v14 = vpop.eup %1542  ;;  %v1077_v12 = vmul.f32 %v1541_v9, %v1770_v25  ;;  %1562 = vpow2.f32 %v1299_v3  ;;  %1112 = vst.msk [vmem:[%s1785_s6 + $0x58] sm:$0xff] %vm1100_vm2, %v1079_v46  ;;  %v1407_v20 = vpop.f32.mrb[26].mxu0  ;;  %v1302_v30 = vmul.f32 -1.442695, %v1848_v49 }
 0x11a   : > { %v1545_v16 = vpop.eup %1544  ;;  %v990_v18 = vadd.f32 1.0, %v1543_v14  ;;  %1564 = vpow2.f32 %v1297_v5  ;;  %v556_v21 = vpop.f32.mrb[27].mxu1  ;;  %v1856_v27 = vadd.f32 %v1407_v20, %v1373_v15  ;;  %v1300_v34 = vmul.f32 -1.442695, %v1852_v22 }
 0x11b   : > { %v1547_v23 = vpop.eup %1546  ;;  %1110 = vst.msk [vmem:[%s1785_s6 + $0x48] sm:$0xff] %vm1100_vm2, %v1077_v12  ;;  %v988_v24 = vadd.f32 1.0, %v1545_v16  ;;  %v848_v25 = vpop.f32.mrb[27].mxu0 }
 0x11c   : > { %v1549_v28 = vpop.eup %1548  ;;  %1566 = vrcp.f32 %v990_v18  ;;  %v991_v29 = vadd.f32 1.0, %v1547_v23  ;;  %v1859_v31 = vadd.f32 %v848_v25, %v556_v21  ;;  %v1303_v55 = vmul.f32 -1.442695, %v1856_v27 }
 0x11d   : > { %v1551_v32 = vpop.eup %1550  ;;  %1568 = vrcp.f32 %v988_v24  ;;  %v989_v33 = vadd.f32 1.0, %v1549_v28  ;;  %v1376_v41 = vpop.f32.mrb[28].mxu1 }
 0x11e   : > { %v1553_v35 = vpop.eup %1552  ;;  %v1082_v37 = vmul.f32 %v1551_v32, %v1775_v36  ;;  %1570 = vrcp.f32 %v991_v29  ;;  %v1301_v58 = vmul.f32 -1.442695, %v1859_v31  ;;  %v1410_v47 = vpop.f32.mrb[28].mxu0 }
 0x11f   : > { %v1555_v38 = vpop.eup %1554  ;;  %v1080_v40 = vmul.f32 %v1553_v35, %v1777_v43  ;;  %1572 = vrcp.f32 %v989_v33  ;;  %v569_v48 = vpop.f32.mrb[29].mxu1  ;;  %v1872_v43 = vadd.f32 %v1410_v47, %v1376_v41 }
 0x120   : > { %v1557_v45 = vpop.eup %1556  ;;  %1115 = vst.msk [vmem:[%s1785_s6 + $0x70] sm:$0xff] %vm1100_vm2, %v1082_v37  ;;  %v1083_v62 = vmul.f32 %v1555_v38, %v1780_v50  ;;  %1574 = vpow2.f32 %v1302_v30  ;;  %v861_v52 = vpop.f32.mrb[29].mxu0 }
 0x121   : > { %v1559_v36 = vpop.eup %1558  ;;  %1113 = vst.msk [vmem:[%s1785_s6 + $0x60] sm:$0xff] %vm1100_vm2, %v1080_v40  ;;  %v1081_v1 = vmul.f32 %v1557_v45, %v1788_v54  ;;  %1576 = vpow2.f32 %v1300_v34  ;;  %v1377_v53 = vpop.f32.mrb[30].mxu1  ;;  %v1876_v50 = vadd.f32 %v861_v52, %v569_v48  ;;  %v1306_v5 = vmul.f32 -1.442695, %v1872_v43 }
 0x122   : > { %v1561_v56 = vpop.eup %1560  ;;  %1116 = vst.msk [vmem:[%s1785_s6 + $0x78] sm:$0xff] %vm1100_vm2, %v1083_v62  ;;  %v994_v57 = vadd.f32 1.0, %v1559_v36  ;;  %1578 = vpow2.f32 %v1303_v55  ;;  %v1411_v60 = vpop.f32.mrb[30].mxu0 }
 0x123   : > { %v572_v61 = vpop.f32.mrb[31].mxu1  ;;  %v1563_v63 = vpop.eup %1562  ;;  %1114 = vst.msk [vmem:[%s1785_s6 + $0x68] sm:$0xff] %vm1100_vm2, %v1081_v1  ;;  %v992_v2 = vadd.f32 1.0, %v1561_v56  ;;  %1580 = vpow2.f32 %v1301_v58  ;;  %v1880_v54 = vadd.f32 %v1411_v60, %v1377_v53  ;;  %v1304_v7 = vmul.f32 -1.442695, %v1876_v50 }
 0x124   : > { %v864_v3 = vpop.f32.mrb[31].mxu0  ;;  %v1565_v4 = vpop.eup %1564  ;;  %1582 = vrcp.f32 %v994_v57  ;;  %v995_v39 = vadd.f32 1.0, %v1563_v63 }
 0x125   : > { %v1883_v6 = vadd.f32 %v864_v3, %v572_v61  ;;  %1584 = vrcp.f32 %v992_v2  ;;  %v993_v42 = vadd.f32 1.0, %v1565_v4  ;;  %v1307_v46 = vmul.f32 -1.442695, %v1880_v54 }
 0x126   : > { %v1567_v9 = vpop.eup %1566  ;;  %1586 = vrcp.f32 %v995_v39 }
 0x127   : > { %v1569_v10 = vpop.eup %1568  ;;  %v1086_v11 = vmul.f32 %v1567_v9, %v1802_v8  ;;  %1588 = vrcp.f32 %v993_v42  ;;  %v1305_v14 = vmul.f32 -1.442695, %v1883_v6 }
 0x128   : > { %v1571_v12 = vpop.eup %1570  ;;  %v1084_v17 = vmul.f32 %v1569_v10, %v1806_v13  ;;  %1590 = vpow2.f32 %v1306_v5 }
 0x129   : > { %v1573_v15 = vpop.eup %1572  ;;  %1119 = vst.msk [vmem:[%s1785_s6 + $0x90] sm:$0xff] %vm1100_vm2, %v1086_v11  ;;  %v1087_v16 = vmul.f32 %v1571_v12, %v1809_v19  ;;  %1592 = vpow2.f32 %v1304_v7 }
 0x12a   : > { %v1575_v18 = vpop.eup %1574  ;;  %1117 = vst.msk [vmem:[%s1785_s6 + $0x80] sm:$0xff] %vm1100_vm2, %v1084_v17  ;;  %v1085_v20 = vmul.f32 %v1573_v15, %v1812_v26  ;;  %1594 = vpow2.f32 %v1307_v46 }
 0x12b   : > { %v1577_v8 = vpop.eup %1576  ;;  %1120 = vst.msk [vmem:[%s1785_s6 + $0x98] sm:$0xff] %vm1100_vm2, %v1087_v16  ;;  %v998_v21 = vadd.f32 1.0, %v1575_v18  ;;  %1596 = vpow2.f32 %v1305_v14 }
 0x12c   : > { %v1579_v23 = vpop.eup %1578  ;;  %1118 = vst.msk [vmem:[%s1785_s6 + $0x88] sm:$0xff] %vm1100_vm2, %v1085_v20  ;;  %v996_v13 = vadd.f32 1.0, %v1577_v8 }
 0x12d   : > { %v1581_v24 = vpop.eup %1580  ;;  %1598 = vrcp.f32 %v998_v21  ;;  %v999_v19 = vadd.f32 1.0, %v1579_v23 }
 0x12e   : > { %v1583_v25 = vpop.eup %1582  ;;  %1600 = vrcp.f32 %v996_v13  ;;  %v997_v28 = vadd.f32 1.0, %v1581_v24 }
 0x12f   : > { %v1585_v26 = vpop.eup %1584  ;;  %v1090_v29 = vmul.f32 %v1583_v25, %v1826_v44  ;;  %1602 = vrcp.f32 %v999_v19 }
 0x130   : > { %v1587_v30 = vpop.eup %1586  ;;  %v1088_v32 = vmul.f32 %v1585_v26, %v1830_v51  ;;  %1604 = vrcp.f32 %v997_v28 }
 0x131   : > { %v1589_v33 = vpop.eup %1588  ;;  %1123 = vst.msk [vmem:[%s1785_s6 + $0xb0] sm:$0xff] %vm1100_vm2, %v1090_v29  ;;  %v1091_v34 = vmul.f32 %v1587_v30, %v1833_v59 }
 0x132   : > { %v1591_v35 = vpop.eup %1590  ;;  %1121 = vst.msk [vmem:[%s1785_s6 + $0xa0] sm:$0xff] %vm1100_vm2, %v1088_v32  ;;  %v1089_v37 = vmul.f32 %v1589_v33, %v1836_v0 }
 0x133   : > { %v1593_v55 = vpop.eup %1592  ;;  %1124 = vst.msk [vmem:[%s1785_s6 + $0xb8] sm:$0xff] %vm1100_vm2, %v1091_v34  ;;  %v1002_v38 = vadd.f32 1.0, %v1591_v35 }
 0x134   : > { %v1595_v44 = vpop.eup %1594  ;;  %1122 = vst.msk [vmem:[%s1785_s6 + $0xa8] sm:$0xff] %vm1100_vm2, %v1089_v37  ;;  %v1000_v51 = vadd.f32 1.0, %v1593_v55 }
 0x135   : > { %v1597_v40 = vpop.eup %1596  ;;  %1606 = vrcp.f32 %v1002_v38  ;;  %v1003_v58 = vadd.f32 1.0, %v1595_v44 }
 0x136   : > { %1608 = vrcp.f32 %v1000_v51  ;;  %v1001_v59 = vadd.f32 1.0, %v1597_v40 }
 0x137   : > { %v1599_v41 = vpop.eup %1598  ;;  %1610 = vrcp.f32 %v1003_v58 }
 0x138   : > { %v1601_v0 = vpop.eup %1600  ;;  %v1094_v45 = vmul.f32 %v1599_v41, %v1848_v49  ;;  %1612 = vrcp.f32 %v1001_v59 }
 0x139   : > { %v1603_v62 = vpop.eup %1602  ;;  %v1092_v47 = vmul.f32 %v1601_v0, %v1852_v22 }
 0x13a   : > { %v1605_v48 = vpop.eup %1604  ;;  %1127 = vst.msk [vmem:[%s1785_s6 + $0xd0] sm:$0xff] %vm1100_vm2, %v1094_v45  ;;  %v1095_v36 = vmul.f32 %v1603_v62, %v1856_v27 }
 0x13b   : > { %1125 = vst.msk [vmem:[%s1785_s6 + $0xc0] sm:$0xff] %vm1100_vm2, %v1092_v47  ;;  %v1093_v1 = vmul.f32 %v1605_v48, %v1859_v31 }
 0x13c   : > { %1128 = vst.msk [vmem:[%s1785_s6 + $0xd8] sm:$0xff] %vm1100_vm2, %v1095_v36 }
 0x13d   : > { %1126 = vst.msk [vmem:[%s1785_s6 + $0xc8] sm:$0xff] %vm1100_vm2, %v1093_v1 }
 0x13f   : > { %v1607_v49 = vpop.eup %1606 }
 0x140   : > { %v1609_v52 = vpop.eup %1608  ;;  %v1098_v22 = vmul.f32 %v1607_v49, %v1872_v43 }
 0x141   : > { %v1611_v53 = vpop.eup %1610  ;;  %v1096_v56 = vmul.f32 %v1609_v52, %v1876_v50 }
 0x142   : > { %v1613_v57 = vpop.eup %1612  ;;  %1131 = vst.msk [vmem:[%s1785_s6 + $0xf0] sm:$0xff] %vm1100_vm2, %v1098_v22  ;;  %v1099_v27 = vmul.f32 %v1611_v53, %v1880_v54 }
 0x143   : > { %1129 = vst.msk [vmem:[%s1785_s6 + $0xe0] sm:$0xff] %vm1100_vm2, %v1096_v56  ;;  %v1097_v31 = vmul.f32 %v1613_v57, %v1883_v6 }
 0x144   : > { %1132 = vst.msk [vmem:[%s1785_s6 + $0xf8] sm:$0xff] %vm1100_vm2, %v1099_v27 }
 0x145   : > { %1130 = vst.msk [vmem:[%s1785_s6 + $0xe8] sm:$0xff] %vm1100_vm2, %v1097_v31 }
 0x146 PF: > { %s14_s15 = sadd.s32 1, %s1620_s15  }
 0x147   : > { %p11_p4 = scmp.ge.s32.totalorder %s14_s15, 4  }
 0x149   :  { %13 = sbr.rel (!%p11_p4) target bundleno = 1 (0x1), region = 69 }

// kernel: c3_forward.6
= control target key start
LH: loop header
LB: loop body
LE: loop exit
PB: predicated region body
PF: predicated region fallthrough
CT: control target
= control target key end

     0   :  { %s2542_s12 = smov 0   ;;  %s2987_s0 = inlined_call_operand.vmem [shape: bf16[2,18,16,6], index: 0, kind: input, shape index: {}]   ;;  %s2988_s1 = inlined_call_operand.vmem [shape: bf16[3,6,2], index: 1, kind: input, shape index: {}]   ;;  %s2989_s2 = inlined_call_operand.vmem [shape: bf16[512,2], index: 2, kind: input, shape index: {}]   ;;  %s2990_s3 = inlined_call_operand.vmem [shape: bf16[512,2], index: 3, kind: output, shape index: {}]  }
   0x1 LB: > { %s2548_s13 = sadd.s32 4294967295, %s2520_s12   ;;  %p1761_p0 = scmp.ge.s32.totalorder %s2520_s12, 1  ;;  %s2520_s12 = sphi %s2542_s12, %s13_s12  }
   0x2   : > { %p148_p1 = scmp.lt.s32.totalorder %s2520_s12, 3 }
   0x4   : > { %p149_p2 = pnand %p1761_p0, %p148_p1 }
   0x5   : > { %v1799_v0 = vld [vmem:[%s2988_s1 + $0x4] sm:$0x7] (!%p149_p2)  ;;  %vm392_vm0 = vcmask (!%p149_p2), 1042432   ;;  %v227_v1 = vld [vmem:[%s2988_s1] sm:$0x7] (!%p149_p2)  ;;  %p177_p3 = scmp.lt.s32.totalorder (!%p149_p2), %s2548_s13, 1 }
   0x6   : > { %152 = sbr.rel (%p149_p2) target bundleno = 364 (0x16c), region = 32  ;;  %2325 = vmatprep.subr.msk.bf16.mxu1 (!%p149_p2), %vm392_vm0, %v1799_v0  ;;  %2326 = vmatprep.subr.msk.bf16.mxu0 (!%p149_p2), %vm392_vm0, %v227_v1  ;;  %v394_v2 = vsel (!%p149_p2), %vm392_vm0, %v1799_v0, 0  ;;  %v686_v3 = vsel (!%p149_p2), %vm392_vm0, %v227_v1, 0  ;;  %v1896_v4 = vld [vmem:[%s2988_s1 + $0x8] sm:$0x7] (!%p149_p2)  ;;  %vm343_vm1 = vcmask (!%p149_p2), 48128  }
   0x7   : > { %2158 = vmatpush3.bf16.msra.mxu1 (!%p149_p2), %v394_v2  ;;  %2192 = vmatpush3.bf16.msra.mxu0 (!%p149_p2), %v686_v3  ;;  %v1013_v9 = vsel (!%p149_p2), %vm392_vm0, %v1896_v4, 0  ;;  %s1763_s25 = sshll.u32 (!%p149_p2), %s2548_s13, 5  ;;  %vm1656_vm2 = vcmask (!%p149_p2), 11264  }
   0x8   : > { %2327 = vmatprep.subr.msk.bf16.mxu1 (!%p149_p2), %vm392_vm0, %v227_v1  ;;  %2328 = vmatprep.subr.msk.bf16.mxu0 (!%p149_p2), %vm392_vm0, %v1896_v4  ;;  %p183_p4 = scmp.lt.s32.totalorder (!%p149_p2), %s1763_s25, 63 }
   0xd   : > { %s178_s20 = scalar_select %p177_p3, %s2548_s13, 1 }
   0xe   : > { %s2992_s25 = smov (!%p183_p4, %s1763_s25), 63 }
   0xf   : > { %s2329_s21 = smul.u32 144, %s178_s20  ;;  %s1764_s26 = sshll.u32 %s2992_s25, 2 }
  0x10   : > { %s2714_s29 = scalar_lea.vmem %s2989_s2, %s1764_s26  ;;  %s2790_s5 = scalar_lea.vmem %s2990_s3, %s1764_s26 }
  0x11   : > { %s2572_s24 = scalar_lea.vmem %s2987_s0, %s2329_s21 }
  0x12   : > { %v2338_v5 = vld [vmem:[%s2572_s24 + $0x8] sm:$0xff]   ;;  %v2339_v6 = vld [vmem:[%s2572_s24] sm:$0xff]   ;;  %v2340_v7 = vld [vmem:[%s2572_s24 + $0x10] sm:$0xff]  }
  0x13   : > { %2159 = vmatprep.mubr.msk.bf16.mxu1 %vm343_vm1, %v2338_v5  ;;  %2193 = vmatprep.mubr.msk.bf16.mxu0 %vm343_vm1, %v2339_v6  ;;  %v2341_v8 = vld [vmem:[%s2572_s24 + $0x8] sm:$0xff]   ;;  %v2342_v10 = vld [vmem:[%s2572_s24 + $0x18] sm:$0xff]   ;;  %v2343_v11 = vld [vmem:[%s2572_s24 + $0x10] sm:$0xff]  }
  0x14   : > { %2160 = vmatmul.mubr.msk.bf16.vlgmr.msra.gmra.mrb[0].mxu1 %vm343_vm1, %v2340_v7  ;;  %2194 = vmatmul.mubr.msk.bf16.vlgmr.msra.gmra.mrb[0].mxu0 %vm343_vm1, %v2341_v8  ;;  %v2344_v12 = vld [vmem:[%s2572_s24 + $0x20] sm:$0xff]   ;;  %v2345_v13 = vld [vmem:[%s2572_s24 + $0x18] sm:$0xff]   ;;  %v2346_v14 = vld [vmem:[%s2572_s24 + $0x28] sm:$0xff]  }
  0x15   : > { %2260 = vmatpush3.bf16.msra.mxu1 %v686_v3  ;;  %2226 = vmatpush3.bf16.msra.mxu0 %v1013_v9  ;;  %v2347_v15 = vld [vmem:[%s2572_s24 + $0x20] sm:$0xff]   ;;  %v2348_v16 = vld [vmem:[%s2572_s24 + $0x30] sm:$0xff]   ;;  %v2349_v17 = vld [vmem:[%s2572_s24 + $0x28] sm:$0xff]  }
  0x16   : > { %2163 = vmatprep.mubr.msk.bf16.mxu1 %vm343_vm1, %v2342_v10  ;;  %2197 = vmatprep.mubr.msk.bf16.mxu0 %vm343_vm1, %v2343_v11  ;;  %v2350_v18 = vld [vmem:[%s2572_s24 + $0x38] sm:$0xff]   ;;  %v2351_v19 = vld [vmem:[%s2572_s24 + $0x30] sm:$0xff]   ;;  %v2352_v20 = vld [vmem:[%s2572_s24 + $0x40] sm:$0xff]  }
  0x17   : > { %v2353_v21 = vld [vmem:[%s2572_s24 + $0x38] sm:$0xff]   ;;  %v2354_v22 = vld [vmem:[%s2572_s24 + $0x48] sm:$0xff]   ;;  %v2355_v23 = vld [vmem:[%s2572_s24 + $0x10] sm:$0xff]  }
  0x18   : > { %v2356_v24 = vld [vmem:[%s2572_s24 + $0x50] sm:$0xff]   ;;  %v2357_v25 = vld [vmem:[%s2572_s24 + $0x18] sm:$0xff]   ;;  %v2359_v27 = vld [vmem:[%s2572_s24 + $0x20] sm:$0xff]  }
  0x19   : > { %v2358_v26 = vld [vmem:[%s2572_s24 + $0x58] sm:$0xff]   ;;  %v2360_v28 = vld [vmem:[%s2572_s24 + $0x60] sm:$0xff]   ;;  %v2361_v29 = vld [vmem:[%s2572_s24 + $0x28] sm:$0xff]  }
  0x1a   : > { %v2362_v30 = vld [vmem:[%s2572_s24 + $0x68] sm:$0xff]   ;;  %v2363_v31 = vld [vmem:[%s2572_s24 + $0x30] sm:$0xff]   ;;  %v2365_v33 = vld [vmem:[%s2572_s24 + $0x38] sm:$0xff]  }
  0x1b   : > { %v2364_v32 = vld [vmem:[%s2572_s24 + $0x70] sm:$0xff]   ;;  %v2366_v34 = vld [vmem:[%s2572_s24 + $0x78] sm:$0xff]   ;;  %v2367_v35 = vld [vmem:[%s2572_s24 + $0x40] sm:$0xff]  }
  0x1c   : > { %2164 = vmatmul.mubr.msk.bf16.gmra.mrb[4].mxu1 %vm343_vm1, %v2344_v12  ;;  %2198 = vmatmul.mubr.msk.bf16.gmra.mrb[4].mxu0 %vm343_vm1, %v2345_v13  ;;  %v2368_v36 = vld [vmem:[%s2572_s24 + $0x80] sm:$0xff]   ;;  %v2369_v37 = vld [vmem:[%s2572_s24 + $0x48] sm:$0xff]   ;;  %v2371_v39 = vld [vmem:[%s2572_s24 + $0x50] sm:$0xff]  }
  0x1d   : > { %2167 = vmatprep.mubr.msk.bf16.mxu1 %vm343_vm1, %v2346_v14  ;;  %2201 = vmatprep.mubr.msk.bf16.mxu0 %vm343_vm1, %v2347_v15  ;;  %v2370_v38 = vld [vmem:[%s2572_s24 + $0x40] sm:$0xff]   ;;  %v2372_v40 = vld [vmem:[%s2572_s24 + $0x48] sm:$0xff]   ;;  %v2373_v41 = vld [vmem:[%s2572_s24 + $0x58] sm:$0xff]  }
  0x1e   : > { %v2374_v42 = vld [vmem:[%s2572_s24 + $0x50] sm:$0xff]   ;;  %v2375_v43 = vld [vmem:[%s2572_s24 + $0x60] sm:$0xff]   ;;  %v2376_v44 = vld [vmem:[%s2572_s24 + $0x58] sm:$0xff]  }
  0x1f   : > { %v2377_v45 = vld [vmem:[%s2572_s24 + $0x68] sm:$0xff]   ;;  %v2378_v46 = vld [vmem:[%s2572_s24 + $0x60] sm:$0xff]   ;;  %v2379_v47 = vld [vmem:[%s2572_s24 + $0x70] sm:$0xff]  }
  0x20   : > { %v2380_v48 = vld [vmem:[%s2572_s24 + $0x68] sm:$0xff]   ;;  %v2381_v49 = vld [vmem:[%s2572_s24 + $0x78] sm:$0xff]   ;;  %v2382_v50 = vld [vmem:[%s2572_s24 + $0x70] sm:$0xff]  }
  0x21   : > { %v2383_v51 = vld [vmem:[%s2572_s24 + $0x80] sm:$0xff]   ;;  %v2384_v52 = vld [vmem:[%s2572_s24 + $0x78] sm:$0xff]   ;;  %v2385_v53 = vld [vmem:[%s2572_s24 + $0x88] sm:$0xff]  }
  0x24   : > { %2168 = vmatmul.mubr.msk.bf16.gmra.mrb[8].mxu1 %vm343_vm1, %v2348_v16  ;;  %2202 = vmatmul.mubr.msk.bf16.gmra.mrb[8].mxu0 %vm343_vm1, %v2349_v17 }
  0x25   : > { %2171 = vmatprep.mubr.msk.bf16.mxu1 %vm343_vm1, %v2350_v18  ;;  %2205 = vmatprep.mubr.msk.bf16.mxu0 %vm343_vm1, %v2351_v19 }
  0x2c   : > { %2172 = vmatmul.mubr.msk.bf16.gmra.mrb[12].mxu1 %vm343_vm1, %v2352_v20  ;;  %2206 = vmatmul.mubr.msk.bf16.gmra.mrb[12].mxu0 %vm343_vm1, %v2353_v21 }
  0x2d   : > { %2175 = vmatprep.mubr.msk.bf16.mxu1 %vm343_vm1, %v2354_v22  ;;  %2227 = vmatprep.mubr.msk.bf16.mxu0 %vm343_vm1, %v2355_v23 }
  0x34   : > { %2176 = vmatmul.mubr.msk.bf16.gmra.mrb[16].mxu1 %vm343_vm1, %v2356_v24  ;;  %2228 = vmatmul.mubr.msk.bf16.vlgmr.msra.gmra.mrb[0].mxu0 %vm343_vm1, %v2357_v25 }
  0x35   : > { %2179 = vmatprep.mubr.msk.bf16.mxu1 %vm343_vm1, %v2358_v26  ;;  %2231 = vmatprep.mubr.msk.bf16.mxu0 %vm343_vm1, %v2359_v27 }
  0x3c   : > { %2180 = vmatmul.mubr.msk.bf16.gmra.mrb[20].mxu1 %vm343_vm1, %v2360_v28  ;;  %2232 = vmatmul.mubr.msk.bf16.gmra.mrb[4].mxu0 %vm343_vm1, %v2361_v29 }
  0x3d   : > { %2183 = vmatprep.mubr.msk.bf16.mxu1 %vm343_vm1, %v2362_v30  ;;  %2235 = vmatprep.mubr.msk.bf16.mxu0 %vm343_vm1, %v2363_v31 }
  0x44   : > { %2184 = vmatmul.mubr.msk.bf16.gmra.mrb[24].mxu1 %vm343_vm1, %v2364_v32  ;;  %2236 = vmatmul.mubr.msk.bf16.gmra.mrb[8].mxu0 %vm343_vm1, %v2365_v33 }
  0x45   : > { %2187 = vmatprep.mubr.msk.bf16.mxu1 %vm343_vm1, %v2366_v34  ;;  %2239 = vmatprep.mubr.msk.bf16.mxu0 %vm343_vm1, %v2367_v35 }
  0x4c   : > { %2188 = vmatmul.mubr.msk.bf16.gmra.mrb[28].mxu1 %vm343_vm1, %v2368_v36  ;;  %2240 = vmatmul.mubr.msk.bf16.gmra.mrb[12].mxu0 %vm343_vm1, %v2369_v37 }
  0x4d   : > { %2209 = vmatprep.mubr.msk.bf16.mxu1 %vm343_vm1, %v2370_v38  ;;  %2243 = vmatprep.mubr.msk.bf16.mxu0 %vm343_vm1, %v2371_v39 }
  0x54   : > { %2210 = vmatmul.mubr.msk.bf16.vlgmr.msra.gmra.mrb[16].mxu1 %vm343_vm1, %v2372_v40  ;;  %2244 = vmatmul.mubr.msk.bf16.gmra.mrb[16].mxu0 %vm343_vm1, %v2373_v41 }
  0x55   : > { %2213 = vmatprep.mubr.msk.bf16.mxu1 %vm343_vm1, %v2374_v42  ;;  %2247 = vmatprep.mubr.msk.bf16.mxu0 %vm343_vm1, %v2375_v43  ;;  %v2721_v42 = vld [vmem:[%s2714_s29 + $0x8] sm:$0xff]   ;;  %v2724_v43 = vld [vmem:[%s2714_s29] sm:$0xff]  }
  0x5c   : > { %2214 = vmatmul.mubr.msk.bf16.gmra.mrb[20].mxu1 %vm343_vm1, %v2376_v44  ;;  %2248 = vmatmul.mubr.msk.bf16.gmra.mrb[20].mxu0 %vm343_vm1, %v2377_v45 }
  0x5d   : > { %2217 = vmatprep.mubr.msk.bf16.mxu1 %vm343_vm1, %v2378_v46  ;;  %2251 = vmatprep.mubr.msk.bf16.mxu0 %vm343_vm1, %v2379_v47 }
  0x64   : > { %2218 = vmatmul.mubr.msk.bf16.gmra.mrb[24].mxu1 %vm343_vm1, %v2380_v48  ;;  %2252 = vmatmul.mubr.msk.bf16.gmra.mrb[24].mxu0 %vm343_vm1, %v2381_v49  ;;  %v2730_v48 = vld [vmem:[%s2714_s29 + $0x18] sm:$0xff]  }
  0x65   : > { %2221 = vmatprep.mubr.msk.bf16.mxu1 %vm343_vm1, %v2382_v50  ;;  %2255 = vmatprep.mubr.msk.bf16.mxu0 %vm343_vm1, %v2383_v51  ;;  %v2737_v51 = vld [vmem:[%s2714_s29 + $0x10] sm:$0xff]  }
  0x6c   : > { %2222 = vmatmul.mubr.msk.bf16.gmra.mrb[28].mxu1 %vm343_vm1, %v2384_v52  ;;  %2256 = vmatmul.mubr.msk.bf16.gmra.mrb[28].mxu0 %vm343_vm1, %v2385_v53  ;;  %v2033_v53 = vunpack.c.l.bf16 %v2721_v42 }
  0xe7   : > { %v2161_v54 = vpop.f32.mrb[0].mxu1 }
  0xe8   : > { %v430_v55 = vpop.f32.mrb[1].mxu1 }
  0xe9   : > { %v2162_v56 = vpop.f32.mrb[2].mxu1 }
  0xea   : > { %v433_v57 = vpop.f32.mrb[3].mxu1 }
  0xef   : > { %v2165_v58 = vpop.f32.mrb[4].mxu1 }
  0xf0   : > { %v446_v59 = vpop.f32.mrb[5].mxu1 }
  0xf1   : > { %v2166_v60 = vpop.f32.mrb[6].mxu1 }
  0xf2   : > { %v449_v61 = vpop.f32.mrb[7].mxu1 }
  0xf7   : > { %v2169_v62 = vpop.f32.mrb[8].mxu1 }
  0xf8   : > { %v462_v63 = vpop.f32.mrb[9].mxu1 }
  0xf9   : > { %v2170_v0 = vpop.f32.mrb[10].mxu1 }
  0xfa   : > { %v2671_v1 = vpop.f32.mrb[11].mxu1 }
  0xff   : > { %v2673_v2 = vpop.f32.mrb[12].mxu1 }
 0x100   : > { %v2675_v3 = vpop.f32.mrb[13].mxu1 }
 0x101   : > { %v2677_v4 = vpop.f32.mrb[14].mxu1 }
 0x102   : > { %v2679_v5 = vpop.f32.mrb[15].mxu1 }
 0x107   : > { %v2229_v6 = vpop.f32.mrb[0].mxu0 }
 0x108   : > { %v2681_v7 = vadd.f32 %v2229_v6, %v2161_v54  ;;  %v1049_v8 = vpop.f32.mrb[1].mxu0  ;;  %v2029_v54 = vunpack.c.l.bf16 %v2724_v43 }
 0x109   : > { %v2684_v9 = vadd.f32 %v1049_v8, %v430_v55  ;;  %v2230_v10 = vpop.f32.mrb[2].mxu0 }
 0x10a   : > { %v1931_v11 = vmul.f32 -1.442695, %v2681_v7  ;;  %v2687_v12 = vadd.f32 %v2230_v10, %v2162_v56  ;;  %v1052_v13 = vpop.f32.mrb[3].mxu0  ;;  %v2038_v10 = vunpack.c.h.bf16 %v2737_v51 }
 0x10b   : > { %v1929_v14 = vmul.f32 -1.442695, %v2684_v9  ;;  %v2690_v15 = vadd.f32 %v1052_v13, %v433_v57  ;;  %v2034_v57 = vunpack.c.h.bf16 %v2721_v42 }
 0x10c   : > { %2386 = vpow2.f32 %v1931_v11  ;;  %v1932_v16 = vmul.f32 -1.442695, %v2687_v12  ;;  %v2753_v11 = vld [vmem:[%s2714_s29 + $0x20] sm:$0xff]  }
 0x10d   : > { %2388 = vpow2.f32 %v1929_v14  ;;  %v1930_v17 = vmul.f32 -1.442695, %v2690_v15 }
 0x10e   : > { %2390 = vpow2.f32 %v1932_v16 }
 0x10f   : > { %2392 = vpow2.f32 %v1930_v17  ;;  %v2233_v18 = vpop.f32.mrb[4].mxu0 }
 0x110   : > { %v2696_v19 = vadd.f32 %v2233_v18, %v2165_v58  ;;  %v1065_v20 = vpop.f32.mrb[5].mxu0  ;;  %v2030_v58 = vunpack.c.h.bf16 %v2724_v43 }
 0x111   : > { %v2698_v21 = vadd.f32 %v1065_v20, %v446_v59  ;;  %v2234_v22 = vpop.f32.mrb[6].mxu0  ;;  %v2041_v59 = vunpack.c.l.bf16 %v2730_v48 }
 0x112   : > { %v1935_v23 = vmul.f32 -1.442695, %v2696_v19  ;;  %v2701_v24 = vadd.f32 %v2234_v22, %v2166_v60  ;;  %v1068_v25 = vpop.f32.mrb[7].mxu0  ;;  %v2747_v60 = vld [vmem:[%s2714_s29 + $0x28] sm:$0xff]  }
 0x113   : > { %v1933_v26 = vmul.f32 -1.442695, %v2698_v21  ;;  %v2704_v27 = vadd.f32 %v1068_v25, %v449_v61  ;;  %v2049_v18 = vunpack.c.l.bf16 %v2747_v60 }
 0x114   : > { %2394 = vpow2.f32 %v1935_v23  ;;  %v1936_v28 = vmul.f32 -1.442695, %v2701_v24 }
 0x115   : > { %2396 = vpow2.f32 %v1933_v26  ;;  %v1934_v29 = vmul.f32 -1.442695, %v2704_v27 }
 0x116   : > { %v2387_v30 = vpop.eup %2386  ;;  %2398 = vpow2.f32 %v1936_v28 }
 0x117   : > { %v2389_v31 = vpop.eup %2388  ;;  %v1306_v32 = vadd.f32 1.0, %v2387_v30  ;;  %2400 = vpow2.f32 %v1934_v29  ;;  %v2237_v33 = vpop.f32.mrb[8].mxu0  ;;  %v2045_v29 = vunpack.c.l.bf16 %v2753_v11  ;;  %v2768_v30 = vld [vmem:[%s2714_s29 + $0x38] sm:$0xff]  }
 0x118   : > { %v2391_v34 = vpop.eup %2390  ;;  %v1304_v35 = vadd.f32 1.0, %v2389_v31  ;;  %v2716_v36 = vadd.f32 %v2237_v33, %v2169_v62  ;;  %v1081_v37 = vpop.f32.mrb[9].mxu0 }
 0x119   : > { %v2393_v38 = vpop.eup %2392  ;;  %2402 = vrcp.f32 %v1306_v32  ;;  %v1307_v39 = vadd.f32 1.0, %v2391_v34  ;;  %v2718_v40 = vadd.f32 %v1081_v37, %v462_v63  ;;  %v2238_v41 = vpop.f32.mrb[10].mxu0  ;;  %v2037_v63 = vunpack.c.l.bf16 %v2737_v51  ;;  %v2777_v34 = vld [vmem:[%s2714_s29 + $0x30] sm:$0xff]  }
 0x11a   : > { %2404 = vrcp.f32 %v1304_v35  ;;  %v1305_v44 = vadd.f32 1.0, %v2393_v38  ;;  %v1939_v45 = vmul.f32 -1.442695, %v2716_v36  ;;  %v2727_v46 = vadd.f32 %v2238_v41, %v2170_v0  ;;  %v1084_v47 = vpop.f32.mrb[11].mxu0 }
 0x11b   : > { %2406 = vrcp.f32 %v1307_v39  ;;  %v1937_v49 = vmul.f32 -1.442695, %v2718_v40  ;;  %v2734_v50 = vadd.f32 %v1084_v47, %v2671_v1  ;;  %v2042_v0 = vunpack.c.h.bf16 %v2730_v48 }
 0x11c   : > { %2408 = vrcp.f32 %v1305_v44  ;;  %v1940_v52 = vmul.f32 -1.442695, %v2727_v46  ;;  %v2046_v39 = vunpack.c.h.bf16 %v2753_v11 }
 0x11d   : > { %2410 = vpow2.f32 %v1939_v45  ;;  %v1938_v55 = vmul.f32 -1.442695, %v2734_v50  ;;  %v2057_v45 = vunpack.c.l.bf16 %v2768_v30 }
 0x11e   : > { %v2395_v56 = vpop.eup %2394  ;;  %2412 = vpow2.f32 %v1937_v49 }
 0x11f   : > { %v2397_v61 = vpop.eup %2396  ;;  %v1310_v62 = vadd.f32 1.0, %v2395_v56  ;;  %2414 = vpow2.f32 %v1940_v52  ;;  %v2241_v1 = vpop.f32.mrb[12].mxu0 }
 0x120   : > { %v2399_v6 = vpop.eup %2398  ;;  %v1308_v8 = vadd.f32 1.0, %v2397_v61  ;;  %2416 = vpow2.f32 %v1938_v55  ;;  %v2756_v13 = vadd.f32 %v2241_v1, %v2673_v2  ;;  %v1097_v14 = vpop.f32.mrb[13].mxu0  ;;  %v2053_v55 = vunpack.c.l.bf16 %v2777_v34 }
 0x121   : > { %v2401_v16 = vpop.eup %2400  ;;  %2418 = vrcp.f32 %v1310_v62  ;;  %v1311_v17 = vadd.f32 1.0, %v2399_v6  ;;  %v2760_v20 = vadd.f32 %v1097_v14, %v2675_v3  ;;  %v2242_v22 = vpop.f32.mrb[14].mxu0 }
 0x122   : > { %2420 = vrcp.f32 %v1308_v8  ;;  %v1309_v23 = vadd.f32 1.0, %v2401_v16  ;;  %v1943_v25 = vmul.f32 -1.442695, %v2756_v13  ;;  %v2764_v26 = vadd.f32 %v2242_v22, %v2677_v4  ;;  %v1100_v2 = vpop.f32.mrb[15].mxu0 }
 0x123   : > { %v2403_v28 = vpop.eup %2402  ;;  %2422 = vrcp.f32 %v1311_v17  ;;  %v1941_v31 = vmul.f32 -1.442695, %v2760_v20  ;;  %v2772_v3 = vadd.f32 %v1100_v2, %v2679_v5  ;;  %v2050_v4 = vunpack.c.h.bf16 %v2747_v60 }
 0x124   : > { %v2405_v32 = vpop.eup %2404  ;;  %v1402_v33 = vmul.f32 %v2403_v28, %v2681_v7  ;;  %2424 = vrcp.f32 %v1309_v23  ;;  %v1944_v35 = vmul.f32 -1.442695, %v2764_v26 }
 0x125   : > { %v2407_v37 = vpop.eup %2406  ;;  %v1400_v38 = vmul.f32 %v2405_v32, %v2684_v9  ;;  %2426 = vpow2.f32 %v1943_v25  ;;  %v1942_v5 = vmul.f32 -1.442695, %v2772_v3 }
 0x126   : > { %v2409_v41 = vpop.eup %2408  ;;  %v1498_v44 = vadd.f32 %v2033_v53, %v1402_v33  ;;  %v1403_v7 = vmul.f32 %v2407_v37, %v2687_v12  ;;  %2428 = vpow2.f32 %v1941_v31 }
 0x127   : > { %v2211_v47 = vpop.f32.mrb[16].mxu1  ;;  %v2411_v49 = vpop.eup %2410  ;;  %v1496_v9 = vadd.f32 %v2029_v54, %v1400_v38  ;;  %v1401_v52 = vmul.f32 %v2409_v41, %v2690_v15  ;;  %2430 = vpow2.f32 %v1944_v35 }
 0x128   : > { %v2245_v53 = vpop.f32.mrb[16].mxu0  ;;  %v786_v56 = vpop.f32.mrb[17].mxu1  ;;  %v1997_v61 = vpack.c.bf16 %v1498_v44, %v1498_v44  ;;  %v1499_v62 = vadd.f32 %v2034_v57, %v1403_v7  ;;  %v1314_v1 = vadd.f32 1.0, %v2411_v49  ;;  %2432 = vpow2.f32 %v1942_v5 }
 0x129   : > { %v2413_v12 = vpop.eup %2412  ;;  %v1113_v6 = vpop.f32.mrb[17].mxu0  ;;  %v1995_v54 = vpack.c.bf16 %v1496_v9, %v1496_v9  ;;  %v1497_v15 = vadd.f32 %v2030_v58, %v1401_v52  ;;  %v2798_v17 = vadd.f32 %v2245_v53, %v2211_v47  ;;  %v2058_v44 = vunpack.c.h.bf16 %v2768_v30 }
 0x12a   : > { %v2212_v8 = vpop.f32.mrb[18].mxu1  ;;  %v2415_v14 = vpop.eup %2414  ;;  %v1312_v16 = vadd.f32 1.0, %v2413_v12  ;;  %1659 = vst.msk [vmem:[%s2790_s5 + $0x8] sm:$0xf] %vm1656_vm2, %v1997_v61  ;;  %v1998_v42 = vpack.c.bf16 %v1499_v62, %v1499_v62  ;;  %2434 = vrcp.f32 %v1314_v1  ;;  %v2802_v2 = vadd.f32 %v1113_v6, %v786_v56 }
 0x12b   : > { %v2246_v22 = vpop.f32.mrb[18].mxu0  ;;  %v789_v23 = vpop.f32.mrb[19].mxu1  ;;  %v1315_v57 = vadd.f32 1.0, %v2415_v14  ;;  %1657 = vst.msk [vmem:[%s2790_s5] sm:$0xf] %vm1656_vm2, %v1995_v54  ;;  %v1996_v43 = vpack.c.bf16 %v1497_v15, %v1497_v15 }
 0x12c   : > { %v2417_v25 = vpop.eup %2416  ;;  %v1116_v28 = vpop.f32.mrb[19].mxu0  ;;  %2436 = vrcp.f32 %v1312_v16  ;;  %v1947_v32 = vmul.f32 -1.442695, %v2798_v17  ;;  %1660 = vst.msk [vmem:[%s2790_s5 + $0xc] sm:$0xf] %vm1656_vm2, %v1998_v42  ;;  %v2811_v38 = vadd.f32 %v2246_v22, %v2212_v8 }
 0x12d   : > { %v2419_v31 = vpop.eup %2418  ;;  %v1313_v58 = vadd.f32 1.0, %v2417_v25  ;;  %2438 = vrcp.f32 %v1315_v57  ;;  %v1945_v37 = vmul.f32 -1.442695, %v2802_v2  ;;  %1658 = vst.msk [vmem:[%s2790_s5 + $0x4] sm:$0xf] %vm1656_vm2, %v1996_v43  ;;  %v2817_v7 = vadd.f32 %v1116_v28, %v789_v23 }
 0x12e   : > { %v2421_v33 = vpop.eup %2420  ;;  %v1406_v35 = vmul.f32 %v2419_v31, %v2696_v19  ;;  %v1948_v9 = vmul.f32 -1.442695, %v2811_v38  ;;  %v2842_v31 = vld [vmem:[%s2714_s29 + $0x48] sm:$0xff]  }
 0x12f   : > { %v2423_v5 = vpop.eup %2422  ;;  %v1404_v41 = vmul.f32 %v2421_v33, %v2698_v21  ;;  %2440 = vrcp.f32 %v1313_v58  ;;  %v2215_v52 = vpop.f32.mrb[20].mxu1  ;;  %v1946_v12 = vmul.f32 -1.442695, %v2817_v7 }
 0x130   : > { %v2425_v47 = vpop.eup %2424  ;;  %v1502_v49 = vadd.f32 %v2041_v59, %v1406_v35  ;;  %v1407_v19 = vmul.f32 %v2423_v5, %v2701_v24  ;;  %2442 = vpow2.f32 %v1947_v32  ;;  %v2249_v61 = vpop.f32.mrb[20].mxu0 }
 0x131   : > { %v2427_v53 = vpop.eup %2426  ;;  %v1500_v56 = vadd.f32 %v2037_v63, %v1404_v41  ;;  %v1405_v21 = vmul.f32 %v2425_v47, %v2704_v27  ;;  %2444 = vpow2.f32 %v1945_v37  ;;  %v802_v62 = vpop.f32.mrb[21].mxu1  ;;  %v2833_v25 = vadd.f32 %v2249_v61, %v2215_v52 }
 0x132   : > { %v2429_v1 = vpop.eup %2428  ;;  %v2001_v59 = vpack.c.bf16 %v1502_v49, %v1502_v49  ;;  %v1503_v24 = vadd.f32 %v2042_v0, %v1407_v19  ;;  %v1318_v6 = vadd.f32 1.0, %v2427_v53  ;;  %2446 = vpow2.f32 %v1948_v9  ;;  %v1129_v8 = vpop.f32.mrb[21].mxu0 }
 0x133   : > { %v2216_v14 = vpop.f32.mrb[22].mxu1  ;;  %v2431_v54 = vpop.eup %2430  ;;  %v1999_v63 = vpack.c.bf16 %v1500_v56, %v1500_v56  ;;  %v1501_v27 = vadd.f32 %v2038_v10, %v1405_v21  ;;  %v1316_v15 = vadd.f32 1.0, %v2429_v1  ;;  %2448 = vpow2.f32 %v1946_v12 }
 0x134   : > { %v2250_v16 = vpop.f32.mrb[22].mxu0  ;;  %v805_v22 = vpop.f32.mrb[23].mxu1  ;;  %1663 = vst.msk [vmem:[%s2790_s5 + $0x18] sm:$0xf] %vm1656_vm2, %v2001_v59  ;;  %v2002_v48 = vpack.c.bf16 %v1503_v24, %v1503_v24  ;;  %2450 = vrcp.f32 %v1318_v6  ;;  %v1319_v0 = vadd.f32 1.0, %v2431_v54  ;;  %v2837_v57 = vadd.f32 %v1129_v8, %v802_v62 }
 0x135   : > { %v2433_v23 = vpop.eup %2432  ;;  %v1132_v42 = vpop.f32.mrb[23].mxu0  ;;  %1661 = vst.msk [vmem:[%s2790_s5 + $0x10] sm:$0xf] %vm1656_vm2, %v1999_v63  ;;  %v2000_v51 = vpack.c.bf16 %v1501_v27, %v1501_v27  ;;  %2452 = vrcp.f32 %v1316_v15  ;;  %v1951_v43 = vmul.f32 -1.442695, %v2833_v25  ;;  %v2845_v58 = vadd.f32 %v2250_v16, %v2216_v14 }
 0x136   : > { %v1317_v10 = vadd.f32 1.0, %v2433_v23  ;;  %v2435_v28 = vpop.eup %2434  ;;  %1664 = vst.msk [vmem:[%s2790_s5 + $0x1c] sm:$0xf] %vm1656_vm2, %v2002_v48  ;;  %2454 = vrcp.f32 %v1319_v0  ;;  %v2847_v32 = vadd.f32 %v1132_v42, %v805_v22  ;;  %v2054_v37 = vunpack.c.h.bf16 %v2777_v34 }
 0x137   : > { %v2437_v33 = vpop.eup %2436  ;;  %1662 = vst.msk [vmem:[%s2790_s5 + $0x14] sm:$0xf] %vm1656_vm2, %v2000_v51  ;;  %v1410_v35 = vmul.f32 %v2435_v28, %v2716_v36  ;;  %v1949_v5 = vmul.f32 -1.442695, %v2837_v57  ;;  %v1952_v49 = vmul.f32 -1.442695, %v2845_v58  ;;  %v2065_v56 = vunpack.c.l.bf16 %v2842_v31 }
 0x138   : > { %2456 = vrcp.f32 %v1317_v10  ;;  %v2439_v41 = vpop.eup %2438  ;;  %v1408_v47 = vmul.f32 %v2437_v33, %v2718_v40  ;;  %v1950_v19 = vmul.f32 -1.442695, %v2847_v32  ;;  %v2219_v9 = vpop.f32.mrb[24].mxu1 }
 0x139   : > { %2458 = vpow2.f32 %v1951_v43  ;;  %v2441_v52 = vpop.eup %2440  ;;  %v1506_v53 = vadd.f32 %v2049_v18, %v1410_v35  ;;  %v1411_v36 = vmul.f32 %v2439_v41, %v2727_v46  ;;  %v2253_v21 = vpop.f32.mrb[24].mxu0 }
 0x13a   : > { %2460 = vpow2.f32 %v1949_v5  ;;  %v818_v12 = vpop.f32.mrb[25].mxu1  ;;  %v2443_v61 = vpop.eup %2442  ;;  %v1504_v40 = vadd.f32 %v2045_v29, %v1408_v47  ;;  %v1409_v62 = vmul.f32 %v2441_v52, %v2734_v50  ;;  %v2864_v1 = vadd.f32 %v2253_v21, %v2219_v9 }
 0x13b   : > { %2462 = vpow2.f32 %v1952_v49  ;;  %v1145_v59 = vpop.f32.mrb[25].mxu0  ;;  %v2220_v24 = vpop.f32.mrb[26].mxu1  ;;  %v2005_v6 = vpack.c.bf16 %v1506_v53, %v1506_v53  ;;  %v1507_v46 = vadd.f32 %v2050_v4, %v1411_v36  ;;  %v1322_v8 = vadd.f32 1.0, %v2443_v61  ;;  %v2874_v4 = vld [vmem:[%s2714_s29 + $0x40] sm:$0xff]  }
 0x13c   : > { %v2445_v18 = vpop.eup %2444  ;;  %2464 = vpow2.f32 %v1950_v19  ;;  %v2254_v14 = vpop.f32.mrb[26].mxu0  ;;  %v2003_v63 = vpack.c.bf16 %v1504_v40, %v1504_v40  ;;  %v1505_v50 = vadd.f32 %v2046_v39, %v1409_v62  ;;  %v1955_v15 = vmul.f32 -1.442695, %v2864_v1 }
 0x13d   : > { %v821_v54 = vpop.f32.mrb[27].mxu1  ;;  %v2447_v29 = vpop.eup %2446  ;;  %v1320_v27 = vadd.f32 1.0, %v2445_v18  ;;  %1667 = vst.msk [vmem:[%s2790_s5 + $0x28] sm:$0xf] %vm1656_vm2, %v2005_v6  ;;  %v2006_v60 = vpack.c.bf16 %v1507_v46, %v1507_v46  ;;  %2466 = vrcp.f32 %v1322_v8  ;;  %v2876_v48 = vadd.f32 %v1145_v59, %v818_v12 }
 0x13e   : > { %v1148_v16 = vpop.f32.mrb[27].mxu0  ;;  %v2449_v22 = vpop.eup %2448  ;;  %v1323_v23 = vadd.f32 1.0, %v2447_v29  ;;  %1665 = vst.msk [vmem:[%s2790_s5 + $0x20] sm:$0xf] %vm1656_vm2, %v2003_v63  ;;  %v2004_v11 = vpack.c.bf16 %v1505_v50, %v1505_v50  ;;  %v2880_v42 = vadd.f32 %v2254_v14, %v2220_v24  ;;  %v2061_v5 = vunpack.c.l.bf16 %v2874_v4 }
 0x13f   : > { %v2451_v0 = vpop.eup %2450  ;;  %2468 = vrcp.f32 %v1320_v27  ;;  %v1321_v39 = vadd.f32 1.0, %v2449_v22  ;;  %1668 = vst.msk [vmem:[%s2790_s5 + $0x2c] sm:$0xf] %vm1656_vm2, %v2006_v60  ;;  %v1953_v28 = vmul.f32 -1.442695, %v2876_v48  ;;  %v2886_v43 = vadd.f32 %v1148_v16, %v821_v54  ;;  %v2223_v47 = vpop.f32.mrb[28].mxu1 }
 0x140   : > { %v2453_v51 = vpop.eup %2452  ;;  %v1414_v10 = vmul.f32 %v2451_v0, %v2756_v13  ;;  %2470 = vrcp.f32 %v1323_v23  ;;  %1666 = vst.msk [vmem:[%s2790_s5 + $0x24] sm:$0xf] %vm1656_vm2, %v2004_v11  ;;  %v1956_v41 = vmul.f32 -1.442695, %v2880_v42  ;;  %v2257_v52 = vpop.f32.mrb[28].mxu0  ;;  %v2066_v50 = vunpack.c.h.bf16 %v2842_v31 }
 0x141   : > { %v2455_v33 = vpop.eup %2454  ;;  %v1412_v35 = vmul.f32 %v2453_v51, %v2760_v20  ;;  %2472 = vrcp.f32 %v1321_v39  ;;  %v1954_v9 = vmul.f32 -1.442695, %v2886_v43  ;;  %v834_v53 = vpop.f32.mrb[29].mxu1  ;;  %v2900_v12 = vadd.f32 %v2257_v52, %v2223_v47 }
 0x142   : > { %v2457_v49 = vpop.eup %2456  ;;  %v1510_v13 = vadd.f32 %v2057_v45, %v1414_v10  ;;  %v1415_v19 = vmul.f32 %v2455_v33, %v2764_v26  ;;  %2474 = vpow2.f32 %v1955_v15  ;;  %v1161_v61 = vpop.f32.mrb[29].mxu0  ;;  %v2062_v60 = vunpack.c.h.bf16 %v2874_v4 }
 0x143   : > { %v2459_v36 = vpop.eup %2458  ;;  %v1508_v20 = vadd.f32 %v2053_v55, %v1412_v35  ;;  %v1413_v21 = vmul.f32 %v2457_v49, %v2772_v3  ;;  %2476 = vpow2.f32 %v1953_v28  ;;  %v2224_v40 = vpop.f32.mrb[30].mxu1  ;;  %v2911_v34 = vadd.f32 %v1161_v61, %v834_v53 }
 0x144   : > { %v2461_v45 = vpop.eup %2460  ;;  %v2009_v62 = vpack.c.bf16 %v1510_v13, %v1510_v13  ;;  %v1511_v26 = vadd.f32 %v2058_v44, %v1415_v19  ;;  %v1326_v59 = vadd.f32 1.0, %v2459_v36  ;;  %2478 = vpow2.f32 %v1956_v41  ;;  %v2258_v24 = vpop.f32.mrb[30].mxu0  ;;  %v2101_v41 = vld [vmem:[%s2714_s29 + $0x58] sm:$0xff]   ;;  %v2100_v19 = vld [vmem:[%s2714_s29 + $0x50] sm:$0xff]  }
 0x145   : > { %v837_v18 = vpop.f32.mrb[31].mxu1  ;;  %v2463_v6 = vpop.eup %2462  ;;  %v2007_v55 = vpack.c.bf16 %v1508_v20, %v1508_v20  ;;  %v1509_v3 = vadd.f32 %v2054_v37, %v1413_v21  ;;  %v1324_v46 = vadd.f32 1.0, %v2461_v45  ;;  %2480 = vpow2.f32 %v1954_v9 }
 0x146   : > { %v1164_v8 = vpop.f32.mrb[31].mxu0  ;;  %v2465_v14 = vpop.eup %2464  ;;  %1671 = vst.msk [vmem:[%s2790_s5 + $0x38] sm:$0xf] %vm1656_vm2, %v2009_v62  ;;  %v2010_v54 = vpack.c.bf16 %v1511_v26, %v1511_v26  ;;  %2482 = vrcp.f32 %v1326_v59  ;;  %v1327_v30 = vadd.f32 1.0, %v2463_v6  ;;  %v1959_v44 = vmul.f32 -1.442695, %v2900_v12 }
 0x147   : > { %1669 = vst.msk [vmem:[%s2790_s5 + $0x30] sm:$0xf] %vm1656_vm2, %v2007_v55  ;;  %v2008_v29 = vpack.c.bf16 %v1509_v3, %v1509_v3  ;;  %2484 = vrcp.f32 %v1324_v46  ;;  %v1325_v63 = vadd.f32 1.0, %v2465_v14  ;;  %v2467_v37 = vpop.eup %2466  ;;  %v2916_v27 = vadd.f32 %v2258_v24, %v2224_v40 }
 0x148   : > { %1672 = vst.msk [vmem:[%s2790_s5 + $0x3c] sm:$0xf] %vm1656_vm2, %v2010_v54  ;;  %2486 = vrcp.f32 %v1327_v30  ;;  %v2918_v15 = vadd.f32 %v1164_v8, %v837_v18  ;;  %v1418_v22 = vmul.f32 %v2467_v37, %v2798_v17  ;;  %v1957_v23 = vmul.f32 -1.442695, %v2911_v34  ;;  %v2103_v30 = vld [vmem:[%s2714_s29 + $0x68] sm:$0xff]   ;;  %v2102_v37 = vld [vmem:[%s2714_s29 + $0x60] sm:$0xff]  }
 0x149   : > { %v2469_v16 = vpop.eup %2468  ;;  %1670 = vst.msk [vmem:[%s2790_s5 + $0x34] sm:$0xf] %vm1656_vm2, %v2008_v29  ;;  %2488 = vrcp.f32 %v1325_v63  ;;  %v1960_v39 = vmul.f32 -1.442695, %v2916_v27  ;;  %v2069_v21 = vunpack.c.l.bf16 %v2100_v19  ;;  %v2074_v62 = vunpack.c.h.bf16 %v2101_v41 }
 0x14a   : > { %v2471_v0 = vpop.eup %2470  ;;  %v1416_v11 = vmul.f32 %v2469_v16, %v2802_v2  ;;  %2490 = vpow2.f32 %v1959_v44  ;;  %v1958_v51 = vmul.f32 -1.442695, %v2918_v15  ;;  %v1514_v28 = vadd.f32 %v2065_v56, %v1418_v22 }
 0x14b   : > { %v2473_v10 = vpop.eup %2472  ;;  %v1419_v17 = vmul.f32 %v2471_v0, %v2811_v38  ;;  %2492 = vpow2.f32 %v1957_v23  ;;  %v2070_v24 = vunpack.c.h.bf16 %v2100_v19 }
 0x14c   : > { %v2475_v33 = vpop.eup %2474  ;;  %v1512_v35 = vadd.f32 %v2061_v5, %v1416_v11  ;;  %v1417_v2 = vmul.f32 %v2473_v10, %v2817_v7  ;;  %2494 = vpow2.f32 %v1960_v39  ;;  %v2013_v49 = vpack.c.bf16 %v1514_v28, %v1514_v28 }
 0x14d   : > { %v2477_v47 = vpop.eup %2476  ;;  %v1515_v13 = vadd.f32 %v2066_v50, %v1419_v17  ;;  %v1330_v9 = vadd.f32 1.0, %v2475_v33  ;;  %2496 = vpow2.f32 %v1958_v51  ;;  %v2073_v7 = vunpack.c.l.bf16 %v2101_v41 }
 0x14e   : > { %v2479_v31 = vpop.eup %2478  ;;  %v2011_v56 = vpack.c.bf16 %v1512_v35, %v1512_v35  ;;  %v1513_v38 = vadd.f32 %v2062_v60, %v1417_v2  ;;  %v1328_v52 = vadd.f32 1.0, %v2477_v47  ;;  %1675 = vst.msk [vmem:[%s2790_s5 + $0x48] sm:$0xf] %vm1656_vm2, %v2013_v49  ;;  %v2081_v60 = vunpack.c.l.bf16 %v2103_v30 }
 0x14f   : > { %v2481_v53 = vpop.eup %2480  ;;  %v2014_v4 = vpack.c.bf16 %v1515_v13, %v1515_v13  ;;  %2498 = vrcp.f32 %v1330_v9  ;;  %v1331_v5 = vadd.f32 1.0, %v2479_v31  ;;  %v2077_v11 = vunpack.c.l.bf16 %v2102_v37  ;;  %v2105_v13 = vld [vmem:[%s2714_s29 + $0x78] sm:$0xff]  }
 0x150   : > { %v2483_v36 = vpop.eup %2482  ;;  %1673 = vst.msk [vmem:[%s2790_s5 + $0x40] sm:$0xf] %vm1656_vm2, %v2011_v56  ;;  %v2012_v20 = vpack.c.bf16 %v1513_v38, %v1513_v38  ;;  %2500 = vrcp.f32 %v1328_v52  ;;  %v1329_v61 = vadd.f32 1.0, %v2481_v53  ;;  %v2082_v10 = vunpack.c.h.bf16 %v2103_v30 }
 0x151   : > { %v2485_v40 = vpop.eup %2484  ;;  %1676 = vst.msk [vmem:[%s2790_s5 + $0x4c] sm:$0xf] %vm1656_vm2, %v2014_v4  ;;  %v1422_v45 = vmul.f32 %v2483_v36, %v2833_v25  ;;  %2502 = vrcp.f32 %v1331_v5  ;;  %v2078_v33 = vunpack.c.h.bf16 %v2102_v37  ;;  %v2089_v38 = vunpack.c.l.bf16 %v2105_v13 }
 0x152   : > { %v2487_v26 = vpop.eup %2486  ;;  %1674 = vst.msk [vmem:[%s2790_s5 + $0x44] sm:$0xf] %vm1656_vm2, %v2012_v20  ;;  %v1420_v59 = vmul.f32 %v2485_v40, %v2837_v57  ;;  %2504 = vrcp.f32 %v1329_v61 }
 0x153   : > { %v2489_v18 = vpop.eup %2488  ;;  %v1518_v6 = vadd.f32 %v2073_v7, %v1422_v45  ;;  %v1423_v55 = vmul.f32 %v2487_v26, %v2845_v58  ;;  %v2090_v7 = vunpack.c.h.bf16 %v2105_v13 }
 0x154   : > { %v2491_v3 = vpop.eup %2490  ;;  %v1516_v46 = vadd.f32 %v2069_v21, %v1420_v59  ;;  %v1421_v25 = vmul.f32 %v2489_v18, %v2847_v32 }
 0x155   : > { %v2493_v8 = vpop.eup %2492  ;;  %v2017_v14 = vpack.c.bf16 %v1518_v6, %v1518_v6  ;;  %v1519_v54 = vadd.f32 %v2074_v62, %v1423_v55  ;;  %v1334_v44 = vadd.f32 1.0, %v2491_v3 }
 0x156   : > { %v2495_v29 = vpop.eup %2494  ;;  %v2015_v57 = vpack.c.bf16 %v1516_v46, %v1516_v46  ;;  %v1517_v63 = vadd.f32 %v2070_v24, %v1421_v25  ;;  %v1332_v50 = vadd.f32 1.0, %v2493_v8 }
 0x157   : > { %v2497_v16 = vpop.eup %2496  ;;  %1679 = vst.msk [vmem:[%s2790_s5 + $0x58] sm:$0xf] %vm1656_vm2, %v2017_v14  ;;  %v2018_v58 = vpack.c.bf16 %v1519_v54, %v1519_v54  ;;  %2506 = vrcp.f32 %v1334_v44  ;;  %v1335_v22 = vadd.f32 1.0, %v2495_v29 }
 0x158   : > { %1677 = vst.msk [vmem:[%s2790_s5 + $0x50] sm:$0xf] %vm1656_vm2, %v2015_v57  ;;  %v2016_v32 = vpack.c.bf16 %v1517_v63, %v1517_v63  ;;  %2508 = vrcp.f32 %v1332_v50  ;;  %v1333_v23 = vadd.f32 1.0, %v2497_v16 }
 0x159   : > { %v2499_v0 = vpop.eup %2498  ;;  %1680 = vst.msk [vmem:[%s2790_s5 + $0x5c] sm:$0xf] %vm1656_vm2, %v2018_v58  ;;  %2510 = vrcp.f32 %v1335_v22 }
 0x15a   : > { %v2501_v39 = vpop.eup %2500  ;;  %1678 = vst.msk [vmem:[%s2790_s5 + $0x54] sm:$0xf] %vm1656_vm2, %v2016_v32  ;;  %v1426_v51 = vmul.f32 %v2499_v0, %v2864_v1  ;;  %2512 = vrcp.f32 %v1333_v23  ;;  %v2104_v1 = vld [vmem:[%s2714_s29 + $0x70] sm:$0xff]  }
 0x15b   : > { %v2503_v28 = vpop.eup %2502  ;;  %v1424_v17 = vmul.f32 %v2501_v39, %v2876_v48  ;;  %v2086_v20 = vunpack.c.h.bf16 %v2104_v1 }
 0x15c   : > { %v2505_v35 = vpop.eup %2504  ;;  %v1522_v2 = vadd.f32 %v2081_v60, %v1426_v51  ;;  %v1427_v41 = vmul.f32 %v2503_v28, %v2880_v42  ;;  %v2085_v42 = vunpack.c.l.bf16 %v2104_v1 }
 0x15d   : > { %v1520_v47 = vadd.f32 %v2077_v11, %v1424_v17  ;;  %v1425_v49 = vmul.f32 %v2505_v35, %v2886_v43 }
 0x15e   : > { %v2021_v19 = vpack.c.bf16 %v1522_v2, %v1522_v2  ;;  %v1523_v9 = vadd.f32 %v2082_v10, %v1427_v41 }
 0x15f   : > { %v2019_v31 = vpack.c.bf16 %v1520_v47, %v1520_v47  ;;  %v1521_v56 = vadd.f32 %v2078_v33, %v1425_v49 }
 0x160   : > { %1683 = vst.msk [vmem:[%s2790_s5 + $0x68] sm:$0xf] %vm1656_vm2, %v2021_v19  ;;  %v2022_v48 = vpack.c.bf16 %v1523_v9, %v1523_v9 }
 0x161   : > { %v2507_v52 = vpop.eup %2506  ;;  %1681 = vst.msk [vmem:[%s2790_s5 + $0x60] sm:$0xf] %vm1656_vm2, %v2019_v31  ;;  %v2020_v53 = vpack.c.bf16 %v1521_v56, %v1521_v56 }
 0x162   : > { %v2509_v4 = vpop.eup %2508  ;;  %1684 = vst.msk [vmem:[%s2790_s5 + $0x6c] sm:$0xf] %vm1656_vm2, %v2022_v48  ;;  %v1430_v43 = vmul.f32 %v2507_v52, %v2900_v12 }
 0x163   : > { %v2511_v5 = vpop.eup %2510  ;;  %1682 = vst.msk [vmem:[%s2790_s5 + $0x64] sm:$0xf] %vm1656_vm2, %v2020_v53  ;;  %v1428_v36 = vmul.f32 %v2509_v4, %v2911_v34 }
 0x164   : > { %v2513_v21 = vpop.eup %2512  ;;  %v1526_v61 = vadd.f32 %v2089_v38, %v1430_v43  ;;  %v1431_v40 = vmul.f32 %v2511_v5, %v2916_v27 }
 0x165   : > { %v1524_v45 = vadd.f32 %v2085_v42, %v1428_v36  ;;  %v1429_v62 = vmul.f32 %v2513_v21, %v2918_v15 }
 0x166   : > { %v2025_v26 = vpack.c.bf16 %v1526_v61, %v1526_v61  ;;  %v1527_v59 = vadd.f32 %v2090_v7, %v1431_v40 }
 0x167   : > { %v2023_v12 = vpack.c.bf16 %v1524_v45, %v1524_v45  ;;  %v1525_v24 = vadd.f32 %v2086_v20, %v1429_v62 }
 0x168   : > { %1687 = vst.msk [vmem:[%s2790_s5 + $0x78] sm:$0xf] %vm1656_vm2, %v2025_v26  ;;  %v2026_v18 = vpack.c.bf16 %v1527_v59, %v1527_v59 }
 0x169   : > { %1685 = vst.msk [vmem:[%s2790_s5 + $0x70] sm:$0xf] %vm1656_vm2, %v2023_v12  ;;  %v2024_v6 = vpack.c.bf16 %v1525_v24, %v1525_v24 }
 0x16a   : > { %1688 = vst.msk [vmem:[%s2790_s5 + $0x7c] sm:$0xf] %vm1656_vm2, %v2026_v18 }
 0x16b   : > { %1686 = vst.msk [vmem:[%s2790_s5 + $0x74] sm:$0xf] %vm1656_vm2, %v2024_v6 }
 0x16c PF: > { %s13_s12 = sadd.s32 1, %s2520_s12  }
 0x16d   : > { %p10_p5 = scmp.ge.s32.totalorder %s13_s12, 4  }
 0x16f   :  { %12 = sbr.rel (!%p10_p5) target bundleno = 1 (0x1), region = 69 }

</bundles_post_ra>
